<compile_context>
chip_gen: v7x
topology: tpu7x:2x2x1
jax: 0.10.0
libtpu: 0.0.40
codegen_flags: <defaults>
</compile_context>

<pallas_src>
import jax
import jax.numpy as jnp
from jax.experimental import pallas as pl
from jax.experimental.pallas import tpu as pltpu

NEG = -1e30  # "minus infinity" for masked max / masked softmax


# ----------------------------- fused Pallas kernel -------------------------

def _make_fused_kernel(cfg, n_nodes):
    L, T = cfg['n_layers'], cfg['netypes']
    t_srcs, t_tgts = cfg['t_srcs'], cfg['t_tgts']

    def mm(a, b):
        # MXU matmul: bf16 inputs, f32 accumulation.
        return jnp.dot(a.astype(jnp.bfloat16), b.astype(jnp.bfloat16),
                       preferred_element_type=jnp.float32)

    def kernel(*refs):
        it = iter(refs)
        oh_cl = next(it); cc = next(it); oh_al = next(it); ac = next(it)
        g_src = [next(it) for _ in range(T)]      # (E, n_src) one-hot gather mats
        dst_neg = [next(it) for _ in range(T)]    # (n_dst, E, 1): 0 on edge, -1e30 off
        self_f = [next(it) for _ in range(T)]     # (E, 1) self-edge flag
        enc_cl_w = next(it); enc_cc_w = next(it); enc_cc_b = next(it)
        enc_al_w = next(it); enc_ac_w = next(it); enc_ac_b = next(it)
        emb_test_w = next(it)
        w_tgt_all = next(it); w_src_all = next(it)
        b_all = next(it); emb_all = next(it)
        dec_w = next(it); dec_b = next(it); class_neg = next(it)
        out_logit = [next(it) for _ in range(3)]
        out_prob = [next(it) for _ in range(3)]

        hp = emb_test_w.shape[1]

        # --- encoders (embedding lookups as one-hot MXU matmuls) -------------
        x0 = mm(oh_cl[...], enc_cl_w[...]) + mm(cc[...], enc_cc_w[...]) + enc_cc_b[...]
        x1 = mm(oh_al[...], enc_al_w[...]) + mm(ac[...], enc_ac_w[...]) + enc_ac_b[...]
        # emb_test has a single row; index is necessarily 0 -> broadcast row.
        x2 = jnp.zeros((n_nodes[2], hp), jnp.float32) + emb_test_w[...]
        xs = [x0, x1, x2]

        # --- message-passing layers (everything VMEM-resident) ---------------
        for l in range(L):
            out = [jnp.zeros_like(x) for x in xs]
            for j in range(T):
                ts, tt = t_srcs[j], t_tgts[j]
                idx = l * T + j
                t_dst = mm(xs[tt], w_tgt_all[idx])       # lin_tgt(x_dst) (n_tt, hp)
                t_src = mm(xs[ts], w_src_all[idx])       # lin_src(x_src) (n_ts, hp)
                emb = emb_all[idx]                       # (2, hp)
                # target-independent part of the per-edge message:
                #   lin_src(x_j) + emb_self_edge(src == dst)
                x_j = mm(g_src[j][...], t_src)           # gather via MXU -> (E, hp)
                m = (x_j + emb[0:1, :]
                     + self_f[j][...] * (emb[1:2, :] - emb[0:1, :]))
                # vectorized segment max over destinations:
                #   seg[d] = max_e ( m[e] + (0 if dst_e == d else -1e30) )
                seg = jnp.max(dst_neg[j][...] + m[None, :, :], axis=1)   # (n_tt, hp)
                # relu(lin_tgt(x_i) + bias + seg); isolated nodes -> relu(-1e30)=0,
                # identical to relu(segment_max(msg)) of the reference.
                out[tt] = out[tt] + jnp.maximum(t_dst + b_all[idx] + seg, 0.0)
            xs = [jnp.maximum(o, 0.0) for o in out]

        # --- decode + softmax (padded class columns masked to -1e30) ---------
        for t in range(3):
            logits = mm(xs[t], dec_w[...]) + dec_b[...]
            out_logit[t][...] = logits
            lm = logits + class_neg[...]
            mx = jnp.max(lm, axis=1, keepdims=True)
            ex = jnp.exp(lm - mx)
            den = jnp.sum(ex, axis=1, keepdims=True)
            out_prob[t][...] = ex * pl.reciprocal(den, approx=True)

    return kernel


# ----------------------------- model wrapper -------------------------------

def mpnn_model_forward(params, xs_in, ess, cfg):
    cl_idx, cc_feat, al_idx, ac_feat, test_idx = xs_in
    h = cfg['dim_h']; C = cfg['n_classes']
    L, T = cfg['n_layers'], cfg['netypes']
    n0, n1, n2 = cc_feat.shape[0], ac_feat.shape[0], test_idx.shape[0]
    n_nodes = (n0, n1, n2)

    HP = ((h + 127) // 128) * 128      # lane-dense hidden width
    CP = ((C + 127) // 128) * 128      # lane-dense class width

    f32 = jnp.float32

    def pad_cols(x, to):
        return jnp.pad(x, ((0, 0),) * (x.ndim - 1) + ((0, to - x.shape[-1],),))

    def pad2(w):
        return jnp.pad(w, ((0, HP - w.shape[0]), (0, HP - w.shape[1])))

    # --- padded / stacked parameters (zero padding keeps padded lanes at 0) --
    enc_cl_w = pad_cols(params['enc_cl_w'], HP)
    enc_cc_w = pad_cols(params['enc_cc_w'], HP)
    enc_cc_b = pad_cols(params['enc_cc_b'].reshape(1, -1), HP)
    enc_al_w = pad_cols(params['enc_al_w'], HP)
    enc_ac_w = pad_cols(params['enc_ac_w'], HP)
    enc_ac_b = pad_cols(params['enc_ac_b'].reshape(1, -1), HP)
    emb_test_w = pad_cols(params['emb_test_w'], HP)

    w_tgt_all = jnp.stack([pad2(params['mpnns'][l][j]['w_tgt'])
                           for l in range(L) for j in range(T)]).astype(jnp.bfloat16)
    w_src_all = jnp.stack([pad2(params['mpnns'][l][j]['w_src'])
                           for l in range(L) for j in range(T)]).astype(jnp.bfloat16)
    b_all = jnp.stack([pad_cols((params['mpnns'][l][j]['b_tgt']
                                 + params['mpnns'][l][j]['b_src']).reshape(1, -1), HP)
                       for l in range(L) for j in range(T)])
    emb_all = jnp.stack([pad_cols(params['mpnns'][l][j]['emb_self_edge'], HP)
                         for l in range(L) for j in range(T)])

    dec_w = jnp.pad(params['decode_w'], ((0, HP - h), (0, CP - C))).astype(jnp.bfloat16)
    dec_b = pad_cols(params['decode_b'].reshape(1, -1), CP)
    class_neg = jnp.where(jnp.arange(CP) < C, 0.0, NEG).astype(f32)[None, :]

    # --- structural (layer-independent) edge matrices, built once ------------
    n_cl = params['enc_cl_w'].shape[0]
    n_al = params['enc_al_w'].shape[0]
    oh_cl = (cl_idx.astype(jnp.int32)[:, None]
             == jnp.arange(n_cl, dtype=jnp.int32)[None, :]).astype(f32)
    oh_al = (al_idx.astype(jnp.int32)[:, None]
             == jnp.arange(n_al, dtype=jnp.int32)[None, :]).astype(f32)

    g_srcs, dst_negs, self_fs = [], [], []
    for j, es in enumerate(ess):
        src = es[0].astype(jnp.int32)
        dst = es[1].astype(jnp.int32)
        n_src = n_nodes[cfg['t_srcs'][j]]
        n_dst = n_nodes[cfg['t_tgts'][j]]
        g_srcs.append((src[:, None]
                       == jnp.arange(n_src, dtype=jnp.int32)[None, :]).astype(f32))
        dst_negs.append(jnp.where(
            dst[None, :] == jnp.arange(n_dst, dtype=jnp.int32)[:, None],
            0.0, NEG).astype(f32)[:, :, None])
        self_fs.append((src == dst).astype(f32)[:, None])

    operands = ([oh_cl, cc_feat.astype(f32), oh_al, ac_feat.astype(f32)]
                + g_srcs + dst_negs + self_fs
                + [enc_cl_w, enc_cc_w, enc_cc_b,
                   enc_al_w, enc_ac_w, enc_ac_b, emb_test_w,
                   w_tgt_all, w_src_all, b_all, emb_all,
                   dec_w, dec_b, class_neg])

    vmem = pl.BlockSpec(memory_space=pltpu.MemorySpace.VMEM)
    out_shape = (tuple(jax.ShapeDtypeStruct((n, CP), f32) for n in n_nodes)
                 + tuple(jax.ShapeDtypeStruct((n, CP), f32) for n in n_nodes))

    outs = pl.pallas_call(
        _make_fused_kernel(cfg, n_nodes),
        out_shape=out_shape,
        in_specs=[vmem] * len(operands),
        out_specs=tuple([vmem] * 6),
    )(*operands)

    lasts = [o[:, :C] for o in outs[:3]]
    probs = [o[:, :C] for o in outs[3:]]
    return lasts, probs


# ------------------- pure-JAX reference (sanity check) ---------------------

def ref_forward(params, xs_in, ess, cfg):
    cl_idx, cc_feat, al_idx, ac_feat, test_idx = xs_in
    xs = [
        params['enc_cl_w'][cl_idx] + cc_feat @ params['enc_cc_w'] + params['enc_cc_b'],
        params['enc_al_w'][al_idx] + ac_feat @ params['enc_ac_w'] + params['enc_ac_b'],
        params['emb_test_w'][test_idx],
    ]

    def mpnn_ref(x_src, x_dst, es, p):
        src, dst = es[0], es[1]
        msg = (x_dst[dst] @ p['w_tgt'] + p['b_tgt']
               + x_src[src] @ p['w_src'] + p['b_src']
               + p['emb_self_edge'][(dst == src).astype(jnp.int32)])
        agg = jax.ops.segment_max(msg, dst, num_segments=x_dst.shape[0])
        return jnp.maximum(agg, 0.0)   # relu; -inf (empty segments) -> 0

    for i in range(cfg['n_layers']):
        out = [jnp.zeros_like(x) for x in xs]
        for j, (es, ts, tt) in enumerate(zip(ess, cfg['t_srcs'], cfg['t_tgts'])):
            out[tt] = out[tt] + mpnn_ref(xs[ts], xs[tt], es, params['mpnns'][i][j])
        xs = [jnp.maximum(o, 0.0) for o in out]
    lasts = [x @ params['decode_w'] + params['decode_b'] for x in xs]
    probs = [jax.nn.softmax(l, axis=1) for l in lasts]
    return lasts, probs


def init_params(key, cfg):
    h = cfg['dim_h']

    def nrm(k, shape, scale=0.1):
        return scale * jax.random.normal(k, shape, jnp.float32)

    keys = iter(jax.random.split(key, 16 + cfg['n_layers'] * cfg['netypes'] * 5))
    p = dict(
        enc_cl_w=nrm(next(keys), (cfg['n_cl'], h)),       # nn.Embedding(n_cl, dim_h)
        enc_cc_w=nrm(next(keys), (cfg['dim_cc'], h)),     # nn.Linear(dim_cc, dim_h)
        enc_cc_b=nrm(next(keys), (h,)),
        enc_al_w=nrm(next(keys), (cfg['n_al'], h)),
        enc_ac_w=nrm(next(keys), (cfg['dim_ac'], h)),
        enc_ac_b=nrm(next(keys), (h,)),
        emb_test_w=nrm(next(keys), (1, h)),
        decode_w=nrm(next(keys), (h, cfg['n_classes'])),
        decode_b=nrm(next(keys), (cfg['n_classes'],)),
    )
    mpnns = []
    for _ in range(cfg['n_layers']):
        layer = []
        for _ in range(cfg['netypes']):
            layer.append(dict(
                w_tgt=nrm(next(keys), (h, h)),
                b_tgt=nrm(next(keys), (h,)),
                w_src=nrm(next(keys), (h, h)),
                b_src=nrm(next(keys), (h,)),
                emb_self_edge=nrm(next(keys), (2, h)),
            ))
        mpnns.append(layer)
    p['mpnns'] = mpnns
    return p


if __name__ == "__main__":
    cfg = dict(n_cl=10, dim_cc=8, dim_h=32, netypes=4,
               t_srcs=(0, 1, 2, 1), t_tgts=(1, 0, 0, 2),
               n_al=6, dim_ac=8, n_layers=2, n_classes=3)
    n_nodes = (16, 12, 8)   # node types: (cl/cc, al/ac, test)
    n_edges = 24

    key = jax.random.PRNGKey(0)
    kp, kd = jax.random.split(key)
    params = init_params(kp, cfg)

    ks = jax.random.split(kd, 8)
    cl_idx = jax.random.randint(ks[0], (n_nodes[0],), 0, cfg['n_cl'], dtype=jnp.int32)
    cc_feat = 0.1 * jax.random.normal(ks[1], (n_nodes[0], cfg['dim_cc']), jnp.float32)
    al_idx = jax.random.randint(ks[2], (n_nodes[1],), 0, cfg['n_al'], dtype=jnp.int32)
    ac_feat = 0.1 * jax.random.normal(ks[3], (n_nodes[1], cfg['dim_ac']), jnp.float32)
    test_idx = jnp.zeros((n_nodes[2],), jnp.int32)
    xs_in = [cl_idx, cc_feat, al_idx, ac_feat, test_idx]

    ess = []
    for j, (ts, tt) in enumerate(zip(cfg['t_srcs'], cfg['t_tgts'])):
        ksrc, kdst = jax.random.split(jax.random.fold_in(ks[4], j))
        src = jax.random.randint(ksrc, (n_edges,), 0, n_nodes[ts], dtype=jnp.int32)
        dst = jax.random.randint(kdst, (n_edges,), 0, n_nodes[tt], dtype=jnp.int32)
        ess.append(jnp.stack([src, dst]))

    lasts, probs = mpnn_model_forward(params, xs_in, ess, cfg)
    jax.block_until_ready(lasts)
    jax.block_until_ready(probs)

    ref_lasts, ref_probs = ref_forward(params, xs_in, ess, cfg)
    for a, b in zip(lasts + probs, ref_lasts + ref_probs):
        assert a.shape == b.shape
        # bf16 MXU inputs (f32 accumulate) -> small numerical drift vs f32 ref
        assert jnp.allclose(a, b, atol=2e-2, rtol=2e-2), "mismatch vs JAX reference"

    print("KERNEL_OK")
</pallas_src>

<mosaic_0001>
module attributes {stable_mosaic.version = 11 : i64} {
  func.func @kernel(%arg0: memref<16x10xf32, #tpu.memory_space<vmem>>, %arg1: memref<16x8xf32, #tpu.memory_space<vmem>>, %arg2: memref<12x6xf32, #tpu.memory_space<vmem>>, %arg3: memref<12x8xf32, #tpu.memory_space<vmem>>, %arg4: memref<24x16xf32, #tpu.memory_space<vmem>>, %arg5: memref<24x12xf32, #tpu.memory_space<vmem>>, %arg6: memref<24x8xf32, #tpu.memory_space<vmem>>, %arg7: memref<24x12xf32, #tpu.memory_space<vmem>>, %arg8: memref<12x24x1xf32, #tpu.memory_space<vmem>>, %arg9: memref<16x24x1xf32, #tpu.memory_space<vmem>>, %arg10: memref<16x24x1xf32, #tpu.memory_space<vmem>>, %arg11: memref<8x24x1xf32, #tpu.memory_space<vmem>>, %arg12: memref<24x1xf32, #tpu.memory_space<vmem>>, %arg13: memref<24x1xf32, #tpu.memory_space<vmem>>, %arg14: memref<24x1xf32, #tpu.memory_space<vmem>>, %arg15: memref<24x1xf32, #tpu.memory_space<vmem>>, %arg16: memref<10x128xf32, #tpu.memory_space<vmem>>, %arg17: memref<8x128xf32, #tpu.memory_space<vmem>>, %arg18: memref<1x128xf32, #tpu.memory_space<vmem>>, %arg19: memref<6x128xf32, #tpu.memory_space<vmem>>, %arg20: memref<8x128xf32, #tpu.memory_space<vmem>>, %arg21: memref<1x128xf32, #tpu.memory_space<vmem>>, %arg22: memref<1x128xf32, #tpu.memory_space<vmem>>, %arg23: memref<8x128x128xbf16, #tpu.memory_space<vmem>>, %arg24: memref<8x128x128xbf16, #tpu.memory_space<vmem>>, %arg25: memref<8x1x128xf32, #tpu.memory_space<vmem>>, %arg26: memref<8x2x128xf32, #tpu.memory_space<vmem>>, %arg27: memref<128x128xbf16, #tpu.memory_space<vmem>>, %arg28: memref<1x128xf32, #tpu.memory_space<vmem>>, %arg29: memref<1x128xf32, #tpu.memory_space<vmem>>, %arg30: memref<16x128xf32, #tpu.memory_space<vmem>>, %arg31: memref<12x128xf32, #tpu.memory_space<vmem>>, %arg32: memref<8x128xf32, #tpu.memory_space<vmem>>, %arg33: memref<16x128xf32, #tpu.memory_space<vmem>>, %arg34: memref<12x128xf32, #tpu.memory_space<vmem>>, %arg35: memref<8x128xf32, #tpu.memory_space<vmem>>) attributes {dimension_semantics = [], scalar_prefetch = 0 : i64, scratch_operands = 0 : i64, tpu.core_type = #tpu.core_type<tc>} {
    %c0 = arith.constant 0 : index
    %c0_0 = arith.constant 0 : index
    %0 = vector.load %arg0[%c0, %c0_0] : memref<16x10xf32, #tpu.memory_space<vmem>>, vector<16x10xf32>
    %c0_1 = arith.constant 0 : index
    %c0_2 = arith.constant 0 : index
    %1 = vector.load %arg16[%c0_1, %c0_2] : memref<10x128xf32, #tpu.memory_space<vmem>>, vector<10x128xf32>
    %2 = arith.truncf %0 : vector<16x10xf32> to vector<16x10xbf16>
    %3 = arith.truncf %1 : vector<10x128xf32> to vector<10x128xbf16>
    %cst = arith.constant dense<0.000000e+00> : vector<16x128xf32>
    %4 = tpu.matmul %2, %3, %cst {dimension_numbers = #tpu.dot_dimension_numbers<[1], [0], [0], [1], [0, 0, 1, 1], [], []>} : vector<16x10xbf16>, vector<10x128xbf16>, vector<16x128xf32> -> vector<16x128xf32>
    %c0_3 = arith.constant 0 : index
    %c0_4 = arith.constant 0 : index
    %5 = vector.load %arg1[%c0_3, %c0_4] : memref<16x8xf32, #tpu.memory_space<vmem>>, vector<16x8xf32>
    %c0_5 = arith.constant 0 : index
    %c0_6 = arith.constant 0 : index
    %6 = vector.load %arg17[%c0_5, %c0_6] : memref<8x128xf32, #tpu.memory_space<vmem>>, vector<8x128xf32>
    %7 = arith.truncf %5 : vector<16x8xf32> to vector<16x8xbf16>
    %8 = arith.truncf %6 : vector<8x128xf32> to vector<8x128xbf16>
    %cst_7 = arith.constant dense<0.000000e+00> : vector<16x128xf32>
    %9 = tpu.matmul %7, %8, %cst_7 {dimension_numbers = #tpu.dot_dimension_numbers<[1], [0], [0], [1], [0, 0, 1, 1], [], []>} : vector<16x8xbf16>, vector<8x128xbf16>, vector<16x128xf32> -> vector<16x128xf32>
    %10 = arith.addf %4, %9 : vector<16x128xf32>
    %c0_8 = arith.constant 0 : index
    %c0_9 = arith.constant 0 : index
    %11 = vector.load %arg18[%c0_8, %c0_9] : memref<1x128xf32, #tpu.memory_space<vmem>>, vector<1x128xf32>
    %12 = vector.broadcast %11 : vector<1x128xf32> to vector<16x128xf32>
    %13 = arith.addf %10, %12 : vector<16x128xf32>
    %c0_10 = arith.constant 0 : index
    %c0_11 = arith.constant 0 : index
    %14 = vector.load %arg2[%c0_10, %c0_11] : memref<12x6xf32, #tpu.memory_space<vmem>>, vector<12x6xf32>
    %c0_12 = arith.constant 0 : index
    %c0_13 = arith.constant 0 : index
    %15 = vector.load %arg19[%c0_12, %c0_13] : memref<6x128xf32, #tpu.memory_space<vmem>>, vector<6x128xf32>
    %16 = arith.truncf %14 : vector<12x6xf32> to vector<12x6xbf16>
    %17 = arith.truncf %15 : vector<6x128xf32> to vector<6x128xbf16>
    %cst_14 = arith.constant dense<0.000000e+00> : vector<12x128xf32>
    %18 = tpu.matmul %16, %17, %cst_14 {dimension_numbers = #tpu.dot_dimension_numbers<[1], [0], [0], [1], [0, 0, 1, 1], [], []>} : vector<12x6xbf16>, vector<6x128xbf16>, vector<12x128xf32> -> vector<12x128xf32>
    %c0_15 = arith.constant 0 : index
    %c0_16 = arith.constant 0 : index
    %19 = vector.load %arg3[%c0_15, %c0_16] : memref<12x8xf32, #tpu.memory_space<vmem>>, vector<12x8xf32>
    %c0_17 = arith.constant 0 : index
    %c0_18 = arith.constant 0 : index
    %20 = vector.load %arg20[%c0_17, %c0_18] : memref<8x128xf32, #tpu.memory_space<vmem>>, vector<8x128xf32>
    %21 = arith.truncf %19 : vector<12x8xf32> to vector<12x8xbf16>
    %22 = arith.truncf %20 : vector<8x128xf32> to vector<8x128xbf16>
    %cst_19 = arith.constant dense<0.000000e+00> : vector<12x128xf32>
    %23 = tpu.matmul %21, %22, %cst_19 {dimension_numbers = #tpu.dot_dimension_numbers<[1], [0], [0], [1], [0, 0, 1, 1], [], []>} : vector<12x8xbf16>, vector<8x128xbf16>, vector<12x128xf32> -> vector<12x128xf32>
    %24 = arith.addf %18, %23 : vector<12x128xf32>
    %c0_20 = arith.constant 0 : index
    %c0_21 = arith.constant 0 : index
    %25 = vector.load %arg21[%c0_20, %c0_21] : memref<1x128xf32, #tpu.memory_space<vmem>>, vector<1x128xf32>
    %26 = vector.broadcast %25 : vector<1x128xf32> to vector<12x128xf32>
    %27 = arith.addf %24, %26 : vector<12x128xf32>
    %cst_22 = arith.constant 0.000000e+00 : f32
    %28 = vector.broadcast %cst_22 : f32 to vector<8x128xf32>
    %c0_23 = arith.constant 0 : index
    %c0_24 = arith.constant 0 : index
    %29 = vector.load %arg22[%c0_23, %c0_24] : memref<1x128xf32, #tpu.memory_space<vmem>>, vector<1x128xf32>
    %30 = vector.broadcast %29 : vector<1x128xf32> to vector<8x128xf32>
    %31 = arith.addf %28, %30 : vector<8x128xf32>
    %cst_25 = arith.constant 0.000000e+00 : f32
    %32 = vector.broadcast %cst_25 : f32 to vector<16x128xf32>
    %cst_26 = arith.constant 0.000000e+00 : f32
    %33 = vector.broadcast %cst_26 : f32 to vector<12x128xf32>
    %cst_27 = arith.constant 0.000000e+00 : f32
    %34 = vector.broadcast %cst_27 : f32 to vector<8x128xf32>
    %c0_28 = arith.constant 0 : index
    %c0_29 = arith.constant 0 : index
    %c0_30 = arith.constant 0 : index
    %35 = vector.load %arg23[%c0_28, %c0_29, %c0_30] : memref<8x128x128xbf16, #tpu.memory_space<vmem>>, vector<1x128x128xbf16>
    %36 = vector.shape_cast %35 : vector<1x128x128xbf16> to vector<128x128xbf16>
    %37 = arith.truncf %27 : vector<12x128xf32> to vector<12x128xbf16>
    %cst_31 = arith.constant dense<0.000000e+00> : vector<12x128xf32>
    %38 = tpu.matmul %37, %36, %cst_31 {dimension_numbers = #tpu.dot_dimension_numbers<[1], [0], [0], [1], [0, 0, 1, 1], [], []>} : vector<12x128xbf16>, vector<128x128xbf16>, vector<12x128xf32> -> vector<12x128xf32>
    %c0_32 = arith.constant 0 : index
    %c0_33 = arith.constant 0 : index
    %c0_34 = arith.constant 0 : index
    %39 = vector.load %arg24[%c0_32, %c0_33, %c0_34] : memref<8x128x128xbf16, #tpu.memory_space<vmem>>, vector<1x128x128xbf16>
    %40 = vector.shape_cast %39 : vector<1x128x128xbf16> to vector<128x128xbf16>
    %41 = arith.truncf %13 : vector<16x128xf32> to vector<16x128xbf16>
    %cst_35 = arith.constant dense<0.000000e+00> : vector<16x128xf32>
    %42 = tpu.matmul %41, %40, %cst_35 {dimension_numbers = #tpu.dot_dimension_numbers<[1], [0], [0], [1], [0, 0, 1, 1], [], []>} : vector<16x128xbf16>, vector<128x128xbf16>, vector<16x128xf32> -> vector<16x128xf32>
    %c0_36 = arith.constant 0 : index
    %c0_37 = arith.constant 0 : index
    %c0_38 = arith.constant 0 : index
    %43 = vector.load %arg26[%c0_36, %c0_37, %c0_38] : memref<8x2x128xf32, #tpu.memory_space<vmem>>, vector<1x2x128xf32>
    %44 = vector.shape_cast %43 : vector<1x2x128xf32> to vector<2x128xf32>
    %c0_39 = arith.constant 0 : index
    %c0_40 = arith.constant 0 : index
    %45 = vector.load %arg4[%c0_39, %c0_40] : memref<24x16xf32, #tpu.memory_space<vmem>>, vector<24x16xf32>
    %46 = arith.truncf %45 : vector<24x16xf32> to vector<24x16xbf16>
    %47 = arith.truncf %42 : vector<16x128xf32> to vector<16x128xbf16>
    %cst_41 = arith.constant dense<0.000000e+00> : vector<24x128xf32>
    %48 = tpu.matmul %46, %47, %cst_41 {dimension_numbers = #tpu.dot_dimension_numbers<[1], [0], [0], [1], [0, 0, 1, 1], [], []>} : vector<24x16xbf16>, vector<16x128xbf16>, vector<24x128xf32> -> vector<24x128xf32>
    %49 = vector.extract_strided_slice %44 {offsets = [0, 0], sizes = [1, 128], strides = [1, 1]} : vector<2x128xf32> to vector<1x128xf32>
    %50 = vector.broadcast %49 : vector<1x128xf32> to vector<24x128xf32>
    %51 = arith.addf %48, %50 : vector<24x128xf32>
    %c0_42 = arith.constant 0 : index
    %c0_43 = arith.constant 0 : index
    %52 = vector.load %arg12[%c0_42, %c0_43] : memref<24x1xf32, #tpu.memory_space<vmem>>, vector<24x1xf32>
    %53 = vector.extract_strided_slice %44 {offsets = [1, 0], sizes = [1, 128], strides = [1, 1]} : vector<2x128xf32> to vector<1x128xf32>
    %54 = vector.extract_strided_slice %44 {offsets = [0, 0], sizes = [1, 128], strides = [1, 1]} : vector<2x128xf32> to vector<1x128xf32>
    %55 = arith.subf %53, %54 : vector<1x128xf32>
    %56 = vector.broadcast %52 : vector<24x1xf32> to vector<24x128xf32>
    %57 = vector.broadcast %55 : vector<1x128xf32> to vector<24x128xf32>
    %58 = arith.mulf %56, %57 : vector<24x128xf32>
    %59 = arith.addf %51, %58 : vector<24x128xf32>
    %c0_44 = arith.constant 0 : index
    %c0_45 = arith.constant 0 : index
    %c0_46 = arith.constant 0 : index
    %60 = vector.load %arg8[%c0_44, %c0_45, %c0_46] : memref<12x24x1xf32, #tpu.memory_space<vmem>>, vector<12x24x1xf32>
    %61 = vector.shape_cast %59 : vector<24x128xf32> to vector<1x24x128xf32>
    %62 = vector.broadcast %60 : vector<12x24x1xf32> to vector<12x24x128xf32>
    %63 = vector.broadcast %61 : vector<1x24x128xf32> to vector<12x24x128xf32>
    %64 = arith.addf %62, %63 : vector<12x24x128xf32>
    %cst_47 = arith.constant dense<0xFF800000> : vector<12x128xf32>
    %65 = vector.multi_reduction <maximumf>, %64, %cst_47 [1] : vector<12x24x128xf32> to vector<12x128xf32>
    %c0_48 = arith.constant 0 : index
    %c0_49 = arith.constant 0 : index
    %c0_50 = arith.constant 0 : index
    %66 = vector.load %arg25[%c0_48, %c0_49, %c0_50] : memref<8x1x128xf32, #tpu.memory_space<vmem>>, vector<1x1x128xf32>
    %67 = vector.shape_cast %66 : vector<1x1x128xf32> to vector<1x128xf32>
    %68 = vector.broadcast %67 : vector<1x128xf32> to vector<12x128xf32>
    %69 = arith.addf %38, %68 : vector<12x128xf32>
    %70 = arith.addf %69, %65 : vector<12x128xf32>
    %cst_51 = arith.constant 0.000000e+00 : f32
    %71 = vector.broadcast %cst_51 : f32 to vector<12x128xf32>
    %72 = arith.maximumf %70, %71 : vector<12x128xf32>
    %73 = arith.addf %33, %72 : vector<12x128xf32>
    %c1 = arith.constant 1 : index
    %c0_52 = arith.constant 0 : index
    %c0_53 = arith.constant 0 : index
    %74 = vector.load %arg23[%c1, %c0_52, %c0_53] : memref<8x128x128xbf16, #tpu.memory_space<vmem>>, vector<1x128x128xbf16>
    %75 = vector.shape_cast %74 : vector<1x128x128xbf16> to vector<128x128xbf16>
    %76 = arith.truncf %13 : vector<16x128xf32> to vector<16x128xbf16>
    %cst_54 = arith.constant dense<0.000000e+00> : vector<16x128xf32>
    %77 = tpu.matmul %76, %75, %cst_54 {dimension_numbers = #tpu.dot_dimension_numbers<[1], [0], [0], [1], [0, 0, 1, 1], [], []>} : vector<16x128xbf16>, vector<128x128xbf16>, vector<16x128xf32> -> vector<16x128xf32>
    %c1_55 = arith.constant 1 : index
    %c0_56 = arith.constant 0 : index
    %c0_57 = arith.constant 0 : index
    %78 = vector.load %arg24[%c1_55, %c0_56, %c0_57] : memref<8x128x128xbf16, #tpu.memory_space<vmem>>, vector<1x128x128xbf16>
    %79 = vector.shape_cast %78 : vector<1x128x128xbf16> to vector<128x128xbf16>
    %80 = arith.truncf %27 : vector<12x128xf32> to vector<12x128xbf16>
    %cst_58 = arith.constant dense<0.000000e+00> : vector<12x128xf32>
    %81 = tpu.matmul %80, %79, %cst_58 {dimension_numbers = #tpu.dot_dimension_numbers<[1], [0], [0], [1], [0, 0, 1, 1], [], []>} : vector<12x128xbf16>, vector<128x128xbf16>, vector<12x128xf32> -> vector<12x128xf32>
    %c1_59 = arith.constant 1 : index
    %c0_60 = arith.constant 0 : index
    %c0_61 = arith.constant 0 : index
    %82 = vector.load %arg26[%c1_59, %c0_60, %c0_61] : memref<8x2x128xf32, #tpu.memory_space<vmem>>, vector<1x2x128xf32>
    %83 = vector.shape_cast %82 : vector<1x2x128xf32> to vector<2x128xf32>
    %c0_62 = arith.constant 0 : index
    %c0_63 = arith.constant 0 : index
    %84 = vector.load %arg5[%c0_62, %c0_63] : memref<24x12xf32, #tpu.memory_space<vmem>>, vector<24x12xf32>
    %85 = arith.truncf %84 : vector<24x12xf32> to vector<24x12xbf16>
    %86 = arith.truncf %81 : vector<12x128xf32> to vector<12x128xbf16>
    %cst_64 = arith.constant dense<0.000000e+00> : vector<24x128xf32>
    %87 = tpu.matmul %85, %86, %cst_64 {dimension_numbers = #tpu.dot_dimension_numbers<[1], [0], [0], [1], [0, 0, 1, 1], [], []>} : vector<24x12xbf16>, vector<12x128xbf16>, vector<24x128xf32> -> vector<24x128xf32>
    %88 = vector.extract_strided_slice %83 {offsets = [0, 0], sizes = [1, 128], strides = [1, 1]} : vector<2x128xf32> to vector<1x128xf32>
    %89 = vector.broadcast %88 : vector<1x128xf32> to vector<24x128xf32>
    %90 = arith.addf %87, %89 : vector<24x128xf32>
    %c0_65 = arith.constant 0 : index
    %c0_66 = arith.constant 0 : index
    %91 = vector.load %arg13[%c0_65, %c0_66] : memref<24x1xf32, #tpu.memory_space<vmem>>, vector<24x1xf32>
    %92 = vector.extract_strided_slice %83 {offsets = [1, 0], sizes = [1, 128], strides = [1, 1]} : vector<2x128xf32> to vector<1x128xf32>
    %93 = vector.extract_strided_slice %83 {offsets = [0, 0], sizes = [1, 128], strides = [1, 1]} : vector<2x128xf32> to vector<1x128xf32>
    %94 = arith.subf %92, %93 : vector<1x128xf32>
    %95 = vector.broadcast %91 : vector<24x1xf32> to vector<24x128xf32>
    %96 = vector.broadcast %94 : vector<1x128xf32> to vector<24x128xf32>
    %97 = arith.mulf %95, %96 : vector<24x128xf32>
    %98 = arith.addf %90, %97 : vector<24x128xf32>
    %c0_67 = arith.constant 0 : index
    %c0_68 = arith.constant 0 : index
    %c0_69 = arith.constant 0 : index
    %99 = vector.load %arg9[%c0_67, %c0_68, %c0_69] : memref<16x24x1xf32, #tpu.memory_space<vmem>>, vector<16x24x1xf32>
    %100 = vector.shape_cast %98 : vector<24x128xf32> to vector<1x24x128xf32>
    %101 = vector.broadcast %99 : vector<16x24x1xf32> to vector<16x24x128xf32>
    %102 = vector.broadcast %100 : vector<1x24x128xf32> to vector<16x24x128xf32>
    %103 = arith.addf %101, %102 : vector<16x24x128xf32>
    %cst_70 = arith.constant dense<0xFF800000> : vector<16x128xf32>
    %104 = vector.multi_reduction <maximumf>, %103, %cst_70 [1] : vector<16x24x128xf32> to vector<16x128xf32>
    %c1_71 = arith.constant 1 : index
    %c0_72 = arith.constant 0 : index
    %c0_73 = arith.constant 0 : index
    %105 = vector.load %arg25[%c1_71, %c0_72, %c0_73] : memref<8x1x128xf32, #tpu.memory_space<vmem>>, vector<1x1x128xf32>
    %106 = vector.shape_cast %105 : vector<1x1x128xf32> to vector<1x128xf32>
    %107 = vector.broadcast %106 : vector<1x128xf32> to vector<16x128xf32>
    %108 = arith.addf %77, %107 : vector<16x128xf32>
    %109 = arith.addf %108, %104 : vector<16x128xf32>
    %cst_74 = arith.constant 0.000000e+00 : f32
    %110 = vector.broadcast %cst_74 : f32 to vector<16x128xf32>
    %111 = arith.maximumf %109, %110 : vector<16x128xf32>
    %112 = arith.addf %32, %111 : vector<16x128xf32>
    %c2 = arith.constant 2 : index
    %c0_75 = arith.constant 0 : index
    %c0_76 = arith.constant 0 : index
    %113 = vector.load %arg23[%c2, %c0_75, %c0_76] : memref<8x128x128xbf16, #tpu.memory_space<vmem>>, vector<1x128x128xbf16>
    %114 = vector.shape_cast %113 : vector<1x128x128xbf16> to vector<128x128xbf16>
    %115 = arith.truncf %13 : vector<16x128xf32> to vector<16x128xbf16>
    %cst_77 = arith.constant dense<0.000000e+00> : vector<16x128xf32>
    %116 = tpu.matmul %115, %114, %cst_77 {dimension_numbers = #tpu.dot_dimension_numbers<[1], [0], [0], [1], [0, 0, 1, 1], [], []>} : vector<16x128xbf16>, vector<128x128xbf16>, vector<16x128xf32> -> vector<16x128xf32>
    %c2_78 = arith.constant 2 : index
    %c0_79 = arith.constant 0 : index
    %c0_80 = arith.constant 0 : index
    %117 = vector.load %arg24[%c2_78, %c0_79, %c0_80] : memref<8x128x128xbf16, #tpu.memory_space<vmem>>, vector<1x128x128xbf16>
    %118 = vector.shape_cast %117 : vector<1x128x128xbf16> to vector<128x128xbf16>
    %119 = arith.truncf %31 : vector<8x128xf32> to vector<8x128xbf16>
    %cst_81 = arith.constant dense<0.000000e+00> : vector<8x128xf32>
    %120 = tpu.matmul %119, %118, %cst_81 {dimension_numbers = #tpu.dot_dimension_numbers<[1], [0], [0], [1], [0, 0, 1, 1], [], []>} : vector<8x128xbf16>, vector<128x128xbf16>, vector<8x128xf32> -> vector<8x128xf32>
    %c2_82 = arith.constant 2 : index
    %c0_83 = arith.constant 0 : index
    %c0_84 = arith.constant 0 : index
    %121 = vector.load %arg26[%c2_82, %c0_83, %c0_84] : memref<8x2x128xf32, #tpu.memory_space<vmem>>, vector<1x2x128xf32>
    %122 = vector.shape_cast %121 : vector<1x2x128xf32> to vector<2x128xf32>
    %c0_85 = arith.constant 0 : index
    %c0_86 = arith.constant 0 : index
    %123 = vector.load %arg6[%c0_85, %c0_86] : memref<24x8xf32, #tpu.memory_space<vmem>>, vector<24x8xf32>
    %124 = arith.truncf %123 : vector<24x8xf32> to vector<24x8xbf16>
    %125 = arith.truncf %120 : vector<8x128xf32> to vector<8x128xbf16>
    %cst_87 = arith.constant dense<0.000000e+00> : vector<24x128xf32>
    %126 = tpu.matmul %124, %125, %cst_87 {dimension_numbers = #tpu.dot_dimension_numbers<[1], [0], [0], [1], [0, 0, 1, 1], [], []>} : vector<24x8xbf16>, vector<8x128xbf16>, vector<24x128xf32> -> vector<24x128xf32>
    %127 = vector.extract_strided_slice %122 {offsets = [0, 0], sizes = [1, 128], strides = [1, 1]} : vector<2x128xf32> to vector<1x128xf32>
    %128 = vector.broadcast %127 : vector<1x128xf32> to vector<24x128xf32>
    %129 = arith.addf %126, %128 : vector<24x128xf32>
    %c0_88 = arith.constant 0 : index
    %c0_89 = arith.constant 0 : index
    %130 = vector.load %arg14[%c0_88, %c0_89] : memref<24x1xf32, #tpu.memory_space<vmem>>, vector<24x1xf32>
    %131 = vector.extract_strided_slice %122 {offsets = [1, 0], sizes = [1, 128], strides = [1, 1]} : vector<2x128xf32> to vector<1x128xf32>
    %132 = vector.extract_strided_slice %122 {offsets = [0, 0], sizes = [1, 128], strides = [1, 1]} : vector<2x128xf32> to vector<1x128xf32>
    %133 = arith.subf %131, %132 : vector<1x128xf32>
    %134 = vector.broadcast %130 : vector<24x1xf32> to vector<24x128xf32>
    %135 = vector.broadcast %133 : vector<1x128xf32> to vector<24x128xf32>
    %136 = arith.mulf %134, %135 : vector<24x128xf32>
    %137 = arith.addf %129, %136 : vector<24x128xf32>
    %c0_90 = arith.constant 0 : index
    %c0_91 = arith.constant 0 : index
    %c0_92 = arith.constant 0 : index
    %138 = vector.load %arg10[%c0_90, %c0_91, %c0_92] : memref<16x24x1xf32, #tpu.memory_space<vmem>>, vector<16x24x1xf32>
    %139 = vector.shape_cast %137 : vector<24x128xf32> to vector<1x24x128xf32>
    %140 = vector.broadcast %138 : vector<16x24x1xf32> to vector<16x24x128xf32>
    %141 = vector.broadcast %139 : vector<1x24x128xf32> to vector<16x24x128xf32>
    %142 = arith.addf %140, %141 : vector<16x24x128xf32>
    %cst_93 = arith.constant dense<0xFF800000> : vector<16x128xf32>
    %143 = vector.multi_reduction <maximumf>, %142, %cst_93 [1] : vector<16x24x128xf32> to vector<16x128xf32>
    %c2_94 = arith.constant 2 : index
    %c0_95 = arith.constant 0 : index
    %c0_96 = arith.constant 0 : index
    %144 = vector.load %arg25[%c2_94, %c0_95, %c0_96] : memref<8x1x128xf32, #tpu.memory_space<vmem>>, vector<1x1x128xf32>
    %145 = vector.shape_cast %144 : vector<1x1x128xf32> to vector<1x128xf32>
    %146 = vector.broadcast %145 : vector<1x128xf32> to vector<16x128xf32>
    %147 = arith.addf %116, %146 : vector<16x128xf32>
    %148 = arith.addf %147, %143 : vector<16x128xf32>
    %cst_97 = arith.constant 0.000000e+00 : f32
    %149 = vector.broadcast %cst_97 : f32 to vector<16x128xf32>
    %150 = arith.maximumf %148, %149 : vector<16x128xf32>
    %151 = arith.addf %112, %150 : vector<16x128xf32>
    %c3 = arith.constant 3 : index
    %c0_98 = arith.constant 0 : index
    %c0_99 = arith.constant 0 : index
    %152 = vector.load %arg23[%c3, %c0_98, %c0_99] : memref<8x128x128xbf16, #tpu.memory_space<vmem>>, vector<1x128x128xbf16>
    %153 = vector.shape_cast %152 : vector<1x128x128xbf16> to vector<128x128xbf16>
    %154 = arith.truncf %31 : vector<8x128xf32> to vector<8x128xbf16>
    %cst_100 = arith.constant dense<0.000000e+00> : vector<8x128xf32>
    %155 = tpu.matmul %154, %153, %cst_100 {dimension_numbers = #tpu.dot_dimension_numbers<[1], [0], [0], [1], [0, 0, 1, 1], [], []>} : vector<8x128xbf16>, vector<128x128xbf16>, vector<8x128xf32> -> vector<8x128xf32>
    %c3_101 = arith.constant 3 : index
    %c0_102 = arith.constant 0 : index
    %c0_103 = arith.constant 0 : index
    %156 = vector.load %arg24[%c3_101, %c0_102, %c0_103] : memref<8x128x128xbf16, #tpu.memory_space<vmem>>, vector<1x128x128xbf16>
    %157 = vector.shape_cast %156 : vector<1x128x128xbf16> to vector<128x128xbf16>
    %158 = arith.truncf %27 : vector<12x128xf32> to vector<12x128xbf16>
    %cst_104 = arith.constant dense<0.000000e+00> : vector<12x128xf32>
    %159 = tpu.matmul %158, %157, %cst_104 {dimension_numbers = #tpu.dot_dimension_numbers<[1], [0], [0], [1], [0, 0, 1, 1], [], []>} : vector<12x128xbf16>, vector<128x128xbf16>, vector<12x128xf32> -> vector<12x128xf32>
    %c3_105 = arith.constant 3 : index
    %c0_106 = arith.constant 0 : index
    %c0_107 = arith.constant 0 : index
    %160 = vector.load %arg26[%c3_105, %c0_106, %c0_107] : memref<8x2x128xf32, #tpu.memory_space<vmem>>, vector<1x2x128xf32>
    %161 = vector.shape_cast %160 : vector<1x2x128xf32> to vector<2x128xf32>
    %c0_108 = arith.constant 0 : index
    %c0_109 = arith.constant 0 : index
    %162 = vector.load %arg7[%c0_108, %c0_109] : memref<24x12xf32, #tpu.memory_space<vmem>>, vector<24x12xf32>
    %163 = arith.truncf %162 : vector<24x12xf32> to vector<24x12xbf16>
    %164 = arith.truncf %159 : vector<12x128xf32> to vector<12x128xbf16>
    %cst_110 = arith.constant dense<0.000000e+00> : vector<24x128xf32>
    %165 = tpu.matmul %163, %164, %cst_110 {dimension_numbers = #tpu.dot_dimension_numbers<[1], [0], [0], [1], [0, 0, 1, 1], [], []>} : vector<24x12xbf16>, vector<12x128xbf16>, vector<24x128xf32> -> vector<24x128xf32>
    %166 = vector.extract_strided_slice %161 {offsets = [0, 0], sizes = [1, 128], strides = [1, 1]} : vector<2x128xf32> to vector<1x128xf32>
    %167 = vector.broadcast %166 : vector<1x128xf32> to vector<24x128xf32>
    %168 = arith.addf %165, %167 : vector<24x128xf32>
    %c0_111 = arith.constant 0 : index
    %c0_112 = arith.constant 0 : index
    %169 = vector.load %arg15[%c0_111, %c0_112] : memref<24x1xf32, #tpu.memory_space<vmem>>, vector<24x1xf32>
    %170 = vector.extract_strided_slice %161 {offsets = [1, 0], sizes = [1, 128], strides = [1, 1]} : vector<2x128xf32> to vector<1x128xf32>
    %171 = vector.extract_strided_slice %161 {offsets = [0, 0], sizes = [1, 128], strides = [1, 1]} : vector<2x128xf32> to vector<1x128xf32>
    %172 = arith.subf %170, %171 : vector<1x128xf32>
    %173 = vector.broadcast %169 : vector<24x1xf32> to vector<24x128xf32>
    %174 = vector.broadcast %172 : vector<1x128xf32> to vector<24x128xf32>
    %175 = arith.mulf %173, %174 : vector<24x128xf32>
    %176 = arith.addf %168, %175 : vector<24x128xf32>
    %c0_113 = arith.constant 0 : index
    %c0_114 = arith.constant 0 : index
    %c0_115 = arith.constant 0 : index
    %177 = vector.load %arg11[%c0_113, %c0_114, %c0_115] : memref<8x24x1xf32, #tpu.memory_space<vmem>>, vector<8x24x1xf32>
    %178 = vector.shape_cast %176 : vector<24x128xf32> to vector<1x24x128xf32>
    %179 = vector.broadcast %177 : vector<8x24x1xf32> to vector<8x24x128xf32>
    %180 = vector.broadcast %178 : vector<1x24x128xf32> to vector<8x24x128xf32>
    %181 = arith.addf %179, %180 : vector<8x24x128xf32>
    %cst_116 = arith.constant dense<0xFF800000> : vector<8x128xf32>
    %182 = vector.multi_reduction <maximumf>, %181, %cst_116 [1] : vector<8x24x128xf32> to vector<8x128xf32>
    %c3_117 = arith.constant 3 : index
    %c0_118 = arith.constant 0 : index
    %c0_119 = arith.constant 0 : index
    %183 = vector.load %arg25[%c3_117, %c0_118, %c0_119] : memref<8x1x128xf32, #tpu.memory_space<vmem>>, vector<1x1x128xf32>
    %184 = vector.shape_cast %183 : vector<1x1x128xf32> to vector<1x128xf32>
    %185 = vector.broadcast %184 : vector<1x128xf32> to vector<8x128xf32>
    %186 = arith.addf %155, %185 : vector<8x128xf32>
    %187 = arith.addf %186, %182 : vector<8x128xf32>
    %cst_120 = arith.constant 0.000000e+00 : f32
    %188 = vector.broadcast %cst_120 : f32 to vector<8x128xf32>
    %189 = arith.maximumf %187, %188 : vector<8x128xf32>
    %190 = arith.addf %34, %189 : vector<8x128xf32>
    %cst_121 = arith.constant 0.000000e+00 : f32
    %191 = vector.broadcast %cst_121 : f32 to vector<16x128xf32>
    %192 = arith.maximumf %151, %191 : vector<16x128xf32>
    %cst_122 = arith.constant 0.000000e+00 : f32
    %193 = vector.broadcast %cst_122 : f32 to vector<12x128xf32>
    %194 = arith.maximumf %73, %193 : vector<12x128xf32>
    %cst_123 = arith.constant 0.000000e+00 : f32
    %195 = vector.broadcast %cst_123 : f32 to vector<8x128xf32>
    %196 = arith.maximumf %190, %195 : vector<8x128xf32>
    %cst_124 = arith.constant 0.000000e+00 : f32
    %197 = vector.broadcast %cst_124 : f32 to vector<16x128xf32>
    %cst_125 = arith.constant 0.000000e+00 : f32
    %198 = vector.broadcast %cst_125 : f32 to vector<12x128xf32>
    %cst_126 = arith.constant 0.000000e+00 : f32
    %199 = vector.broadcast %cst_126 : f32 to vector<8x128xf32>
    %c4 = arith.constant 4 : index
    %c0_127 = arith.constant 0 : index
    %c0_128 = arith.constant 0 : index
    %200 = vector.load %arg23[%c4, %c0_127, %c0_128] : memref<8x128x128xbf16, #tpu.memory_space<vmem>>, vector<1x128x128xbf16>
    %201 = vector.shape_cast %200 : vector<1x128x128xbf16> to vector<128x128xbf16>
    %202 = arith.truncf %194 : vector<12x128xf32> to vector<12x128xbf16>
    %cst_129 = arith.constant dense<0.000000e+00> : vector<12x128xf32>
    %203 = tpu.matmul %202, %201, %cst_129 {dimension_numbers = #tpu.dot_dimension_numbers<[1], [0], [0], [1], [0, 0, 1, 1], [], []>} : vector<12x128xbf16>, vector<128x128xbf16>, vector<12x128xf32> -> vector<12x128xf32>
    %c4_130 = arith.constant 4 : index
    %c0_131 = arith.constant 0 : index
    %c0_132 = arith.constant 0 : index
    %204 = vector.load %arg24[%c4_130, %c0_131, %c0_132] : memref<8x128x128xbf16, #tpu.memory_space<vmem>>, vector<1x128x128xbf16>
    %205 = vector.shape_cast %204 : vector<1x128x128xbf16> to vector<128x128xbf16>
    %206 = arith.truncf %192 : vector<16x128xf32> to vector<16x128xbf16>
    %cst_133 = arith.constant dense<0.000000e+00> : vector<16x128xf32>
    %207 = tpu.matmul %206, %205, %cst_133 {dimension_numbers = #tpu.dot_dimension_numbers<[1], [0], [0], [1], [0, 0, 1, 1], [], []>} : vector<16x128xbf16>, vector<128x128xbf16>, vector<16x128xf32> -> vector<16x128xf32>
    %c4_134 = arith.constant 4 : index
    %c0_135 = arith.constant 0 : index
    %c0_136 = arith.constant 0 : index
    %208 = vector.load %arg26[%c4_134, %c0_135, %c0_136] : memref<8x2x128xf32, #tpu.memory_space<vmem>>, vector<1x2x128xf32>
    %209 = vector.shape_cast %208 : vector<1x2x128xf32> to vector<2x128xf32>
    %c0_137 = arith.constant 0 : index
    %c0_138 = arith.constant 0 : index
    %210 = vector.load %arg4[%c0_137, %c0_138] : memref<24x16xf32, #tpu.memory_space<vmem>>, vector<24x16xf32>
    %211 = arith.truncf %210 : vector<24x16xf32> to vector<24x16xbf16>
    %212 = arith.truncf %207 : vector<16x128xf32> to vector<16x128xbf16>
    %cst_139 = arith.constant dense<0.000000e+00> : vector<24x128xf32>
    %213 = tpu.matmul %211, %212, %cst_139 {dimension_numbers = #tpu.dot_dimension_numbers<[1], [0], [0], [1], [0, 0, 1, 1], [], []>} : vector<24x16xbf16>, vector<16x128xbf16>, vector<24x128xf32> -> vector<24x128xf32>
    %214 = vector.extract_strided_slice %209 {offsets = [0, 0], sizes = [1, 128], strides = [1, 1]} : vector<2x128xf32> to vector<1x128xf32>
    %215 = vector.broadcast %214 : vector<1x128xf32> to vector<24x128xf32>
    %216 = arith.addf %213, %215 : vector<24x128xf32>
    %c0_140 = arith.constant 0 : index
    %c0_141 = arith.constant 0 : index
    %217 = vector.load %arg12[%c0_140, %c0_141] : memref<24x1xf32, #tpu.memory_space<vmem>>, vector<24x1xf32>
    %218 = vector.extract_strided_slice %209 {offsets = [1, 0], sizes = [1, 128], strides = [1, 1]} : vector<2x128xf32> to vector<1x128xf32>
    %219 = vector.extract_strided_slice %209 {offsets = [0, 0], sizes = [1, 128], strides = [1, 1]} : vector<2x128xf32> to vector<1x128xf32>
    %220 = arith.subf %218, %219 : vector<1x128xf32>
    %221 = vector.broadcast %217 : vector<24x1xf32> to vector<24x128xf32>
    %222 = vector.broadcast %220 : vector<1x128xf32> to vector<24x128xf32>
    %223 = arith.mulf %221, %222 : vector<24x128xf32>
    %224 = arith.addf %216, %223 : vector<24x128xf32>
    %c0_142 = arith.constant 0 : index
    %c0_143 = arith.constant 0 : index
    %c0_144 = arith.constant 0 : index
    %225 = vector.load %arg8[%c0_142, %c0_143, %c0_144] : memref<12x24x1xf32, #tpu.memory_space<vmem>>, vector<12x24x1xf32>
    %226 = vector.shape_cast %224 : vector<24x128xf32> to vector<1x24x128xf32>
    %227 = vector.broadcast %225 : vector<12x24x1xf32> to vector<12x24x128xf32>
    %228 = vector.broadcast %226 : vector<1x24x128xf32> to vector<12x24x128xf32>
    %229 = arith.addf %227, %228 : vector<12x24x128xf32>
    %cst_145 = arith.constant dense<0xFF800000> : vector<12x128xf32>
    %230 = vector.multi_reduction <maximumf>, %229, %cst_145 [1] : vector<12x24x128xf32> to vector<12x128xf32>
    %c4_146 = arith.constant 4 : index
    %c0_147 = arith.constant 0 : index
    %c0_148 = arith.constant 0 : index
    %231 = vector.load %arg25[%c4_146, %c0_147, %c0_148] : memref<8x1x128xf32, #tpu.memory_space<vmem>>, vector<1x1x128xf32>
    %232 = vector.shape_cast %231 : vector<1x1x128xf32> to vector<1x128xf32>
    %233 = vector.broadcast %232 : vector<1x128xf32> to vector<12x128xf32>
    %234 = arith.addf %203, %233 : vector<12x128xf32>
    %235 = arith.addf %234, %230 : vector<12x128xf32>
    %cst_149 = arith.constant 0.000000e+00 : f32
    %236 = vector.broadcast %cst_149 : f32 to vector<12x128xf32>
    %237 = arith.maximumf %235, %236 : vector<12x128xf32>
    %238 = arith.addf %198, %237 : vector<12x128xf32>
    %c5 = arith.constant 5 : index
    %c0_150 = arith.constant 0 : index
    %c0_151 = arith.constant 0 : index
    %239 = vector.load %arg23[%c5, %c0_150, %c0_151] : memref<8x128x128xbf16, #tpu.memory_space<vmem>>, vector<1x128x128xbf16>
    %240 = vector.shape_cast %239 : vector<1x128x128xbf16> to vector<128x128xbf16>
    %241 = arith.truncf %192 : vector<16x128xf32> to vector<16x128xbf16>
    %cst_152 = arith.constant dense<0.000000e+00> : vector<16x128xf32>
    %242 = tpu.matmul %241, %240, %cst_152 {dimension_numbers = #tpu.dot_dimension_numbers<[1], [0], [0], [1], [0, 0, 1, 1], [], []>} : vector<16x128xbf16>, vector<128x128xbf16>, vector<16x128xf32> -> vector<16x128xf32>
    %c5_153 = arith.constant 5 : index
    %c0_154 = arith.constant 0 : index
    %c0_155 = arith.constant 0 : index
    %243 = vector.load %arg24[%c5_153, %c0_154, %c0_155] : memref<8x128x128xbf16, #tpu.memory_space<vmem>>, vector<1x128x128xbf16>
    %244 = vector.shape_cast %243 : vector<1x128x128xbf16> to vector<128x128xbf16>
    %245 = arith.truncf %194 : vector<12x128xf32> to vector<12x128xbf16>
    %cst_156 = arith.constant dense<0.000000e+00> : vector<12x128xf32>
    %246 = tpu.matmul %245, %244, %cst_156 {dimension_numbers = #tpu.dot_dimension_numbers<[1], [0], [0], [1], [0, 0, 1, 1], [], []>} : vector<12x128xbf16>, vector<128x128xbf16>, vector<12x128xf32> -> vector<12x128xf32>
    %c5_157 = arith.constant 5 : index
    %c0_158 = arith.constant 0 : index
    %c0_159 = arith.constant 0 : index
    %247 = vector.load %arg26[%c5_157, %c0_158, %c0_159] : memref<8x2x128xf32, #tpu.memory_space<vmem>>, vector<1x2x128xf32>
    %248 = vector.shape_cast %247 : vector<1x2x128xf32> to vector<2x128xf32>
    %c0_160 = arith.constant 0 : index
    %c0_161 = arith.constant 0 : index
    %249 = vector.load %arg5[%c0_160, %c0_161] : memref<24x12xf32, #tpu.memory_space<vmem>>, vector<24x12xf32>
    %250 = arith.truncf %249 : vector<24x12xf32> to vector<24x12xbf16>
    %251 = arith.truncf %246 : vector<12x128xf32> to vector<12x128xbf16>
    %cst_162 = arith.constant dense<0.000000e+00> : vector<24x128xf32>
    %252 = tpu.matmul %250, %251, %cst_162 {dimension_numbers = #tpu.dot_dimension_numbers<[1], [0], [0], [1], [0, 0, 1, 1], [], []>} : vector<24x12xbf16>, vector<12x128xbf16>, vector<24x128xf32> -> vector<24x128xf32>
    %253 = vector.extract_strided_slice %248 {offsets = [0, 0], sizes = [1, 128], strides = [1, 1]} : vector<2x128xf32> to vector<1x128xf32>
    %254 = vector.broadcast %253 : vector<1x128xf32> to vector<24x128xf32>
    %255 = arith.addf %252, %254 : vector<24x128xf32>
    %c0_163 = arith.constant 0 : index
    %c0_164 = arith.constant 0 : index
    %256 = vector.load %arg13[%c0_163, %c0_164] : memref<24x1xf32, #tpu.memory_space<vmem>>, vector<24x1xf32>
    %257 = vector.extract_strided_slice %248 {offsets = [1, 0], sizes = [1, 128], strides = [1, 1]} : vector<2x128xf32> to vector<1x128xf32>
    %258 = vector.extract_strided_slice %248 {offsets = [0, 0], sizes = [1, 128], strides = [1, 1]} : vector<2x128xf32> to vector<1x128xf32>
    %259 = arith.subf %257, %258 : vector<1x128xf32>
    %260 = vector.broadcast %256 : vector<24x1xf32> to vector<24x128xf32>
    %261 = vector.broadcast %259 : vector<1x128xf32> to vector<24x128xf32>
    %262 = arith.mulf %260, %261 : vector<24x128xf32>
    %263 = arith.addf %255, %262 : vector<24x128xf32>
    %c0_165 = arith.constant 0 : index
    %c0_166 = arith.constant 0 : index
    %c0_167 = arith.constant 0 : index
    %264 = vector.load %arg9[%c0_165, %c0_166, %c0_167] : memref<16x24x1xf32, #tpu.memory_space<vmem>>, vector<16x24x1xf32>
    %265 = vector.shape_cast %263 : vector<24x128xf32> to vector<1x24x128xf32>
    %266 = vector.broadcast %264 : vector<16x24x1xf32> to vector<16x24x128xf32>
    %267 = vector.broadcast %265 : vector<1x24x128xf32> to vector<16x24x128xf32>
    %268 = arith.addf %266, %267 : vector<16x24x128xf32>
    %cst_168 = arith.constant dense<0xFF800000> : vector<16x128xf32>
    %269 = vector.multi_reduction <maximumf>, %268, %cst_168 [1] : vector<16x24x128xf32> to vector<16x128xf32>
    %c5_169 = arith.constant 5 : index
    %c0_170 = arith.constant 0 : index
    %c0_171 = arith.constant 0 : index
    %270 = vector.load %arg25[%c5_169, %c0_170, %c0_171] : memref<8x1x128xf32, #tpu.memory_space<vmem>>, vector<1x1x128xf32>
    %271 = vector.shape_cast %270 : vector<1x1x128xf32> to vector<1x128xf32>
    %272 = vector.broadcast %271 : vector<1x128xf32> to vector<16x128xf32>
    %273 = arith.addf %242, %272 : vector<16x128xf32>
    %274 = arith.addf %273, %269 : vector<16x128xf32>
    %cst_172 = arith.constant 0.000000e+00 : f32
    %275 = vector.broadcast %cst_172 : f32 to vector<16x128xf32>
    %276 = arith.maximumf %274, %275 : vector<16x128xf32>
    %277 = arith.addf %197, %276 : vector<16x128xf32>
    %c6 = arith.constant 6 : index
    %c0_173 = arith.constant 0 : index
    %c0_174 = arith.constant 0 : index
    %278 = vector.load %arg23[%c6, %c0_173, %c0_174] : memref<8x128x128xbf16, #tpu.memory_space<vmem>>, vector<1x128x128xbf16>
    %279 = vector.shape_cast %278 : vector<1x128x128xbf16> to vector<128x128xbf16>
    %280 = arith.truncf %192 : vector<16x128xf32> to vector<16x128xbf16>
    %cst_175 = arith.constant dense<0.000000e+00> : vector<16x128xf32>
    %281 = tpu.matmul %280, %279, %cst_175 {dimension_numbers = #tpu.dot_dimension_numbers<[1], [0], [0], [1], [0, 0, 1, 1], [], []>} : vector<16x128xbf16>, vector<128x128xbf16>, vector<16x128xf32> -> vector<16x128xf32>
    %c6_176 = arith.constant 6 : index
    %c0_177 = arith.constant 0 : index
    %c0_178 = arith.constant 0 : index
    %282 = vector.load %arg24[%c6_176, %c0_177, %c0_178] : memref<8x128x128xbf16, #tpu.memory_space<vmem>>, vector<1x128x128xbf16>
    %283 = vector.shape_cast %282 : vector<1x128x128xbf16> to vector<128x128xbf16>
    %284 = arith.truncf %196 : vector<8x128xf32> to vector<8x128xbf16>
    %cst_179 = arith.constant dense<0.000000e+00> : vector<8x128xf32>
    %285 = tpu.matmul %284, %283, %cst_179 {dimension_numbers = #tpu.dot_dimension_numbers<[1], [0], [0], [1], [0, 0, 1, 1], [], []>} : vector<8x128xbf16>, vector<128x128xbf16>, vector<8x128xf32> -> vector<8x128xf32>
    %c6_180 = arith.constant 6 : index
    %c0_181 = arith.constant 0 : index
    %c0_182 = arith.constant 0 : index
    %286 = vector.load %arg26[%c6_180, %c0_181, %c0_182] : memref<8x2x128xf32, #tpu.memory_space<vmem>>, vector<1x2x128xf32>
    %287 = vector.shape_cast %286 : vector<1x2x128xf32> to vector<2x128xf32>
    %c0_183 = arith.constant 0 : index
    %c0_184 = arith.constant 0 : index
    %288 = vector.load %arg6[%c0_183, %c0_184] : memref<24x8xf32, #tpu.memory_space<vmem>>, vector<24x8xf32>
    %289 = arith.truncf %288 : vector<24x8xf32> to vector<24x8xbf16>
    %290 = arith.truncf %285 : vector<8x128xf32> to vector<8x128xbf16>
    %cst_185 = arith.constant dense<0.000000e+00> : vector<24x128xf32>
    %291 = tpu.matmul %289, %290, %cst_185 {dimension_numbers = #tpu.dot_dimension_numbers<[1], [0], [0], [1], [0, 0, 1, 1], [], []>} : vector<24x8xbf16>, vector<8x128xbf16>, vector<24x128xf32> -> vector<24x128xf32>
    %292 = vector.extract_strided_slice %287 {offsets = [0, 0], sizes = [1, 128], strides = [1, 1]} : vector<2x128xf32> to vector<1x128xf32>
    %293 = vector.broadcast %292 : vector<1x128xf32> to vector<24x128xf32>
    %294 = arith.addf %291, %293 : vector<24x128xf32>
    %c0_186 = arith.constant 0 : index
    %c0_187 = arith.constant 0 : index
    %295 = vector.load %arg14[%c0_186, %c0_187] : memref<24x1xf32, #tpu.memory_space<vmem>>, vector<24x1xf32>
    %296 = vector.extract_strided_slice %287 {offsets = [1, 0], sizes = [1, 128], strides = [1, 1]} : vector<2x128xf32> to vector<1x128xf32>
    %297 = vector.extract_strided_slice %287 {offsets = [0, 0], sizes = [1, 128], strides = [1, 1]} : vector<2x128xf32> to vector<1x128xf32>
    %298 = arith.subf %296, %297 : vector<1x128xf32>
    %299 = vector.broadcast %295 : vector<24x1xf32> to vector<24x128xf32>
    %300 = vector.broadcast %298 : vector<1x128xf32> to vector<24x128xf32>
    %301 = arith.mulf %299, %300 : vector<24x128xf32>
    %302 = arith.addf %294, %301 : vector<24x128xf32>
    %c0_188 = arith.constant 0 : index
    %c0_189 = arith.constant 0 : index
    %c0_190 = arith.constant 0 : index
    %303 = vector.load %arg10[%c0_188, %c0_189, %c0_190] : memref<16x24x1xf32, #tpu.memory_space<vmem>>, vector<16x24x1xf32>
    %304 = vector.shape_cast %302 : vector<24x128xf32> to vector<1x24x128xf32>
    %305 = vector.broadcast %303 : vector<16x24x1xf32> to vector<16x24x128xf32>
    %306 = vector.broadcast %304 : vector<1x24x128xf32> to vector<16x24x128xf32>
    %307 = arith.addf %305, %306 : vector<16x24x128xf32>
    %cst_191 = arith.constant dense<0xFF800000> : vector<16x128xf32>
    %308 = vector.multi_reduction <maximumf>, %307, %cst_191 [1] : vector<16x24x128xf32> to vector<16x128xf32>
    %c6_192 = arith.constant 6 : index
    %c0_193 = arith.constant 0 : index
    %c0_194 = arith.constant 0 : index
    %309 = vector.load %arg25[%c6_192, %c0_193, %c0_194] : memref<8x1x128xf32, #tpu.memory_space<vmem>>, vector<1x1x128xf32>
    %310 = vector.shape_cast %309 : vector<1x1x128xf32> to vector<1x128xf32>
    %311 = vector.broadcast %310 : vector<1x128xf32> to vector<16x128xf32>
    %312 = arith.addf %281, %311 : vector<16x128xf32>
    %313 = arith.addf %312, %308 : vector<16x128xf32>
    %cst_195 = arith.constant 0.000000e+00 : f32
    %314 = vector.broadcast %cst_195 : f32 to vector<16x128xf32>
    %315 = arith.maximumf %313, %314 : vector<16x128xf32>
    %316 = arith.addf %277, %315 : vector<16x128xf32>
    %c7 = arith.constant 7 : index
    %c0_196 = arith.constant 0 : index
    %c0_197 = arith.constant 0 : index
    %317 = vector.load %arg23[%c7, %c0_196, %c0_197] : memref<8x128x128xbf16, #tpu.memory_space<vmem>>, vector<1x128x128xbf16>
    %318 = vector.shape_cast %317 : vector<1x128x128xbf16> to vector<128x128xbf16>
    %319 = arith.truncf %196 : vector<8x128xf32> to vector<8x128xbf16>
    %cst_198 = arith.constant dense<0.000000e+00> : vector<8x128xf32>
    %320 = tpu.matmul %319, %318, %cst_198 {dimension_numbers = #tpu.dot_dimension_numbers<[1], [0], [0], [1], [0, 0, 1, 1], [], []>} : vector<8x128xbf16>, vector<128x128xbf16>, vector<8x128xf32> -> vector<8x128xf32>
    %c7_199 = arith.constant 7 : index
    %c0_200 = arith.constant 0 : index
    %c0_201 = arith.constant 0 : index
    %321 = vector.load %arg24[%c7_199, %c0_200, %c0_201] : memref<8x128x128xbf16, #tpu.memory_space<vmem>>, vector<1x128x128xbf16>
    %322 = vector.shape_cast %321 : vector<1x128x128xbf16> to vector<128x128xbf16>
    %323 = arith.truncf %194 : vector<12x128xf32> to vector<12x128xbf16>
    %cst_202 = arith.constant dense<0.000000e+00> : vector<12x128xf32>
    %324 = tpu.matmul %323, %322, %cst_202 {dimension_numbers = #tpu.dot_dimension_numbers<[1], [0], [0], [1], [0, 0, 1, 1], [], []>} : vector<12x128xbf16>, vector<128x128xbf16>, vector<12x128xf32> -> vector<12x128xf32>
    %c7_203 = arith.constant 7 : index
    %c0_204 = arith.constant 0 : index
    %c0_205 = arith.constant 0 : index
    %325 = vector.load %arg26[%c7_203, %c0_204, %c0_205] : memref<8x2x128xf32, #tpu.memory_space<vmem>>, vector<1x2x128xf32>
    %326 = vector.shape_cast %325 : vector<1x2x128xf32> to vector<2x128xf32>
    %c0_206 = arith.constant 0 : index
    %c0_207 = arith.constant 0 : index
    %327 = vector.load %arg7[%c0_206, %c0_207] : memref<24x12xf32, #tpu.memory_space<vmem>>, vector<24x12xf32>
    %328 = arith.truncf %327 : vector<24x12xf32> to vector<24x12xbf16>
    %329 = arith.truncf %324 : vector<12x128xf32> to vector<12x128xbf16>
    %cst_208 = arith.constant dense<0.000000e+00> : vector<24x128xf32>
    %330 = tpu.matmul %328, %329, %cst_208 {dimension_numbers = #tpu.dot_dimension_numbers<[1], [0], [0], [1], [0, 0, 1, 1], [], []>} : vector<24x12xbf16>, vector<12x128xbf16>, vector<24x128xf32> -> vector<24x128xf32>
    %331 = vector.extract_strided_slice %326 {offsets = [0, 0], sizes = [1, 128], strides = [1, 1]} : vector<2x128xf32> to vector<1x128xf32>
    %332 = vector.broadcast %331 : vector<1x128xf32> to vector<24x128xf32>
    %333 = arith.addf %330, %332 : vector<24x128xf32>
    %c0_209 = arith.constant 0 : index
    %c0_210 = arith.constant 0 : index
    %334 = vector.load %arg15[%c0_209, %c0_210] : memref<24x1xf32, #tpu.memory_space<vmem>>, vector<24x1xf32>
    %335 = vector.extract_strided_slice %326 {offsets = [1, 0], sizes = [1, 128], strides = [1, 1]} : vector<2x128xf32> to vector<1x128xf32>
    %336 = vector.extract_strided_slice %326 {offsets = [0, 0], sizes = [1, 128], strides = [1, 1]} : vector<2x128xf32> to vector<1x128xf32>
    %337 = arith.subf %335, %336 : vector<1x128xf32>
    %338 = vector.broadcast %334 : vector<24x1xf32> to vector<24x128xf32>
    %339 = vector.broadcast %337 : vector<1x128xf32> to vector<24x128xf32>
    %340 = arith.mulf %338, %339 : vector<24x128xf32>
    %341 = arith.addf %333, %340 : vector<24x128xf32>
    %c0_211 = arith.constant 0 : index
    %c0_212 = arith.constant 0 : index
    %c0_213 = arith.constant 0 : index
    %342 = vector.load %arg11[%c0_211, %c0_212, %c0_213] : memref<8x24x1xf32, #tpu.memory_space<vmem>>, vector<8x24x1xf32>
    %343 = vector.shape_cast %341 : vector<24x128xf32> to vector<1x24x128xf32>
    %344 = vector.broadcast %342 : vector<8x24x1xf32> to vector<8x24x128xf32>
    %345 = vector.broadcast %343 : vector<1x24x128xf32> to vector<8x24x128xf32>
    %346 = arith.addf %344, %345 : vector<8x24x128xf32>
    %cst_214 = arith.constant dense<0xFF800000> : vector<8x128xf32>
    %347 = vector.multi_reduction <maximumf>, %346, %cst_214 [1] : vector<8x24x128xf32> to vector<8x128xf32>
    %c7_215 = arith.constant 7 : index
    %c0_216 = arith.constant 0 : index
    %c0_217 = arith.constant 0 : index
    %348 = vector.load %arg25[%c7_215, %c0_216, %c0_217] : memref<8x1x128xf32, #tpu.memory_space<vmem>>, vector<1x1x128xf32>
    %349 = vector.shape_cast %348 : vector<1x1x128xf32> to vector<1x128xf32>
    %350 = vector.broadcast %349 : vector<1x128xf32> to vector<8x128xf32>
    %351 = arith.addf %320, %350 : vector<8x128xf32>
    %352 = arith.addf %351, %347 : vector<8x128xf32>
    %cst_218 = arith.constant 0.000000e+00 : f32
    %353 = vector.broadcast %cst_218 : f32 to vector<8x128xf32>
    %354 = arith.maximumf %352, %353 : vector<8x128xf32>
    %355 = arith.addf %199, %354 : vector<8x128xf32>
    %cst_219 = arith.constant 0.000000e+00 : f32
    %356 = vector.broadcast %cst_219 : f32 to vector<16x128xf32>
    %357 = arith.maximumf %316, %356 : vector<16x128xf32>
    %cst_220 = arith.constant 0.000000e+00 : f32
    %358 = vector.broadcast %cst_220 : f32 to vector<12x128xf32>
    %359 = arith.maximumf %238, %358 : vector<12x128xf32>
    %cst_221 = arith.constant 0.000000e+00 : f32
    %360 = vector.broadcast %cst_221 : f32 to vector<8x128xf32>
    %361 = arith.maximumf %355, %360 : vector<8x128xf32>
    %c0_222 = arith.constant 0 : index
    %c0_223 = arith.constant 0 : index
    %362 = vector.load %arg27[%c0_222, %c0_223] : memref<128x128xbf16, #tpu.memory_space<vmem>>, vector<128x128xbf16>
    %363 = arith.truncf %357 : vector<16x128xf32> to vector<16x128xbf16>
    %cst_224 = arith.constant dense<0.000000e+00> : vector<16x128xf32>
    %364 = tpu.matmul %363, %362, %cst_224 {dimension_numbers = #tpu.dot_dimension_numbers<[1], [0], [0], [1], [0, 0, 1, 1], [], []>} : vector<16x128xbf16>, vector<128x128xbf16>, vector<16x128xf32> -> vector<16x128xf32>
    %c0_225 = arith.constant 0 : index
    %c0_226 = arith.constant 0 : index
    %365 = vector.load %arg28[%c0_225, %c0_226] : memref<1x128xf32, #tpu.memory_space<vmem>>, vector<1x128xf32>
    %366 = vector.broadcast %365 : vector<1x128xf32> to vector<16x128xf32>
    %367 = arith.addf %364, %366 : vector<16x128xf32>
    %c0_227 = arith.constant 0 : index
    %c0_228 = arith.constant 0 : index
    %368 = vector.load %arg30[%c0_227, %c0_228] : memref<16x128xf32, #tpu.memory_space<vmem>>, vector<16x128xf32>
    tpu.vector_store %arg30[%c0_227, %c0_228], %367 {strides = array<i32>} : memref<16x128xf32, #tpu.memory_space<vmem>>, vector<16x128xf32>,
    %c0_229 = arith.constant 0 : index
    %c0_230 = arith.constant 0 : index
    %369 = vector.load %arg29[%c0_229, %c0_230] : memref<1x128xf32, #tpu.memory_space<vmem>>, vector<1x128xf32>
    %370 = vector.broadcast %369 : vector<1x128xf32> to vector<16x128xf32>
    %371 = arith.addf %367, %370 : vector<16x128xf32>
    %cst_231 = arith.constant dense<0xFF800000> : vector<16xf32>
    %372 = vector.multi_reduction <maximumf>, %371, %cst_231 [1] : vector<16x128xf32> to vector<16xf32>
    %373 = vector.shape_cast %372 : vector<16xf32> to vector<16x1xf32>
    %374 = vector.broadcast %373 : vector<16x1xf32> to vector<16x128xf32>
    %375 = arith.subf %371, %374 : vector<16x128xf32>
    %376 = math.exp %375 : vector<16x128xf32>
    %cst_232 = arith.constant dense<0.000000e+00> : vector<16xf32>
    %377 = vector.multi_reduction <add>, %376, %cst_232 [1] : vector<16x128xf32> to vector<16xf32>
    %378 = vector.shape_cast %377 : vector<16xf32> to vector<16x1xf32>
    %379 = tpu.reciprocal %378 {approx = true} : vector<16x1xf32> -> vector<16x1xf32>
    %380 = vector.broadcast %379 : vector<16x1xf32> to vector<16x128xf32>
    %381 = arith.mulf %376, %380 : vector<16x128xf32>
    %c0_233 = arith.constant 0 : index
    %c0_234 = arith.constant 0 : index
    %382 = vector.load %arg33[%c0_233, %c0_234] : memref<16x128xf32, #tpu.memory_space<vmem>>, vector<16x128xf32>
    tpu.vector_store %arg33[%c0_233, %c0_234], %381 {strides = array<i32>} : memref<16x128xf32, #tpu.memory_space<vmem>>, vector<16x128xf32>,
    %c0_235 = arith.constant 0 : index
    %c0_236 = arith.constant 0 : index
    %383 = vector.load %arg27[%c0_235, %c0_236] : memref<128x128xbf16, #tpu.memory_space<vmem>>, vector<128x128xbf16>
    %384 = arith.truncf %359 : vector<12x128xf32> to vector<12x128xbf16>
    %cst_237 = arith.constant dense<0.000000e+00> : vector<12x128xf32>
    %385 = tpu.matmul %384, %383, %cst_237 {dimension_numbers = #tpu.dot_dimension_numbers<[1], [0], [0], [1], [0, 0, 1, 1], [], []>} : vector<12x128xbf16>, vector<128x128xbf16>, vector<12x128xf32> -> vector<12x128xf32>
    %c0_238 = arith.constant 0 : index
    %c0_239 = arith.constant 0 : index
    %386 = vector.load %arg28[%c0_238, %c0_239] : memref<1x128xf32, #tpu.memory_space<vmem>>, vector<1x128xf32>
    %387 = vector.broadcast %386 : vector<1x128xf32> to vector<12x128xf32>
    %388 = arith.addf %385, %387 : vector<12x128xf32>
    %c0_240 = arith.constant 0 : index
    %c0_241 = arith.constant 0 : index
    %389 = vector.load %arg31[%c0_240, %c0_241] : memref<12x128xf32, #tpu.memory_space<vmem>>, vector<12x128xf32>
    tpu.vector_store %arg31[%c0_240, %c0_241], %388 {strides = array<i32>} : memref<12x128xf32, #tpu.memory_space<vmem>>, vector<12x128xf32>,
    %c0_242 = arith.constant 0 : index
    %c0_243 = arith.constant 0 : index
    %390 = vector.load %arg29[%c0_242, %c0_243] : memref<1x128xf32, #tpu.memory_space<vmem>>, vector<1x128xf32>
    %391 = vector.broadcast %390 : vector<1x128xf32> to vector<12x128xf32>
    %392 = arith.addf %388, %391 : vector<12x128xf32>
    %cst_244 = arith.constant dense<0xFF800000> : vector<12xf32>
    %393 = vector.multi_reduction <maximumf>, %392, %cst_244 [1] : vector<12x128xf32> to vector<12xf32>
    %394 = vector.shape_cast %393 : vector<12xf32> to vector<12x1xf32>
    %395 = vector.broadcast %394 : vector<12x1xf32> to vector<12x128xf32>
    %396 = arith.subf %392, %395 : vector<12x128xf32>
    %397 = math.exp %396 : vector<12x128xf32>
    %cst_245 = arith.constant dense<0.000000e+00> : vector<12xf32>
    %398 = vector.multi_reduction <add>, %397, %cst_245 [1] : vector<12x128xf32> to vector<12xf32>
    %399 = vector.shape_cast %398 : vector<12xf32> to vector<12x1xf32>
    %400 = tpu.reciprocal %399 {approx = true} : vector<12x1xf32> -> vector<12x1xf32>
    %401 = vector.broadcast %400 : vector<12x1xf32> to vector<12x128xf32>
    %402 = arith.mulf %397, %401 : vector<12x128xf32>
    %c0_246 = arith.constant 0 : index
    %c0_247 = arith.constant 0 : index
    %403 = vector.load %arg34[%c0_246, %c0_247] : memref<12x128xf32, #tpu.memory_space<vmem>>, vector<12x128xf32>
    tpu.vector_store %arg34[%c0_246, %c0_247], %402 {strides = array<i32>} : memref<12x128xf32, #tpu.memory_space<vmem>>, vector<12x128xf32>,
    %c0_248 = arith.constant 0 : index
    %c0_249 = arith.constant 0 : index
    %404 = vector.load %arg27[%c0_248, %c0_249] : memref<128x128xbf16, #tpu.memory_space<vmem>>, vector<128x128xbf16>
    %405 = arith.truncf %361 : vector<8x128xf32> to vector<8x128xbf16>
    %cst_250 = arith.constant dense<0.000000e+00> : vector<8x128xf32>
    %406 = tpu.matmul %405, %404, %cst_250 {dimension_numbers = #tpu.dot_dimension_numbers<[1], [0], [0], [1], [0, 0, 1, 1], [], []>} : vector<8x128xbf16>, vector<128x128xbf16>, vector<8x128xf32> -> vector<8x128xf32>
    %c0_251 = arith.constant 0 : index
    %c0_252 = arith.constant 0 : index
    %407 = vector.load %arg28[%c0_251, %c0_252] : memref<1x128xf32, #tpu.memory_space<vmem>>, vector<1x128xf32>
    %408 = vector.broadcast %407 : vector<1x128xf32> to vector<8x128xf32>
    %409 = arith.addf %406, %408 : vector<8x128xf32>
    %c0_253 = arith.constant 0 : index
    %c0_254 = arith.constant 0 : index
    %410 = vector.load %arg32[%c0_253, %c0_254] : memref<8x128xf32, #tpu.memory_space<vmem>>, vector<8x128xf32>
    tpu.vector_store %arg32[%c0_253, %c0_254], %409 {strides = array<i32>} : memref<8x128xf32, #tpu.memory_space<vmem>>, vector<8x128xf32>,
    %c0_255 = arith.constant 0 : index
    %c0_256 = arith.constant 0 : index
    %411 = vector.load %arg29[%c0_255, %c0_256] : memref<1x128xf32, #tpu.memory_space<vmem>>, vector<1x128xf32>
    %412 = vector.broadcast %411 : vector<1x128xf32> to vector<8x128xf32>
    %413 = arith.addf %409, %412 : vector<8x128xf32>
    %cst_257 = arith.constant dense<0xFF800000> : vector<8xf32>
    %414 = vector.multi_reduction <maximumf>, %413, %cst_257 [1] : vector<8x128xf32> to vector<8xf32>
    %415 = vector.shape_cast %414 : vector<8xf32> to vector<8x1xf32>
    %416 = vector.broadcast %415 : vector<8x1xf32> to vector<8x128xf32>
    %417 = arith.subf %413, %416 : vector<8x128xf32>
    %418 = math.exp %417 : vector<8x128xf32>
    %cst_258 = arith.constant dense<0.000000e+00> : vector<8xf32>
    %419 = vector.multi_reduction <add>, %418, %cst_258 [1] : vector<8x128xf32> to vector<8xf32>
    %420 = vector.shape_cast %419 : vector<8xf32> to vector<8x1xf32>
    %421 = tpu.reciprocal %420 {approx = true} : vector<8x1xf32> -> vector<8x1xf32>
    %422 = vector.broadcast %421 : vector<8x1xf32> to vector<8x128xf32>
    %423 = arith.mulf %418, %422 : vector<8x128xf32>
    %c0_259 = arith.constant 0 : index
    %c0_260 = arith.constant 0 : index
    %424 = vector.load %arg35[%c0_259, %c0_260] : memref<8x128xf32, #tpu.memory_space<vmem>>, vector<8x128xf32>
    tpu.vector_store %arg35[%c0_259, %c0_260], %423 {strides = array<i32>} : memref<8x128xf32, #tpu.memory_space<vmem>>, vector<8x128xf32>,
    return
  }
}

</mosaic_0001>

<bundles_post_ra>
// kernel: tpu_custom_call.1
= control target key start
LH: loop header
LB: loop body
LE: loop exit
PB: predicated region body
PF: predicated region fallthrough
CT: control target
= control target key end

     0   :  { %s7171_s6 = smov 1   ;;  %s7172_s10 = smov 2   ;;  %s9546_s0 = inlined_call_operand.smem [shape: u32[36], index: -1, kind: input, shape index: {}] }
   0x1   :  { %s7225_s5 = sld [smem:[%s9546_s0]]   ;;  %s7173_s14 = smov 3  }
   0x2   :  { %s7230_s9 = sld [smem:[%s9546_s0 + %s7171_s6]]   ;;  %s7174_s18 = smov 4  }
   0x3   :  { %s7235_s13 = sld [smem:[%s9546_s0 + %s7172_s10]]   ;;  %s7175_s22 = smov 5  }
   0x4   :  { %s7240_s17 = sld [smem:[%s9546_s0 + %s7173_s14]]   ;;  %s7176_s26 = smov 6  }
   0x5   :  { %s7245_s21 = sld [smem:[%s9546_s0 + %s7174_s18]]   ;;  %s7177_s30 = smov 7  }
   0x6   :  { %s7250_s25 = sld [smem:[%s9546_s0 + %s7175_s22]]   ;;  %s7178_s4 = smov 8  }
   0x7   :  { %s7255_s29 = sld [smem:[%s9546_s0 + %s7176_s26]]   ;;  %s7179_s10 = smov 9  }
   0x8   :  { %s7260_s3 = sld [smem:[%s9546_s0 + %s7177_s30]]   ;;  %s7180_s15 = smov 10  }
   0x9   :  { %s7265_s8 = sld [smem:[%s9546_s0 + %s7178_s4]]   ;;  %s7181_s20 = smov 11  }
   0xa   :  { %s7270_s14 = sld [smem:[%s9546_s0 + %s7179_s10]]   ;;  %s7182_s26 = smov 12  }
   0xb   :  { %9751 = sst [smem:[#allocation16_spill]] %s7245_s21  ;;  %s7183_s1 = smov 13  }
   0xc   :  { %9752 = sst [smem:[#allocation17_spill]] %s7250_s25  ;;  %s7184_s7 = smov 14  }
   0xd   :  { %9753 = sst [smem:[#allocation18_spill]] %s7255_s29  ;;  %s7186_s22 = smov 16  }
   0xe   :  { %9754 = sst [smem:[#allocation19_spill]] %s7260_s3  ;;  %s7187_s28 = smov 17  }
   0xf   :  { %9755 = sst [smem:[#allocation20_spill]] %s7265_s8 }
  0x10   :  { %s7275_s19 = sld [smem:[%s9546_s0 + %s7180_s15]]   ;;  %s7185_s15 = smov 15  }
  0x11   :  { %s7280_s24 = sld [smem:[%s9546_s0 + %s7181_s20]]  }
  0x12   :  { %s7285_s30 = sld [smem:[%s9546_s0 + %s7182_s26]]  }
  0x13   :  { %s7290_s6 = sld [smem:[%s9546_s0 + %s7183_s1]]  }
  0x14   :  { %s7295_s12 = sld [smem:[%s9546_s0 + %s7184_s7]]   ;;  %s7188_s7 = smov 18  }
  0x15   :  { %s7300_s20 = sld [smem:[%s9546_s0 + %s7185_s15]]   ;;  %s7189_s15 = smov 19  }
  0x16   :  { %s7305_s27 = sld [smem:[%s9546_s0 + %s7186_s22]]   ;;  %s7190_s22 = smov 20  }
  0x17   :  { %9756 = sst [smem:[#allocation21_spill]] %s7280_s24 }
  0x18   :  { %s7310_s4 = sld [smem:[%s9546_s0 + %s7187_s28]]   ;;  %s7191_s28 = smov 21  }
  0x19   :  { %s7315_s3 = sld [smem:[%s9546_s0 + %s7188_s7]]   ;;  %s7192_s7 = smov 22  }
  0x1a   :  { %s7320_s29 = sld [smem:[%s9546_s0 + %s7189_s15]]   ;;  %s7193_s15 = smov 23  }
  0x1b   :  { %9757 = sst [smem:[#allocation22_spill]] %s7300_s20 }
  0x1c   :  { %s7325_s25 = sld [smem:[%s9546_s0 + %s7190_s22]]   ;;  %s7194_s22 = smov 24  }
  0x1d   :  { %s7330_s21 = sld [smem:[%s9546_s0 + %s7191_s28]]   ;;  %s7195_s28 = smov 25  }
  0x1e   :  { %s7335_s24 = sld [smem:[%s9546_s0 + %s7192_s7]]   ;;  %s7196_s7 = smov 26  }
  0x1f   :  { %9758 = sst [smem:[#allocation23_spill]] %s7315_s3 }
  0x20   :  { %s7340_s20 = sld [smem:[%s9546_s0 + %s7193_s15]]   ;;  %s7197_s15 = smov 27  }
  0x21   :  { %s7345_s3 = sld [smem:[%s9546_s0 + %s7194_s22]]   ;;  %s7198_s22 = smov 28  }
  0x22   :  { %s7365_s8 = sld [smem:[%s9546_s0 + %s7198_s22]]   ;;  %s7202_s22 = smov 32  }
  0x23   :  { %9759 = sst [smem:[#allocation24_spill]] %s7330_s21 }
  0x24   :  { %9760 = sst [smem:[#allocation25_spill]] %s7335_s24 }
  0x25   :  { %s7350_s21 = sld [smem:[%s9546_s0 + %s7195_s28]]   ;;  %s7199_s28 = smov 29  }
  0x26   :  { %9761 = sst [smem:[#allocation26_spill]] %s7340_s20 }
  0x27   :  { %s7355_s24 = sld [smem:[%s9546_s0 + %s7196_s7]]   ;;  %s7200_s7 = smov 30  }
  0x28   :  { %s7360_s20 = sld [smem:[%s9546_s0 + %s7197_s15]]   ;;  %s7201_s15 = smov 31  }
  0x29   :  { %9765 = sst [smem:[#allocation30_spill]] %s7365_s8 }
  0x2a   :  { %s7385_s8 = sld [smem:[%s9546_s0 + %s7202_s22]]  }
  0x2b   :  { %9762 = sst [smem:[#allocation27_spill]] %s7350_s21 }
  0x2c   :  { %s7370_s21 = sld [smem:[%s9546_s0 + %s7199_s28]]   ;;  %s7203_s28 = smov 33  }
  0x2d   :  { %9763 = sst [smem:[#allocation28_spill]] %s7355_s24 }
  0x2e   :  { %9764 = sst [smem:[#allocation29_spill]] %s7360_s20 }
  0x2f   :  { %s7375_s24 = sld [smem:[%s9546_s0 + %s7200_s7]]   ;;  %s7204_s7 = smov 34  }
  0x30   :  { %s7380_s20 = sld [smem:[%s9546_s0 + %s7201_s15]]   ;;  %s7205_s15 = smov 35  }
  0x32   :  { %9766 = sst [smem:[#allocation31_spill]] %s7370_s21 }
  0x33   :  { %s7390_s21 = sld [smem:[%s9546_s0 + %s7203_s28]]  }
  0x35   :  { %9767 = sst [smem:[#allocation32_spill]] %s7375_s24 }
  0x36   :  { %9768 = sst [smem:[#allocation33_spill]] %s7380_s20 }
  0x37   :  { %s7395_s24 = sld [smem:[%s9546_s0 + %s7204_s7]]  }
  0x38   :  { %s7400_s20 = sld [smem:[%s9546_s0 + %s7205_s15]]  }
  0x39   :  { %77 = vsyncpa [#allocation3], 0 }
  0x3a   :  { %78 = vsyncpa [#allocation5], 0 }
  0x3b   :  { %79 = vsyncpa [#allocation8], 0  ;;  %v150_v0 = vld [vmem:[%s7310_s4] sm:$0xff]  ;;  %vm157_vm0 = vcmask 1043456   ;;  %v145_v2 = vld [vmem:[%s7305_s27 + $0x8] sm:$0x3] }
  0x3c   :  { %v144_v1 = vld [vmem:[%s7305_s27] sm:$0xff]  ;;  %v9573_v3 = vmov 0.0   ;;  %v152_v4 = vpack.c.bf16 %v150_v0, %v150_v0  ;;  %vm206_vm1 = vcmask 1044480   ;;  %v149_v7 = vld [vmem:[%s7230_s9 + $0x8] sm:$0xff]  ;;  %vm7207_vm2 = vmmov 0   ;;  %v2104_v31 = vld [vmem:[%s7295_s12 + $0x10] sm:$0xff] }
  0x3d   :  { %6353 = vmatprep.subr.bf16.mxu0 %v9573_v3  ;;  %6359 = vmatprep.subr.bf16.mxu1 %v9573_v3  ;;  %v147_v5 = vpack.c.bf16 %v145_v2, %v144_v1  ;;  %v148_v6 = vld [vmem:[%s7230_s9] sm:$0xff]  ;;  %v143_v10 = vld [vmem:[%s7225_s5 + $0x8] sm:$0xff]  ;;  %vm153_vm3 = vcmask 64512   ;;  %vm202_vm4 = vcmask 80896   ;;  %vm321_vm5 = vcmask 1042432   ;;  %v1281_v32 = vld [vmem:[%s7290_s6 + $0x10] sm:$0xff] }
  0x3e   :  { %v142_v8 = vld [vmem:[%s7225_s5] sm:$0xff]  ;;  %6355 = vmatprep.mubr.msk.bf16.mxu0 %vm7207_vm2, %v9573_v3  ;;  %6361 = vmatprep.mubr.msk.bf16.mxu1 %vm7207_vm2, %v9573_v3  ;;  %v151_v9 = vpack.c.bf16 %v149_v7, %v148_v6  ;;  %v159_v13 = vsel %vm157_vm0, %v152_v4, 0  ;;  %v7208_v20 = vmov 0   ;;  %v266_v24 = vld [vmem:[%s7240_s17 + $0x8] sm:$0xf]  ;;  %vm317_vm6 = vcmask 48128  }
  0x3f   :  { %v267_v11 = vld [vmem:[%s7325_s25] sm:$0xff]  ;;  %v208_v14 = vsel %vm206_vm1, %v147_v5, 0  ;;  %v146_v15 = vpack.c.bf16 %v143_v10, %v142_v8  ;;  %6354 = vmatpush3.bf16.msra.mxu0 %v159_v13  ;;  %6858 = vset.pattern.permute.xlu1 %v7208_v20  ;;  %v261_v26 = vld [vmem:[%s7235_s13 + $0x8] sm:$0xf]  ;;  %v1314_v37 = vld [vmem:[%s7270_s14 + $0x18] sm:$0xff] }
  0x40   :  { %v262_v12 = vld [vmem:[%s7320_s29] sm:$0x3f]  ;;  %v269_v16 = vpack.c.bf16 %v267_v11, %v267_v11  ;;  %6360 = vmatpush3.bf16.msra.mxu1 %v208_v14  ;;  %6365 = vmatprep.subr.bf16.mxu0 %v9573_v3  ;;  %v2103_v29 = vld [vmem:[%s7295_s12 + $0x8] sm:$0xff]  ;;  %v6861_v41 = vld [vmem:[%s7345_s3 + $0x10] sm:$0xff]  }
  0x41   :  { %v264_v17 = vpack.c.bf16 %v262_v12, %v262_v12  ;;  %6371 = vmatprep.subr.bf16.mxu1 %v9573_v3  ;;  %6857 = vset.pattern.permute.xlu0 %v7208_v20  ;;  %v265_v21 = vld [vmem:[%s7240_s17] sm:$0xff]  ;;  %v1280_v30 = vld [vmem:[%s7290_s6 + $0x8] sm:$0xff]  ;;  %v1338_v43 = vld [vmem:[%s7270_s14 + $0xd8] sm:$0xff] }
  0x42   :  { %v274_v18 = vsel %vm157_vm0, %v269_v16, 0  ;;  %6356 = vmatmul.mubr.msk.bf16.vlgmr.msra.gmra.mrb[0].mxu0 %vm153_vm3, %v151_v9  ;;  %v2102_v22 = vld [vmem:[%s7295_s12] sm:$0xff]  ;;  %v268_v27 = vpack.c.bf16 %v266_v24, %v265_v21  ;;  %v1312_v33 = vld [vmem:[%s7270_s14 + $0x8] sm:$0xff]  ;;  %v6862_v44 = vld [vmem:[%s7345_s3 + $0x18] sm:$0xff]  }
  0x43   :  { %v323_v19 = vsel %vm321_vm5, %v264_v17, 0  ;;  %6362 = vmatmul.mubr.msk.bf16.vlgmr.msra.gmra.mrb[0].mxu1 %vm202_vm4, %v146_v15  ;;  %v1279_v23 = vld [vmem:[%s7290_s6] sm:$0xff]  ;;  %6366 = vmatpush3.bf16.msra.mxu0 %v274_v18  ;;  %v6860_v38 = vld [vmem:[%s7345_s3 + $0x8] sm:$0xff]   ;;  %v2137_v49 = vld [vmem:[%s7275_s19 + $0x18] sm:$0xff] }
  0x44   :  { %6372 = vmatpush3.bf16.msra.mxu1 %v323_v19  ;;  %v260_v25 = vld [vmem:[%s7235_s13] sm:$0xff]  ;;  %6367 = vmatprep.mubr.msk.bf16.mxu0 %vm7207_vm2, %v9573_v3  ;;  %v1336_v39 = vld [vmem:[%s7270_s14 + $0xc8] sm:$0xff]  ;;  %v2161_v54 = vld [vmem:[%s7275_s19 + $0xd8] sm:$0xff] }
  0x45   :  { %6373 = vmatprep.mubr.msk.bf16.mxu1 %vm7207_vm2, %v9573_v3  ;;  %2111 = vperm.xlu1 %6858, %v2102_v22   ;;  %v263_v28 = vpack.c.bf16 %v261_v26, %v260_v25  ;;  %v1311_v34 = vld [vmem:[%s7270_s14] sm:$0xff]  ;;  %v2135_v45 = vld [vmem:[%s7275_s19 + $0x8] sm:$0xff]  ;;  %v1318_v55 = vld [vmem:[%s7270_s14 + $0x38] sm:$0xff] }
  0x46   :  { %1288 = vperm.xlu0 %6857, %v1279_v23   ;;  %6377 = vmatprep.subr.bf16.mxu0 %v9573_v3  ;;  %v6859_v35 = vld [vmem:[%s7345_s3] sm:$0xff]   ;;  %v6864_v50 = vld [vmem:[%s7345_s3 + $0x28] sm:$0xff]   ;;  %v1317_v56 = vld [vmem:[%s7270_s14 + $0x30] sm:$0xff] }
  0x47   :  { %v1315_v36 = vld [vmem:[%s7270_s14 + $0x20] sm:$0xff]  ;;  %v2159_v51 = vld [vmem:[%s7275_s19 + $0xc8] sm:$0xff]  ;;  %v1342_v57 = vld [vmem:[%s7270_s14 + $0xf8] sm:$0xff] }
  0x48   :  { %v1335_v40 = vld [vmem:[%s7270_s14 + $0xc0] sm:$0xff]  ;;  %v1341_v58 = vld [vmem:[%s7270_s14 + $0xf0] sm:$0xff]  ;;  %v2141_v59 = vld [vmem:[%s7275_s19 + $0x38] sm:$0xff] }
  0x49   :  { %2116 = vperm.xlu1 %6858, %v2103_v29   ;;  %v1339_v42 = vld [vmem:[%s7270_s14 + $0xe0] sm:$0xff]  ;;  %v2140_v60 = vld [vmem:[%s7275_s19 + $0x30] sm:$0xff]  ;;  %v2165_v61 = vld [vmem:[%s7275_s19 + $0xf8] sm:$0xff] }
  0x4a   :  { %1293 = vperm.xlu0 %6857, %v1280_v30   ;;  %6368 = vmatmul.mubr.msk.bf16.vlgmr.msra.gmra.mrb[4].mxu0 %vm153_vm3, %v268_v27  ;;  %v2134_v46 = vld [vmem:[%s7275_s19] sm:$0xff]  ;;  %v2164_v62 = vld [vmem:[%s7275_s19 + $0xf0] sm:$0xff]  ;;  %v1316_v63 = vld [vmem:[%s7270_s14 + $0x28] sm:$0xff] }
  0x4b   :  { %6374 = vmatmul.mubr.msk.bf16.vlgmr.msra.gmra.mrb[4].mxu1 %vm317_vm6, %v263_v28  ;;  %6393 = vmatprep.mubr.msk.bf16.mxu0 %vm7207_vm2, %v9573_v3  ;;  %v6863_v47 = vld [vmem:[%s7345_s3 + $0x20] sm:$0xff]   ;;  %v1313_v0 = vld [vmem:[%s7270_s14 + $0x10] sm:$0xff]  ;;  %v1320_v2 = vld [vmem:[%s7270_s14 + $0x48] sm:$0xff] }
  0x4c   :  { %6378 = vmatpush3.bf16.msra.mxu0 %v6859_v35  ;;  %v2138_v48 = vld [vmem:[%s7275_s19 + $0x20] sm:$0xff]  ;;  %v1321_v1 = vld [vmem:[%s7270_s14 + $0x50] sm:$0xff]  ;;  %v1340_v4 = vld [vmem:[%s7270_s14 + $0xe8] sm:$0xff] }
  0x4d   :  { %2121 = vperm.xlu1 %6858, %v2104_v31   ;;  %6379 = vmatprep.subr.bf16.mxu0 %v9573_v3  ;;  %v2158_v52 = vld [vmem:[%s7275_s19 + $0xc0] sm:$0xff]  ;;  %v1337_v5 = vld [vmem:[%s7270_s14 + $0xd0] sm:$0xff]  ;;  %v1344_v7 = vld [vmem:[%s7270_s14 + $0x108] sm:$0xff] }
  0x4e   :  { %1298 = vperm.xlu0 %6857, %v1281_v32   ;;  %v2162_v53 = vld [vmem:[%s7275_s19 + $0xe0] sm:$0xff]  ;;  %v1345_v6 = vld [vmem:[%s7270_s14 + $0x110] sm:$0xff]  ;;  %v2139_v8 = vld [vmem:[%s7275_s19 + $0x28] sm:$0xff] }
  0x4f   :  { %v2136_v9 = vld [vmem:[%s7275_s19 + $0x10] sm:$0xff]  ;;  %v2143_v11 = vld [vmem:[%s7275_s19 + $0x48] sm:$0xff]  ;;  %v6866_v15 = vld [vmem:[%s7345_s3 + $0x38] sm:$0xff]  }
  0x50   :  { %6380 = vmatpush3.bf16.msra.mxu0 %v6860_v38  ;;  %v2144_v10 = vld [vmem:[%s7275_s19 + $0x50] sm:$0xff]  ;;  %v2163_v13 = vld [vmem:[%s7275_s19 + $0xe8] sm:$0xff]  ;;  %v1323_v18 = vld [vmem:[%s7270_s14 + $0x60] sm:$0xff] }
  0x51   :  { %1366 = vperm.xlu1 %6858, %v1312_v33   ;;  %6381 = vmatprep.subr.bf16.mxu0 %v9573_v3  ;;  %v6865_v12 = vld [vmem:[%s7345_s3 + $0x30] sm:$0xff]   ;;  %v2167_v17 = vld [vmem:[%s7275_s19 + $0x108] sm:$0xff]  ;;  %v1319_v19 = vld [vmem:[%s7270_s14 + $0x40] sm:$0xff] }
  0x52   :  { %1361 = vperm.xlu0 %6857, %v1311_v34   ;;  %v2160_v14 = vld [vmem:[%s7275_s19 + $0xd0] sm:$0xff]  ;;  %v1343_v20 = vld [vmem:[%s7270_s14 + $0x100] sm:$0xff]  ;;  %v1324_v21 = vld [vmem:[%s7270_s14 + $0x68] sm:$0xff] }
  0x53   :  { %v2168_v16 = vld [vmem:[%s7275_s19 + $0x110] sm:$0xff]  ;;  %v1348_v22 = vld [vmem:[%s7270_s14 + $0x128] sm:$0xff]  ;;  %v1347_v23 = vld [vmem:[%s7270_s14 + $0x120] sm:$0xff] }
  0x54   :  { %6382 = vmatpush3.bf16.msra.mxu0 %v6861_v41  ;;  %v2146_v24 = vld [vmem:[%s7275_s19 + $0x60] sm:$0xff]  ;;  %v2147_v27 = vld [vmem:[%s7275_s19 + $0x68] sm:$0xff]  ;;  %v1326_v30 = vld [vmem:[%s7270_s14 + $0x78] sm:$0xff] }
  0x55   :  { %1381 = vperm.xlu1 %6858, %v1315_v36   ;;  %6383 = vmatprep.subr.bf16.mxu0 %v9573_v3  ;;  %v2142_v25 = vld [vmem:[%s7275_s19 + $0x40] sm:$0xff]  ;;  %v2171_v28 = vld [vmem:[%s7275_s19 + $0x128] sm:$0xff]  ;;  %v1322_v31 = vld [vmem:[%s7270_s14 + $0x58] sm:$0xff] }
  0x56   :  { %1376 = vperm.xlu0 %6857, %v1314_v37   ;;  %v2166_v26 = vld [vmem:[%s7275_s19 + $0x100] sm:$0xff]  ;;  %v1346_v32 = vld [vmem:[%s7270_s14 + $0x118] sm:$0xff] }
  0x57   :  { %v2170_v29 = vld [vmem:[%s7275_s19 + $0x120] sm:$0xff]  ;;  %v1350_v35 = vld [vmem:[%s7270_s14 + $0x138] sm:$0xff] }
  0x58   :  { %6384 = vmatpush3.bf16.msra.mxu0 %v6862_v44  ;;  %v1327_v33 = vld [vmem:[%s7270_s14 + $0x80] sm:$0xff]  ;;  %v2149_v36 = vld [vmem:[%s7275_s19 + $0x78] sm:$0xff] }
  0x59   :  { %1486 = vperm.xlu1 %6858, %v1336_v39   ;;  %6385 = vmatprep.subr.bf16.mxu0 %v9573_v3  ;;  %v1351_v34 = vld [vmem:[%s7270_s14 + $0x140] sm:$0xff]  ;;  %v2145_v37 = vld [vmem:[%s7275_s19 + $0x58] sm:$0xff] }
  0x5a   :  { %1481 = vperm.xlu0 %6857, %v1335_v40   ;;  %v2169_v40 = vld [vmem:[%s7275_s19 + $0x118] sm:$0xff]  ;;  %v2150_v41 = vld [vmem:[%s7275_s19 + $0x80] sm:$0xff] }
  0x5b   :  { %v2174_v44 = vld [vmem:[%s7275_s19 + $0x140] sm:$0xff] }
  0x5c   :  { %6386 = vmatpush3.bf16.msra.mxu0 %v6863_v47 }
  0x5d   :  { %1501 = vperm.xlu1 %6858, %v1339_v42   ;;  %6387 = vmatprep.subr.bf16.mxu0 %v9573_v3 }
  0x5e   :  { %1496 = vperm.xlu0 %6857, %v1338_v43  }
  0x60   :  { %6388 = vmatpush3.bf16.msra.mxu0 %v6864_v50 }
  0x61   :  { %2189 = vperm.xlu1 %6858, %v2135_v45   ;;  %6389 = vmatprep.subr.bf16.mxu0 %v9573_v3  ;;  %v2173_v45 = vld [vmem:[%s7275_s19 + $0x138] sm:$0xff] }
  0x62   :  { %2184 = vperm.xlu0 %6857, %v2134_v46  }
  0x64   :  { %6390 = vmatpush3.bf16.msra.mxu0 %v6865_v12 }
  0x65   :  { %2204 = vperm.xlu1 %6858, %v2138_v48   ;;  %6391 = vmatprep.subr.bf16.mxu0 %v9573_v3 }
  0x66   :  { %2199 = vperm.xlu0 %6857, %v2137_v49  }
  0x68   :  { %6392 = vmatpush3.bf16.msra.mxu0 %v6866_v15 }
  0x69   :  { %2309 = vperm.xlu1 %6858, %v2159_v51   ;;  %6423 = vmatprep.subr.bf16.mxu0 %v9573_v3 }
  0x6a   :  { %2304 = vperm.xlu0 %6857, %v2158_v52  }
  0x6d   :  { %2324 = vperm.xlu1 %6858, %v2162_v53  }
  0x6e   :  { %2319 = vperm.xlu0 %6857, %v2161_v54  }
  0x71   :  { %1396 = vperm.xlu1 %6858, %v1318_v55  }
  0x72   :  { %1391 = vperm.xlu0 %6857, %v1317_v56  }
  0x75   :  { %1516 = vperm.xlu1 %6858, %v1342_v57  }
  0x76   :  { %1511 = vperm.xlu0 %6857, %v1341_v58  }
  0x79   :  { %2219 = vperm.xlu1 %6858, %v2141_v59  }
  0x7a   :  { %2214 = vperm.xlu0 %6857, %v2140_v60  }
  0x7d   :  { %2339 = vperm.xlu1 %6858, %v2165_v61  }
  0x7e   :  { %2334 = vperm.xlu0 %6857, %v2164_v62  }
  0x81   :  { %1386 = vperm.xlu1 %6858, %v1316_v63  }
  0x82   :  { %1371 = vperm.xlu0 %6857, %v1313_v0  }
  0x85   :  { %1411 = vperm.xlu1 %6858, %v1321_v1  }
  0x86   :  { %1406 = vperm.xlu0 %6857, %v1320_v2  }
  0x89   :  { %1506 = vperm.xlu1 %6858, %v1340_v4  }
  0x8a   :  { %1491 = vperm.xlu0 %6857, %v1337_v5  }
  0x8d   :  { %1531 = vperm.xlu1 %6858, %v1345_v6  }
  0x8e   :  { %1526 = vperm.xlu0 %6857, %v1344_v7  }
  0x91   :  { %2209 = vperm.xlu1 %6858, %v2139_v8  }
  0x92   :  { %2194 = vperm.xlu0 %6857, %v2136_v9  }
  0x95   :  { %2234 = vperm.xlu1 %6858, %v2144_v10  }
  0x96   :  { %2229 = vperm.xlu0 %6857, %v2143_v11  }
  0x99   :  { %2329 = vperm.xlu1 %6858, %v2163_v13  }
  0x9a   :  { %2314 = vperm.xlu0 %6857, %v2160_v14  }
  0x9d   :  { %2354 = vperm.xlu1 %6858, %v2168_v16  }
  0x9e   :  { %2349 = vperm.xlu0 %6857, %v2167_v17  }
  0xa1   :  { %1421 = vperm.xlu1 %6858, %v1323_v18  }
  0xa2   :  { %1401 = vperm.xlu0 %6857, %v1319_v19  }
  0xa5   :  { %1521 = vperm.xlu1 %6858, %v1343_v20  }
  0xa6   :  { %1426 = vperm.xlu0 %6857, %v1324_v21  }
  0xa9   :  { %1546 = vperm.xlu1 %6858, %v1348_v22  }
  0xaa   :  { %1541 = vperm.xlu0 %6857, %v1347_v23  }
  0xad   :  { %2244 = vperm.xlu1 %6858, %v2146_v24  }
  0xae   :  { %2224 = vperm.xlu0 %6857, %v2142_v25  }
  0xb1   :  { %2344 = vperm.xlu1 %6858, %v2166_v26  }
  0xb2   :  { %2249 = vperm.xlu0 %6857, %v2147_v27  }
  0xb5   :  { %2369 = vperm.xlu1 %6858, %v2171_v28  }
  0xb6   :  { %2364 = vperm.xlu0 %6857, %v2170_v29  }
  0xb9   :  { %1436 = vperm.xlu1 %6858, %v1326_v30  }
  0xba   :  { %1416 = vperm.xlu0 %6857, %v1322_v31  }
  0xbd   :  { %1536 = vperm.xlu1 %6858, %v1346_v32  }
  0xbe   :  { %1441 = vperm.xlu0 %6857, %v1327_v33  }
  0xc1   :  { %1561 = vperm.xlu1 %6858, %v1351_v34  }
  0xc2   :  { %1556 = vperm.xlu0 %6857, %v1350_v35  }
  0xc4   :  { %v7516_v38 = vpop.permute.xlu1 %2111 }
  0xc5   :  { %9769 = vst [vmem:[#allocation34_spill] sm:$0xff] %v7516_v38  ;;  %v7518_v39 = vpop.permute.xlu0 %1288  ;;  %2259 = vperm.xlu1 %6858, %v2149_v36  }
  0xc6   :  { %9770 = vst [vmem:[#allocation35_spill] sm:$0xff] %v7518_v39  ;;  %2239 = vperm.xlu0 %6857, %v2145_v37  }
  0xc8   :  { %v7522_v42 = vpop.permute.xlu1 %2116 }
  0xc9   :  { %9771 = vst [vmem:[#allocation36_spill] sm:$0xff] %v7522_v42  ;;  %v7524_v43 = vpop.permute.xlu0 %1293  ;;  %2359 = vperm.xlu1 %6858, %v2169_v40  }
  0xca   :  { %9772 = vst [vmem:[#allocation37_spill] sm:$0xff] %v7524_v43  ;;  %2264 = vperm.xlu0 %6857, %v2150_v41  }
  0xcc   :  { %v7528_v46 = vpop.permute.xlu1 %2121 }
  0xcd   :  { %9773 = vst [vmem:[#allocation38_spill] sm:$0xff] %v7528_v46  ;;  %v7530_v47 = vpop.permute.xlu0 %1298 }
  0xce   :  { %9774 = vst [vmem:[#allocation39_spill] sm:$0xff] %v7530_v47 }
  0xcf   :  { %80 = vsyncpa [#allocation11], 0  ;;  %2384 = vperm.xlu1 %6858, %v2174_v44   ;;  %2379 = vperm.xlu0 %6857, %v2173_v45   ;;  %v1329_v48 = vld [vmem:[%s7270_s14 + $0x90] sm:$0xff]  ;;  %v1330_v53 = vld [vmem:[%s7270_s14 + $0x98] sm:$0xff]  ;;  %s9793_s0 = sld [smem:[#allocation20_spill]]  ;;  %s9798_s5 = sld [smem:[#allocation23_spill]] }
  0xd0   :  { %v1325_v49 = vld [vmem:[%s7270_s14 + $0x70] sm:$0xff]  ;;  %v7534_v50 = vpop.permute.xlu1 %1366  ;;  %v1354_v54 = vld [vmem:[%s7270_s14 + $0x158] sm:$0xff]  ;;  %v1332_v5 = vld [vmem:[%s7270_s14 + $0xa8] sm:$0xff]  ;;  %s9801_s9 = sld [smem:[#allocation24_spill]]  ;;  %s9819_s13 = sld [smem:[#allocation25_spill]]  ;;  %vm517_vm7 = vcmask 130048  }
  0xd1   :  { %9775 = vst [vmem:[#allocation40_spill] sm:$0xff] %v7534_v50  ;;  %v7536_v51 = vpop.permute.xlu0 %1361  ;;  %v1349_v52 = vld [vmem:[%s7270_s14 + $0x130] sm:$0xff]  ;;  %v2153_v63 = vld [vmem:[%s7275_s19 + $0x98] sm:$0xff]  ;;  %v1328_v6 = vld [vmem:[%s7270_s14 + $0x88] sm:$0xff]  ;;  %s9821_s17 = sld [smem:[#allocation22_spill]]  ;;  %s9825_s25 = sld [smem:[#allocation21_spill]] }
  0xd2   :  { %9776 = vst [vmem:[#allocation41_spill] sm:$0xff] %v7536_v51  ;;  %v1353_v55 = vld [vmem:[%s7270_s14 + $0x150] sm:$0xff]  ;;  %v2177_v0 = vld [vmem:[%s7275_s19 + $0x158] sm:$0xff]  ;;  %v1352_v9 = vld [vmem:[%s7270_s14 + $0x148] sm:$0xff]  ;;  %s9833_s29 = sld [smem:[#allocation16_spill]]  ;;  %vm1227_vm8 = vcmask 1045504  }
  0xd3   :  { %1451 = vperm.xlu1 %6858, %v1329_v48   ;;  %1431 = vperm.xlu0 %6857, %v1325_v49   ;;  %v2152_v58 = vld [vmem:[%s7275_s19 + $0x90] sm:$0xff]  ;;  %v1356_v12 = vld [vmem:[%s7270_s14 + $0x168] sm:$0xff]  ;;  %v1355_v25 = vld [vmem:[%s7270_s14 + $0x160] sm:$0xff]  ;;  %vm1220_vm9 = vcmask 97280   ;;  %s9879_s6 = sld [smem:[#allocation19_spill]]  ;;  %s9911_s12 = sld [smem:[#allocation28_spill]] }
  0xd4   :  { %v7542_v56 = vpop.permute.xlu1 %1381  ;;  %v2148_v59 = vld [vmem:[%s7275_s19 + $0x70] sm:$0xff]  ;;  %v2155_v15 = vld [vmem:[%s7275_s19 + $0xa8] sm:$0xff]  ;;  %v1331_v26 = vld [vmem:[%s7270_s14 + $0xa0] sm:$0xff]  ;;  %vm1060_vm10 = vcmask 1041409   ;;  %vm1062_vm11 = vcmask 1042434   ;;  %vm1064_vm12 = vcmask 1043459  }
  0xd5   :  { %9777 = vst [vmem:[#allocation42_spill] sm:$0xff] %v7542_v56  ;;  %v7544_v57 = vpop.permute.xlu0 %1376  ;;  %v2172_v62 = vld [vmem:[%s7275_s19 + $0x130] sm:$0xff]  ;;  %v2151_v16 = vld [vmem:[%s7275_s19 + $0x88] sm:$0xff]  ;;  %v2178_v29 = vld [vmem:[%s7275_s19 + $0x160] sm:$0xff]  ;;  %vm1066_vm13 = vcmask 1044484   ;;  %vm1068_vm14 = vcmask 1045509  }
  0xd6   :  { %9778 = vst [vmem:[#allocation43_spill] sm:$0xff] %v7544_v57  ;;  %v2176_v1 = vld [vmem:[%s7275_s19 + $0x150] sm:$0xff]  ;;  %v2175_v19 = vld [vmem:[%s7275_s19 + $0x148] sm:$0xff]  ;;  %v2154_v30 = vld [vmem:[%s7275_s19 + $0xa0] sm:$0xff]  ;;  %vm1070_vm15 = vcmask 1046534   ;;  %s9932_s27 = sld [smem:[#allocation27_spill]] }
  0xd7   :  { %1551 = vperm.xlu1 %6858, %v1349_v52   ;;  %1456 = vperm.xlu0 %6857, %v1330_v53   ;;  %v1333_v10 = vld [vmem:[%s7270_s14 + $0xb0] sm:$0xff]  ;;  %v2179_v22 = vld [vmem:[%s7275_s19 + $0x168] sm:$0xff]  ;;  %v1358_v31 = vld [vmem:[%s7270_s14 + $0x178] sm:$0xff]  ;;  %vm1072_vm1 = vcmask 1047559   ;;  %s10244_s4 = sld [smem:[#allocation30_spill]]  ;;  %s10245_s22 = sld [smem:[#allocation31_spill]] }
  0xd8   :  { %v7548_v60 = vpop.permute.xlu1 %1486  ;;  %v1357_v11 = vld [vmem:[%s7270_s14 + $0x170] sm:$0xff]  ;;  %v1334_v32 = vld [vmem:[%s7270_s14 + $0xb8] sm:$0xff]  ;;  %v573_v41 = vld [vmem:[%s7285_s30 + $0x8] sm:$0xff]  ;;  %s9842_s14 = sld [smem:[#allocation26_spill]]  ;;  %s7209_s23 = smov [#allocation4]  }
  0xd9   :  { %9779 = vst [vmem:[#allocation44_spill] sm:$0xff] %v7548_v60  ;;  %v7550_v61 = vpop.permute.xlu0 %1481  ;;  %v2156_v20 = vld [vmem:[%s7275_s19 + $0xb0] sm:$0xff]  ;;  %v2181_v35 = vld [vmem:[%s7275_s19 + $0x178] sm:$0xff]  ;;  %v572_v44 = vld [vmem:[%s7285_s30] sm:$0xff]  ;;  %s5615_s26 = sshll.u32 %s7209_s23, 4  ;;  %s7210_s28 = smov [#allocation7]   ;;  %s5616_s26 = int_to_ptr.vmem [resolvable:$true] %s5615_s26 }
  0xda   :  { %9780 = vst [vmem:[#allocation45_spill] sm:$0xff] %v7550_v61  ;;  %v2180_v21 = vld [vmem:[%s7275_s19 + $0x170] sm:$0xff]  ;;  %v2157_v36 = vld [vmem:[%s7275_s19 + $0xb8] sm:$0xff]  ;;  %v604_v45 = vld [vmem:[%s9793_s0] sm:$0xff]  ;;  %s9850_s19 = sld [smem:[#allocation17_spill]]  ;;  %s5637_s1 = sshll.u32 %s7210_s28, 4  ;;  %s9502_s1 = int_to_ptr.vmem [resolvable:$true] %s5637_s1 }
  0xdb   :  { %1576 = vperm.xlu1 %6858, %v1354_v54   ;;  %1571 = vperm.xlu0 %6857, %v1353_v55   ;;  %v574_v48 = vld [vmem:[%s7285_s30 + $0x10] sm:$0xff]  ;;  %s9864_s30 = sld [smem:[#allocation18_spill]]  ;;  %s7031_s2 = scalar_lea.vmem %s5616_s26, 256 }
  0xdc   :  { %v7556_v2 = vpop.permute.xlu1 %1501  ;;  %p7032_p0 = scmp.ne.s32.totalorder %s5616_s26, %s7031_s2  ;;  %p7036_p1 = scmp.lt.s32.totalorder %s5616_s26, %s5616_s26 }
  0xdd   :  { %9781 = vst [vmem:[#allocation46_spill] sm:$0xff] %v7556_v2  ;;  %v7558_v4 = vpop.permute.xlu0 %1496  ;;  %v6926_v2 = vld [vmem:[%s7345_s3 + $0x118] sm:$0xff]   ;;  %p7037_p2 = scmp.lt.s32.totalorder %s7031_s2, %s7031_s2 }
  0xde   :  { %9782 = vst [vmem:[#allocation47_spill] sm:$0xff] %v7558_v4  ;;  %v506_v4 = vld [vmem:[%s9911_s12] sm:$0x3] }
  0xdf   :  { %2274 = vperm.xlu1 %6858, %v2152_v58   ;;  %2254 = vperm.xlu0 %6857, %v2148_v59   ;;  %v576_v60 = vrot.slane %v506_v4, 7  ;;  %p7038_p3 = por %p7037_p2, %p7036_p1 }
  0xe0   :  { %v7562_v7 = vpop.permute.xlu1 %2189 }
  0xe1   :  { %9783 = vst [vmem:[#allocation48_spill] sm:$0xff] %v7562_v7  ;;  %v7564_v8 = vpop.permute.xlu0 %2184  ;;  %p7039_p4 = pnand %p7038_p3, %p7032_p0 }
  0xe2   :  { %9784 = vst [vmem:[#allocation49_spill] sm:$0xff] %v7564_v8 }
  0xe3   :  { %2374 = vperm.xlu1 %6858, %v2172_v62   ;;  %2279 = vperm.xlu0 %6857, %v2153_v63   ;;  %v607_v62 = vld [vmem:[%s9793_s0 + $0x18] sm:$0xff]  ;;  %v5725_v63 = vld [vmem:[%s9798_s5] ss:$0 sm:$0xff] }
  0xe4   :  { %v7570_v13 = vpop.permute.xlu1 %2204 }
  0xe5   :  { %9785 = vst [vmem:[#allocation50_spill] sm:$0xff] %v7570_v13  ;;  %v7572_v14 = vpop.permute.xlu0 %2199 }
  0xe6   :  { %9786 = vst [vmem:[#allocation51_spill] sm:$0xff] %v7572_v14  ;;  %v6910_v14 = vld [vmem:[%s9842_s14 + $0x98] sm:$0xff]  }
  0xe7   :  { %2399 = vperm.xlu1 %6858, %v2177_v0   ;;  %2394 = vperm.xlu0 %6857, %v2176_v1  }
  0xe8   :  { %v7576_v17 = vpop.permute.xlu1 %2309 }
  0xe9   :  { %9787 = vst [vmem:[#allocation52_spill] sm:$0xff] %v7576_v17  ;;  %v7578_v18 = vpop.permute.xlu0 %2304  ;;  %v2974_v17 = vld [vmem:[%s9825_s25 + $0x88] sm:$0xff] }
  0xea   :  { %9788 = vst [vmem:[#allocation53_spill] sm:$0xff] %v7578_v18  ;;  %v2976_v18 = vld [vmem:[%s9825_s25 + $0x98] sm:$0xff] }
  0xeb   :  { %1466 = vperm.xlu1 %6858, %v1332_v5   ;;  %1446 = vperm.xlu0 %6857, %v1328_v6   ;;  %v605_v5 = vld [vmem:[%s9793_s0 + $0x8] sm:$0xff] }
  0xec   :  { %v7584_v23 = vpop.permute.xlu1 %2324 }
  0xed   :  { %9789 = vst [vmem:[#allocation54_spill] sm:$0xff] %v7584_v23  ;;  %v7586_v24 = vpop.permute.xlu0 %2319  ;;  %v507_v23 = vld [vmem:[%s9833_s29] sm:$0xff] }
  0xee   :  { %9790 = vst [vmem:[#allocation55_spill] sm:$0xff] %v7586_v24 }
  0xef   :  { %1566 = vperm.xlu1 %6858, %v1352_v9   ;;  %1471 = vperm.xlu0 %6857, %v1333_v10  }
  0xf0   :  { %v7590_v27 = vpop.permute.xlu1 %1396 }
  0xf1   :  { %9791 = vst [vmem:[#allocation56_spill] sm:$0xff] %v7590_v27  ;;  %v7592_v28 = vpop.permute.xlu0 %1391 }
  0xf2   :  { %9792 = vst [vmem:[#allocation57_spill] sm:$0xff] %v7592_v28 }
  0xf3   :  { %1591 = vperm.xlu1 %6858, %v1357_v11   ;;  %1586 = vperm.xlu0 %6857, %v1356_v12  }
  0xf4   :  { %v7598_v33 = vpop.permute.xlu1 %1516 }
  0xf5   :  { %9794 = vst [vmem:[#allocation58_spill] sm:$0xff] %v7598_v33  ;;  %v7600_v34 = vpop.permute.xlu0 %1511  ;;  %v6925_v33 = vld [vmem:[%s7345_s3 + $0x110] sm:$0xff]  }
  0xf6   :  { %9795 = vst [vmem:[#allocation59_spill] sm:$0xff] %v7600_v34 }
  0xf7   :  { %2289 = vperm.xlu1 %6858, %v2155_v15   ;;  %2269 = vperm.xlu0 %6857, %v2151_v16   ;;  %v610_v15 = vld [vmem:[%s9793_s0 + $0x30] sm:$0xff]  ;;  %v6867_v16 = vld [vmem:[%s7345_s3 + $0x40] sm:$0xff]  }
  0xf8   :  { %v7604_v37 = vpop.permute.xlu1 %2219 }
  0xf9   :  { %9796 = vst [vmem:[#allocation60_spill] sm:$0xff] %v7604_v37  ;;  %v7606_v40 = vpop.permute.xlu0 %2214 }
  0xfa   :  { %9797 = vst [vmem:[#allocation61_spill] sm:$0xff] %v7606_v40 }
  0xfb   :  { %2389 = vperm.xlu1 %6858, %v2175_v19   ;;  %2294 = vperm.xlu0 %6857, %v2156_v20   ;;  %v608_v19 = vld [vmem:[%s9793_s0 + $0x20] sm:$0xff] }
  0xfc   :  { %v7612_v49 = vpop.permute.xlu1 %2339 }
  0xfd   :  { %9799 = vst [vmem:[#allocation62_spill] sm:$0xff] %v7612_v49  ;;  %v7614_v52 = vpop.permute.xlu0 %2334 }
  0xfe   :  { %9800 = vst [vmem:[#allocation63_spill] sm:$0xff] %v7614_v52  ;;  %v2962_v52 = vld [vmem:[%s9825_s25 + $0x28] sm:$0xff] }
  0xff   :  { %2414 = vperm.xlu1 %6858, %v2180_v21   ;;  %2409 = vperm.xlu0 %6857, %v2179_v22  }
 0x100   :  { %v7624_v21 = vpop.permute.xlu1 %1386 }
 0x101   :  { %9802 = vst [vmem:[#allocation64_spill] sm:$0xff] %v7624_v21  ;;  %v7626_v22 = vpop.permute.xlu0 %1371 }
 0x102   :  { %9803 = vst [vmem:[#allocation65_spill] sm:$0xff] %v7626_v22 }
 0x103   :  { %1581 = vperm.xlu1 %6858, %v1355_v25   ;;  %1461 = vperm.xlu0 %6857, %v1331_v26  }
 0x107   :  { %2404 = vperm.xlu1 %6858, %v2178_v29   ;;  %2284 = vperm.xlu0 %6857, %v2154_v30   ;;  %v5728_v29 = vld [vmem:[%s9801_s9] ss:$0 sm:$0xff] }
 0x10b   :  { %1596 = vperm.xlu1 %6858, %v1358_v31   ;;  %1476 = vperm.xlu0 %6857, %v1334_v32  }
 0x10f   :  { %2419 = vperm.xlu1 %6858, %v2181_v35   ;;  %2299 = vperm.xlu0 %6857, %v2157_v36   ;;  %v606_v35 = vld [vmem:[%s9793_s0 + $0x10] sm:$0xff]  ;;  %v6868_v36 = vld [vmem:[%s7345_s3 + $0x48] sm:$0xff]  }
 0x113   :  { %586 = vperm.xlu1 %6858, %v573_v41   ;;  %581 = vperm.xlu0 %6857, %v572_v44  }
 0x115   :  { %v195_v53 = vpop.f32.mrb[0].mxu0 }
 0x116   :  { %v244_v54 = vpop.f32.mrb[0].mxu1  ;;  %v6357_v58 = vpop.f32.mrb[1].mxu0 }
 0x117   :  { %642 = vperm.xlu1 %6858, %v604_v45   ;;  %v245_v55 = vadd.f32 %v244_v54, %v195_v53  ;;  %v6363_v59 = vpop.f32.mrb[1].mxu1  ;;  %591 = vperm.xlu0 %6857, %v574_v48   ;;  %v198_v0 = vpop.f32.mrb[2].mxu0  ;;  %v611_v45 = vld [vmem:[%s9793_s0 + $0x38] sm:$0xff] }
 0x118   :  { %v247_v1 = vpop.f32.mrb[2].mxu1  ;;  %v6358_v9 = vpop.f32.mrb[3].mxu0  ;;  %v613_v59 = vld [vmem:[%s9793_s0 + $0x48] sm:$0xff] }
 0x119   :  { %v248_v6 = vadd.f32 %v247_v1, %v198_v0  ;;  %v6364_v10 = vpop.f32.mrb[3].mxu1  ;;  %v258_v11 = vadd.f32 %v5725_v63, %v245_v55  ;;  %v7642_v1 = vpop.permute.xlu1 %1411  ;;  %v6870_v9 = vld [vmem:[%s7345_s3 + $0x58] sm:$0xff]  }
 0x11a   :  { %9804 = vst [vmem:[#allocation66_spill] sm:$0xff] %v7642_v1  ;;  %v614_v10 = vld [vmem:[%s9793_s0 + $0x50] sm:$0xff] }
 0x11b   :  { %657 = vperm.xlu1 %6858, %v607_v62   ;;  %v259_v12 = vadd.f32 %v5725_v63, %v248_v6  ;;  %647 = vperm.xlu0 %6857, %v605_v5   ;;  %v6869_v62 = vld [vmem:[%s7345_s3 + $0x50] sm:$0xff]   ;;  %v609_v63 = vld [vmem:[%s9793_s0 + $0x28] sm:$0xff]  ;;  %v7644_v5 = vpop.permute.xlu0 %1406  ;;  %v612_v6 = vld [vmem:[%s9793_s0 + $0x40] sm:$0xff] }
 0x11c   :  { %9805 = vst [vmem:[#allocation67_spill] sm:$0xff] %v7644_v5 }
 0x11d   :  { %v7622_v20 = vpack.c.bf16 %v259_v12, %v258_v11  ;;  %v310_v25 = vpop.f32.mrb[4].mxu0  ;;  %v617_v11 = vld [vmem:[%s9793_s0 + $0x68] sm:$0xff]  ;;  %v6871_v12 = vld [vmem:[%s7345_s3 + $0x60] sm:$0xff]  }
 0x11e   :  { %v359_v26 = vpop.f32.mrb[4].mxu1  ;;  %v6369_v31 = vpop.f32.mrb[5].mxu0 }
 0x11f   :  { %672 = vperm.xlu1 %6858, %v610_v15   ;;  %6394 = vmatmul.mubr.bf16.vlgmr.msra.gmra.mrb[8].mxu0 %v7622_v20  ;;  %v360_v30 = vadd.f32 %v359_v26, %v310_v25  ;;  %v6375_v32 = vpop.f32.mrb[5].mxu1  ;;  %v313_v41 = vpop.f32.mrb[6].mxu0  ;;  %v619_v25 = vld [vmem:[%s9793_s0 + $0x78] sm:$0xff]  ;;  %v6872_v26 = vld [vmem:[%s7345_s3 + $0x68] sm:$0xff]  }
 0x120   :  { %662 = vperm.xlu0 %6857, %v608_v19   ;;  %6424 = vmatpush3.bf16.msra.mxu0 %v6867_v16  ;;  %v362_v44 = vpop.f32.mrb[6].mxu1  ;;  %v6370_v54 = vpop.f32.mrb[7].mxu0  ;;  %v616_v16 = vld [vmem:[%s9793_s0 + $0x60] sm:$0xff] }
 0x121   :  { %6439 = vmatprep.mubr.msk.bf16.mxu0 %vm7207_vm2, %v9573_v3  ;;  %6425 = vmatprep.subr.bf16.mxu0 %v9573_v3  ;;  %v373_v48 = vadd.f32 %v5728_v29, %v360_v30  ;;  %v363_v53 = vadd.f32 %v362_v44, %v313_v41  ;;  %v6376_v55 = vpop.f32.mrb[7].mxu1  ;;  %v7652_v15 = vpop.permute.xlu1 %1506  ;;  %v628_v32 = vld [vmem:[%s9793_s0 + $0xc0] sm:$0xff]  ;;  %v631_v41 = vld [vmem:[%s9793_s0 + $0xd8] sm:$0xff]  ;;  %v618_v54 = vld [vmem:[%s9793_s0 + $0x70] sm:$0xff] }
 0x122   :  { %9806 = vst [vmem:[#allocation68_spill] sm:$0xff] %v7652_v15  ;;  %v7656_v19 = vpop.permute.xlu0 %1491  ;;  %v6874_v44 = vld [vmem:[%s7345_s3 + $0x78] sm:$0xff]   ;;  %v6875_v55 = vld [vmem:[%s7345_s3 + $0x80] sm:$0xff]   ;;  %v513_v15 = vlaneseq }
 0x123   :  { %652 = vperm.xlu1 %6858, %v606_v35   ;;  %v374_v58 = vadd.f32 %v5728_v29, %v363_v53  ;;  %9807 = vst [vmem:[#allocation69_spill] sm:$0xff] %v7656_v19  ;;  %v615_v29 = vld [vmem:[%s9793_s0 + $0x58] sm:$0xff]  ;;  %v6873_v35 = vld [vmem:[%s7345_s3 + $0x70] sm:$0xff]  }
 0x124   :  { %677 = vperm.xlu0 %6857, %v611_v45   ;;  %6426 = vmatpush3.bf16.msra.mxu0 %v6868_v36  ;;  %v620_v36 = vld [vmem:[%s9793_s0 + $0x80] sm:$0xff] }
 0x125   :  { %6427 = vmatprep.subr.bf16.mxu0 %v9573_v3  ;;  %v7640_v0 = vpack.c.bf16 %v374_v58, %v373_v48  ;;  %v7662_v30 = vpop.permute.xlu1 %1531  ;;  %v629_v48 = vld [vmem:[%s9793_s0 + $0xc8] sm:$0xff]  ;;  %v632_v58 = vld [vmem:[%s9793_s0 + $0xe0] sm:$0xff] }
 0x126   :  { %9808 = vst [vmem:[#allocation70_spill] sm:$0xff] %v7662_v30  ;;  %v7664_v31 = vpop.permute.xlu0 %1526 }
 0x127   :  { %687 = vperm.xlu1 %6858, %v613_v59   ;;  %9809 = vst [vmem:[#allocation71_spill] sm:$0xff] %v7664_v31  ;;  %v6924_v31 = vld [vmem:[%s7345_s3 + $0x108] sm:$0xff]  }
 0x128   :  { %667 = vperm.xlu0 %6857, %v609_v63   ;;  %6428 = vmatpush3.bf16.msra.mxu0 %v6869_v62  ;;  %v623_v63 = vld [vmem:[%s9793_s0 + $0x98] sm:$0xff] }
 0x129   :  { %6429 = vmatprep.subr.bf16.mxu0 %v9573_v3  ;;  %v7672_v45 = vpop.permute.xlu1 %2209 }
 0x12a   :  { %9810 = vst [vmem:[#allocation72_spill] sm:$0xff] %v7672_v45  ;;  %v7676_v53 = vpop.permute.xlu0 %2194 }
 0x12b   :  { %682 = vperm.xlu1 %6858, %v612_v6   ;;  %9811 = vst [vmem:[#allocation73_spill] sm:$0xff] %v7676_v53  ;;  %v6876_v6 = vld [vmem:[%s7345_s3 + $0x88] sm:$0xff]  }
 0x12c   :  { %692 = vperm.xlu0 %6857, %v614_v10   ;;  %6430 = vmatpush3.bf16.msra.mxu0 %v6870_v9  ;;  %v622_v9 = vld [vmem:[%s9793_s0 + $0x90] sm:$0xff]  ;;  %v635_v10 = vld [vmem:[%s9793_s0 + $0xf8] sm:$0xff] }
 0x12d   :  { %6431 = vmatprep.subr.bf16.mxu0 %v9573_v3  ;;  %v7682_v59 = vpop.permute.xlu1 %2234 }
 0x12e   :  { %9812 = vst [vmem:[#allocation74_spill] sm:$0xff] %v7682_v59  ;;  %v7685_v62 = vpop.permute.xlu0 %2229 }
 0x12f   :  { %707 = vperm.xlu1 %6858, %v617_v11   ;;  %9813 = vst [vmem:[#allocation75_spill] sm:$0xff] %v7685_v62  ;;  %v6877_v11 = vld [vmem:[%s7345_s3 + $0x90] sm:$0xff]  }
 0x130   :  { %702 = vperm.xlu0 %6857, %v616_v16   ;;  %6432 = vmatpush3.bf16.msra.mxu0 %v6871_v12  ;;  %v634_v16 = vld [vmem:[%s9793_s0 + $0xf0] sm:$0xff] }
 0x131   :  { %6433 = vmatprep.subr.bf16.mxu0 %v9573_v3  ;;  %v7695_v12 = vpop.permute.xlu1 %2329 }
 0x132   :  { %9814 = vst [vmem:[#allocation76_spill] sm:$0xff] %v7695_v12  ;;  %v2969_v12 = vld [vmem:[%s9825_s25 + $0x60] sm:$0xff] }
 0x133   :  { %717 = vperm.xlu1 %6858, %v619_v25   ;;  %v7699_v25 = vpop.permute.xlu0 %2314 }
 0x134   :  { %697 = vperm.xlu0 %6857, %v615_v29   ;;  %6434 = vmatpush3.bf16.msra.mxu0 %v6872_v26  ;;  %9815 = vst [vmem:[#allocation77_spill] sm:$0xff] %v7699_v25  ;;  %v625_v26 = vld [vmem:[%s9793_s0 + $0xa8] sm:$0xff]  ;;  %v6878_v29 = vld [vmem:[%s7345_s3 + $0x98] sm:$0xff]  }
 0x135   :  { %6435 = vmatprep.subr.bf16.mxu0 %v9573_v3 }
 0x137   :  { %762 = vperm.xlu1 %6858, %v628_v32   ;;  %v621_v32 = vld [vmem:[%s9793_s0 + $0x88] sm:$0xff] }
 0x138   :  { %722 = vperm.xlu0 %6857, %v620_v36   ;;  %6436 = vmatpush3.bf16.msra.mxu0 %v6873_v35  ;;  %v7705_v35 = vpop.permute.xlu1 %2354  ;;  %v7707_v36 = vpop.permute.xlu0 %2349 }
 0x139   :  { %6437 = vmatprep.subr.bf16.mxu0 %v9573_v3  ;;  %9816 = vst [vmem:[#allocation78_spill] sm:$0xff] %v7705_v35  ;;  %9817 = vst [vmem:[#allocation79_spill] sm:$0xff] %v7707_v36  ;;  %v2961_v35 = vld [vmem:[%s9825_s25 + $0x20] sm:$0xff]  ;;  %v6886_v36 = vld [vmem:[%s7345_s3 + $0xd8] sm:$0xff]  }
 0x13b   :  { %777 = vperm.xlu1 %6858, %v631_v41   ;;  %v630_v41 = vld [vmem:[%s9793_s0 + $0xd0] sm:$0xff] }
 0x13c   :  { %767 = vperm.xlu0 %6857, %v629_v48   ;;  %6438 = vmatpush3.bf16.msra.mxu0 %v6874_v44  ;;  %v6879_v44 = vld [vmem:[%s7345_s3 + $0xa0] sm:$0xff]   ;;  %v626_v48 = vld [vmem:[%s9793_s0 + $0xb0] sm:$0xff] }
 0x13d   :  { %6469 = vmatprep.subr.bf16.mxu0 %v9573_v3 }
 0x13f   :  { %712 = vperm.xlu1 %6858, %v618_v54   ;;  %6440 = vmatmul.mubr.bf16.vlgmr.msra.gmra.mrb[12].mxu0 %v7640_v0  ;;  %v637_v54 = vld [vmem:[%s9793_s0 + $0x108] sm:$0xff] }
 0x140   :  { %782 = vperm.xlu0 %6857, %v632_v58   ;;  %6470 = vmatpush3.bf16.msra.mxu0 %v6875_v55  ;;  %v6880_v55 = vld [vmem:[%s7345_s3 + $0xa8] sm:$0xff]   ;;  %v7715_v58 = vpop.permute.xlu1 %1421 }
 0x141   :  { %6485 = vmatprep.mubr.msk.bf16.mxu0 %vm7207_vm2, %v9573_v3  ;;  %6471 = vmatprep.subr.bf16.mxu0 %v9573_v3  ;;  %9818 = vst [vmem:[#allocation80_spill] sm:$0xff] %v7715_v58 }
 0x143   :  { %737 = vperm.xlu1 %6858, %v623_v63   ;;  %v633_v63 = vld [vmem:[%s9793_s0 + $0xe8] sm:$0xff] }
 0x144   :  { %732 = vperm.xlu0 %6857, %v622_v9   ;;  %6472 = vmatpush3.bf16.msra.mxu0 %v6876_v6  ;;  %v7719_v6 = vpop.permute.xlu0 %1401  ;;  %v624_v9 = vld [vmem:[%s9793_s0 + $0xa0] sm:$0xff] }
 0x145   :  { %6473 = vmatprep.subr.bf16.mxu0 %v9573_v3  ;;  %9820 = vst [vmem:[#allocation81_spill] sm:$0xff] %v7719_v6 }
 0x147   :  { %797 = vperm.xlu1 %6858, %v635_v10   ;;  %v6881_v10 = vld [vmem:[%s7345_s3 + $0xb0] sm:$0xff]  }
 0x148   :  { %792 = vperm.xlu0 %6857, %v634_v16   ;;  %6474 = vmatpush3.bf16.msra.mxu0 %v6877_v11  ;;  %v638_v11 = vld [vmem:[%s9793_s0 + $0x110] sm:$0xff]  ;;  %v7725_v16 = vpop.permute.xlu1 %1521 }
 0x149   :  { %6475 = vmatprep.subr.bf16.mxu0 %v9573_v3  ;;  %9822 = vst [vmem:[#allocation82_spill] sm:$0xff] %v7725_v16 }
 0x14b   :  { %747 = vperm.xlu1 %6858, %v625_v26   ;;  %v7727_v26 = vpop.permute.xlu0 %1426 }
 0x14c   :  { %727 = vperm.xlu0 %6857, %v621_v32   ;;  %6476 = vmatpush3.bf16.msra.mxu0 %v6878_v29  ;;  %9823 = vst [vmem:[#allocation83_spill] sm:$0xff] %v7727_v26  ;;  %v627_v29 = vld [vmem:[%s9793_s0 + $0xb8] sm:$0xff] }
 0x14d   :  { %6477 = vmatprep.subr.bf16.mxu0 %v9573_v3  ;;  %v6882_v32 = vld [vmem:[%s7345_s3 + $0xb8] sm:$0xff]  }
 0x14f   :  { %772 = vperm.xlu1 %6858, %v630_v41   ;;  %v5729_v41 = vld [vmem:[%s9819_s13] ss:$0 sm:$0xff] }
 0x150   :  { %752 = vperm.xlu0 %6857, %v626_v48   ;;  %6478 = vmatpush3.bf16.msra.mxu0 %v6879_v44  ;;  %v636_v44 = vld [vmem:[%s9793_s0 + $0x100] sm:$0xff]  ;;  %v7734_v48 = vpack.c.bf16 %v5729_v41, %v5729_v41 }
 0x151   :  { %6479 = vmatprep.subr.bf16.mxu0 %v9573_v3 }
 0x153   :  { %807 = vperm.xlu1 %6858, %v637_v54   ;;  %v2925_v54 = vld [vmem:[%s9821_s17] sm:$0xff] }
 0x154   :  { %787 = vperm.xlu0 %6857, %v633_v63   ;;  %6480 = vmatpush3.bf16.msra.mxu0 %v6880_v55  ;;  %v6883_v55 = vld [vmem:[%s7345_s3 + $0xc0] sm:$0xff]   ;;  %v7738_v63 = vpop.permute.xlu1 %1546 }
 0x155   :  { %6481 = vmatprep.subr.bf16.mxu0 %v9573_v3  ;;  %9824 = vst [vmem:[#allocation84_spill] sm:$0xff] %v7738_v63 }
 0x157   :  { %742 = vperm.xlu1 %6858, %v624_v9   ;;  %v639_v9 = vld [vmem:[%s9793_s0 + $0x118] sm:$0xff] }
 0x158   :  { %812 = vperm.xlu0 %6857, %v638_v11   ;;  %6482 = vmatpush3.bf16.msra.mxu0 %v6881_v10  ;;  %v7742_v10 = vpop.permute.xlu0 %1541  ;;  %v2927_v11 = vld [vmem:[%s9821_s17 + $0x10] sm:$0xff]  ;;  %v7751_v41 = vpop.permute.xlu1 %2244 }
 0x159   :  { %6483 = vmatprep.subr.bf16.mxu0 %v9573_v3  ;;  %9826 = vst [vmem:[#allocation85_spill] sm:$0xff] %v7742_v10  ;;  %9827 = vst [vmem:[#allocation86_spill] sm:$0xff] %v7751_v41 }
 0x15b   :  { %757 = vperm.xlu1 %6858, %v627_v29   ;;  %v6884_v29 = vld [vmem:[%s7345_s3 + $0xc8] sm:$0xff]  }
 0x15c   :  { %802 = vperm.xlu0 %6857, %v636_v44   ;;  %6484 = vmatpush3.bf16.msra.mxu0 %v6882_v32  ;;  %v2926_v32 = vld [vmem:[%s9821_s17 + $0x8] sm:$0xff]  ;;  %v7753_v44 = vpop.permute.xlu0 %2224  ;;  %v7761_v49 = vpop.permute.xlu1 %2344 }
 0x15d   :  { %6515 = vmatprep.subr.bf16.mxu0 %v9573_v3  ;;  %9828 = vst [vmem:[#allocation87_spill] sm:$0xff] %v7753_v44  ;;  %9829 = vst [vmem:[#allocation88_spill] sm:$0xff] %v7761_v49 }
 0x15f   :  { %2934 = vperm.xlu1 %6858, %v2925_v54   ;;  %6486 = vmatmul.mubr.bf16.vlgmr.msra.gmra.mrb[16].mxu0 %v7734_v48  ;;  %v2958_v54 = vld [vmem:[%s9825_s25 + $0x8] sm:$0xff] }
 0x160   :  { %817 = vperm.xlu0 %6857, %v639_v9   ;;  %6516 = vmatpush3.bf16.msra.mxu0 %v6883_v55  ;;  %v6885_v55 = vld [vmem:[%s7345_s3 + $0xd0] sm:$0xff]   ;;  %v2957_v9 = vld [vmem:[%s9825_s25] sm:$0xff] }
 0x161   :  { %6531 = vmatprep.mubr.msk.bf16.mxu0 %vm7207_vm2, %v9573_v3  ;;  %6517 = vmatprep.subr.bf16.mxu0 %v9573_v3 }
 0x163   :  { %2944 = vperm.xlu1 %6858, %v2927_v11   ;;  %v2960_v11 = vld [vmem:[%s9825_s25 + $0x18] sm:$0xff] }
 0x164   :  { %2939 = vperm.xlu0 %6857, %v2926_v32   ;;  %6518 = vmatpush3.bf16.msra.mxu0 %v6884_v29  ;;  %v7765_v29 = vpop.permute.xlu0 %2249  ;;  %v2964_v32 = vld [vmem:[%s9825_s25 + $0x38] sm:$0xff] }
 0x165   :  { %6519 = vmatprep.subr.bf16.mxu0 %v9573_v3  ;;  %9830 = vst [vmem:[#allocation89_spill] sm:$0xff] %v7765_v29 }
 0x167   :  { %2988 = vperm.xlu1 %6858, %v2958_v54   ;;  %v6887_v54 = vld [vmem:[%s7345_s3 + $0xe0] sm:$0xff]  }
 0x168   :  { %2983 = vperm.xlu0 %6857, %v2957_v9   ;;  %6520 = vmatpush3.bf16.msra.mxu0 %v6885_v55  ;;  %v2963_v9 = vld [vmem:[%s9825_s25 + $0x30] sm:$0xff]  ;;  %v7771_v55 = vpop.permute.xlu1 %2369  ;;  %v7773_v49 = vpop.permute.xlu0 %2364 }
 0x169   :  { %6521 = vmatprep.subr.bf16.mxu0 %v9573_v3  ;;  %9831 = vst [vmem:[#allocation90_spill] sm:$0xff] %v7771_v55  ;;  %9832 = vst [vmem:[#allocation91_spill] sm:$0xff] %v7773_v49  ;;  %v6889_v55 = vld [vmem:[%s7345_s3 + $0xf0] sm:$0xff]   ;;  %v2966_v49 = vld [vmem:[%s9825_s25 + $0x48] sm:$0xff] }
 0x16b   :  { %3003 = vperm.xlu1 %6858, %v2961_v35   ;;  %v6888_v35 = vld [vmem:[%s7345_s3 + $0xe8] sm:$0xff]  }
 0x16c   :  { %2998 = vperm.xlu0 %6857, %v2960_v11   ;;  %6522 = vmatpush3.bf16.msra.mxu0 %v6886_v36  ;;  %v2959_v11 = vld [vmem:[%s9825_s25 + $0x10] sm:$0xff] }
 0x16d   :  { %6523 = vmatprep.subr.bf16.mxu0 %v9573_v3  ;;  %v2967_v36 = vld [vmem:[%s9825_s25 + $0x50] sm:$0xff] }
 0x16f   :  { %3018 = vperm.xlu1 %6858, %v2964_v32   ;;  %v7781_v32 = vpop.permute.xlu1 %1436 }
 0x170   :  { %3013 = vperm.xlu0 %6857, %v2963_v9   ;;  %6524 = vmatpush3.bf16.msra.mxu0 %v6887_v54  ;;  %9834 = vst [vmem:[#allocation92_spill] sm:$0xff] %v7781_v32  ;;  %v7785_v9 = vpop.permute.xlu0 %1416  ;;  %v6890_v54 = vld [vmem:[%s7345_s3 + $0xf8] sm:$0xff]  }
 0x171   :  { %6525 = vmatprep.subr.bf16.mxu0 %v9573_v3  ;;  %9835 = vst [vmem:[#allocation93_spill] sm:$0xff] %v7785_v9 }
 0x173   :  { %3008 = vperm.xlu1 %6858, %v2962_v52   ;;  %v2965_v52 = vld [vmem:[%s9825_s25 + $0x40] sm:$0xff]  ;;  %v7795_v24 = vpop.permute.xlu1 %1536 }
 0x174   :  { %2993 = vperm.xlu0 %6857, %v2959_v11   ;;  %6526 = vmatpush3.bf16.msra.mxu0 %v6888_v35  ;;  %v508_v11 = vld [vmem:[%s9833_s29 + $0x8] sm:$0xff]  ;;  %9836 = vst [vmem:[#allocation94_spill] sm:$0xff] %v7795_v24  ;;  %v7797_v25 = vpop.permute.xlu0 %1441  ;;  %v6923_v24 = vld [vmem:[%s7345_s3 + $0x100] sm:$0xff]  }
 0x175   :  { %6527 = vmatprep.subr.bf16.mxu0 %v9573_v3  ;;  %v7793_v35 = vpack.c.bf16 %v508_v11, %v507_v23  ;;  %9837 = vst [vmem:[#allocation95_spill] sm:$0xff] %v7797_v25  ;;  %v2973_v23 = vld [vmem:[%s9825_s25 + $0x80] sm:$0xff]  ;;  %v2971_v11 = vld [vmem:[%s9825_s25 + $0x70] sm:$0xff] }
 0x177   :  { %3033 = vperm.xlu1 %6858, %v2967_v36   ;;  %6399 = vmatprep.mubr.msk.bf16.mxu1 %vm517_vm7, %v7793_v35  ;;  %v2972_v36 = vld [vmem:[%s9825_s25 + $0x78] sm:$0xff] }
 0x178   :  { %3028 = vperm.xlu0 %6857, %v2966_v49   ;;  %6528 = vmatpush3.bf16.msra.mxu0 %v6889_v55  ;;  %v2968_v49 = vld [vmem:[%s9825_s25 + $0x58] sm:$0xff]  ;;  %v2970_v55 = vld [vmem:[%s9825_s25 + $0x68] sm:$0xff] }
 0x179   :  { %6529 = vmatprep.subr.bf16.mxu0 %v9573_v3 }
 0x17b   :  { %3043 = vperm.xlu1 %6858, %v2969_v12   ;;  %v7806_v12 = vpop.permute.xlu1 %1561 }
 0x17c   :  { %3023 = vperm.xlu0 %6857, %v2965_v52   ;;  %6530 = vmatpush3.bf16.msra.mxu0 %v6890_v54  ;;  %9838 = vst [vmem:[#allocation96_spill] sm:$0xff] %v7806_v12  ;;  %v7811_v52 = vpop.permute.xlu0 %1556  ;;  %v2975_v54 = vld [vmem:[%s9825_s25 + $0x90] sm:$0xff] }
 0x17d   :  { %6541 = vmatprep.subr.bf16.mxu0 %v9573_v3  ;;  %9839 = vst [vmem:[#allocation97_spill] sm:$0xff] %v7811_v52 }
 0x17f   :  { %3038 = vperm.xlu1 %6858, %v2968_v49   ;;  %6532 = vmatmul.mubr.bf16.vlgmr.msra.gmra.mrb[20].mxu0 %v7640_v0  ;;  %v7815_v49 = vpop.permute.xlu1 %2259 }
 0x180   :  { %3048 = vperm.xlu0 %6857, %v2970_v55   ;;  %6557 = vmatprep.mubr.msk.bf16.mxu0 %vm7207_vm2, %v9573_v3  ;;  %9840 = vst [vmem:[#allocation98_spill] sm:$0xff] %v7815_v49  ;;  %v7817_v55 = vpop.permute.xlu0 %2239  ;;  %v2979_v3 = vld [vmem:[%s9825_s25 + $0xb0] sm:$0xff]  ;;  %v2980_v49 = vld [vmem:[%s9825_s25 + $0xb8] sm:$0xff] }
 0x181   :  { %9841 = vst [vmem:[#allocation99_spill] sm:$0xff] %v7817_v55  ;;  %v6916_v55 = vld [vmem:[%s9842_s14 + $0xc8] sm:$0xff]  }
 0x183   :  { %3063 = vperm.xlu1 %6858, %v2973_v23   ;;  %v7822_v29 = vpop.permute.xlu1 %2359  ;;  %v2978_v23 = vld [vmem:[%s9825_s25 + $0xa8] sm:$0xff] }
 0x184   :  { %3058 = vperm.xlu0 %6857, %v2972_v36   ;;  %9843 = vst [vmem:[#allocation100_spill] sm:$0xff] %v7822_v29  ;;  %v7825_v36 = vpop.permute.xlu0 %2264 }
 0x185   :  { %9844 = vst [vmem:[#allocation101_spill] sm:$0xff] %v7825_v36 }
 0x187   :  { %3073 = vperm.xlu1 %6858, %v2975_v54   ;;  %v2977_v54 = vld [vmem:[%s9825_s25 + $0xa0] sm:$0xff]  ;;  %v7829_v41 = vpop.permute.xlu1 %2384 }
 0x188   :  { %3053 = vperm.xlu0 %6857, %v2971_v11   ;;  %9845 = vst [vmem:[#allocation102_spill] sm:$0xff] %v7829_v41  ;;  %v7831_v11 = vpop.permute.xlu0 %2379  ;;  %v6917_v41 = vld [vmem:[%s9842_s14 + $0xd0] sm:$0xff]  }
 0x189   :  { %9846 = vst [vmem:[#allocation103_spill] sm:$0xff] %v7831_v11 }
 0x18b   :  { %3068 = vperm.xlu1 %6858, %v2974_v17   ;;  %v6915_v17 = vld [vmem:[%s9842_s14 + $0xc0] sm:$0xff]  }
 0x18c   :  { %3078 = vperm.xlu0 %6857, %v2976_v18   ;;  %6542 = vmatpush3.bf16.msra.mxu0 %v6915_v17  ;;  %v9847_v18 = vmov 0.0   ;;  %v6921_v17 = vld [vmem:[%s9842_s14 + $0xf0] sm:$0xff]  }
 0x18d   :  { %6543 = vmatprep.subr.bf16.mxu0 %v9847_v18 }
 0x18f   :  { %3093 = vperm.xlu1 %6858, %v2979_v3  }
 0x190   :  { %3088 = vperm.xlu0 %6857, %v2978_v23   ;;  %v509_v23 = vld [vmem:[%s9833_s29 + $0x10] sm:$0xff]  ;;  %6544 = vmatpush3.bf16.msra.mxu0 %v6916_v55  ;;  %v6894_v55 = vld [vmem:[%s9842_s14 + $0x18] sm:$0xff]  }
 0x191   :  { %6545 = vmatprep.subr.bf16.mxu0 %v9847_v18 }
 0x193   :  { %3098 = vperm.xlu1 %6858, %v2980_v49   ;;  %v7839_v49 = vpack.c.bf16 %v509_v23, %v509_v23  ;;  %v6922_v23 = vld [vmem:[%s9842_s14 + $0xf8] sm:$0xff]  }
 0x194   :  { %3083 = vperm.xlu0 %6857, %v2977_v54   ;;  %v6891_v54 = vld [vmem:[%s9842_s14] sm:$0xff]   ;;  %6546 = vmatpush3.bf16.msra.mxu0 %v6917_v41  ;;  %v6893_v41 = vld [vmem:[%s9842_s14 + $0x10] sm:$0xff]  }
 0x195   :  { %9848 = vst [vmem:[#allocation104_spill] sm:$0xff] %v7839_v49  ;;  %6547 = vmatprep.subr.bf16.mxu0 %v9847_v18 }
 0x1f2   :  { %v499_v29 = vpop.f32.mrb[8].mxu0 }
 0x1f3   :  { %v6395_v36 = vpop.f32.mrb[9].mxu0 }
 0x1f4   :  { %v502_v3 = vpop.f32.mrb[10].mxu0  ;;  %v6918_v36 = vld [vmem:[%s9842_s14 + $0xd8] sm:$0xff]  }
 0x1f5   :  { %v512_v59 = vpack.c.bf16 %v502_v3, %v499_v29  ;;  %v6396_v62 = vpop.f32.mrb[11].mxu0  ;;  %6548 = vmatpush3.bf16.msra.mxu0 %v6918_v36  ;;  %v6920_v29 = vld [vmem:[%s9842_s14 + $0xe8] sm:$0xff]   ;;  %v6895_v3 = vld [vmem:[%s9842_s14 + $0x20] sm:$0xff]  }
 0x1f6   :  { %v6892_v62 = vld [vmem:[%s9842_s14 + $0x8] sm:$0xff]   ;;  %6549 = vmatprep.subr.bf16.mxu0 %v9847_v18 }
 0x1f7   :  { %6397 = vmatprep.subr.bf16.mxu1 %v512_v59  ;;  %v6896_v36 = vld [vmem:[%s9842_s14 + $0x28] sm:$0xff]  }
 0x1f8   :  { %6398 = vmatpush3.bf16.msra.mxu1 %v512_v59  ;;  %v6919_v59 = vld [vmem:[%s9842_s14 + $0xe0] sm:$0xff]  }
 0x1f9   :  { %6403 = vmatprep.subr.bf16.mxu1 %v9847_v18  ;;  %6550 = vmatpush3.bf16.msra.mxu0 %v6919_v59 }
 0x1fa   :  { %6551 = vmatprep.subr.bf16.mxu0 %v9847_v18 }
 0x1fb   :  { %6400 = vmatmul.mubr.msk.bf16.vlgmr.msra.gmra.mrb[8].mxu1 %vm517_vm7, %v7839_v49  ;;  %v1211_v49 = vld [vmem:[%s9850_s19 + $0x8] sm:$0xff] }
 0x1fc   :  { %6404 = vmatpush3.bf16.msra.mxu1 %v6891_v54  ;;  %6419 = vmatprep.mubr.msk.bf16.mxu1 %vm7207_vm2, %v9847_v18  ;;  %v7865_v54 = vpop.permute.xlu1 %1451 }
 0x1fd   :  { %6405 = vmatprep.subr.bf16.mxu1 %v9847_v18  ;;  %6552 = vmatpush3.bf16.msra.mxu0 %v6920_v29  ;;  %9849 = vst [vmem:[#allocation105_spill] sm:$0xff] %v7865_v54 }
 0x1fe   :  { %6553 = vmatprep.subr.bf16.mxu0 %v9847_v18 }
 0x200   :  { %6406 = vmatpush3.bf16.msra.mxu1 %v6892_v62  ;;  %v6897_v62 = vld [vmem:[%s9842_s14 + $0x30] sm:$0xff]   ;;  %v7874_v59 = vpop.permute.xlu1 %1551 }
 0x201   :  { %6407 = vmatprep.subr.bf16.mxu1 %v9847_v18  ;;  %6554 = vmatpush3.bf16.msra.mxu0 %v6921_v17  ;;  %9851 = vst [vmem:[#allocation106_spill] sm:$0xff] %v7874_v59  ;;  %v6898_v17 = vld [vmem:[%s9842_s14 + $0x38] sm:$0xff]  }
 0x202   :  { %6555 = vmatprep.subr.bf16.mxu0 %v9847_v18 }
 0x204   :  { %6408 = vmatpush3.bf16.msra.mxu1 %v6893_v41 }
 0x205   :  { %6409 = vmatprep.subr.bf16.mxu1 %v9847_v18  ;;  %6556 = vmatpush3.bf16.msra.mxu0 %v6922_v23 }
 0x208   :  { %6410 = vmatpush3.bf16.msra.mxu1 %v6894_v55  ;;  %6558 = vmatmul.mubr.bf16.vlgmr.msra.gmra.mrb[24].mxu0 %v7734_v48  ;;  %v7880_v48 = vpop.permute.xlu1 %1576 }
 0x209   :  { %6411 = vmatprep.subr.bf16.mxu1 %v9847_v18  ;;  %6583 = vmatprep.mubr.msk.bf16.mxu0 %vm517_vm7, %v7793_v35  ;;  %9852 = vst [vmem:[#allocation107_spill] sm:$0xff] %v7880_v48 }
 0x20c   :  { %6412 = vmatpush3.bf16.msra.mxu1 %v6895_v3 }
 0x20d   :  { %6413 = vmatprep.subr.bf16.mxu1 %v9847_v18 }
 0x210   :  { %6414 = vmatpush3.bf16.msra.mxu1 %v6896_v36  ;;  %v1210_v36 = vld [vmem:[%s9850_s19] sm:$0xff] }
 0x211   :  { %6415 = vmatprep.subr.bf16.mxu1 %v9847_v18  ;;  %v7882_v35 = vpack.c.bf16 %v1211_v49, %v1210_v36  ;;  %v7893_v49 = vpop.permute.xlu1 %2274 }
 0x212   :  { %v1201_v41 = vpop.f32.mrb[12].mxu0  ;;  %9855 = vst [vmem:[#allocation110_spill] sm:$0xff] %v7893_v49 }
 0x213   :  { %v6441_v29 = vpop.f32.mrb[13].mxu0  ;;  %9853 = vst [vmem:[#allocation108_spill] sm:$0xff] %v7882_v35 }
 0x214   :  { %6416 = vmatpush3.bf16.msra.mxu1 %v6897_v62  ;;  %v1204_v55 = vpop.f32.mrb[14].mxu0  ;;  %v7886_v62 = vpop.permute.xlu0 %1431 }
 0x215   :  { %v1215_v3 = vpack.c.bf16 %v1204_v55, %v1201_v41  ;;  %6417 = vmatprep.subr.bf16.mxu1 %v9847_v18  ;;  %v6442_v23 = vpop.f32.mrb[15].mxu0  ;;  %9854 = vst [vmem:[#allocation109_spill] sm:$0xff] %v7886_v62  ;;  %v1212_v41 = vld [vmem:[%s9850_s19 + $0x10] sm:$0xff]  ;;  %v6899_v55 = vld [vmem:[%s9842_s14 + $0x40] sm:$0xff]  }
 0x216   :  { %v7895_v29 = vpack.c.bf16 %v1212_v41, %v1212_v41  ;;  %v6901_v23 = vld [vmem:[%s9842_s14 + $0x50] sm:$0xff]   ;;  %v6902_v41 = vld [vmem:[%s9842_s14 + $0x58] sm:$0xff]  }
 0x217   :  { %v1229_v11 = vsel %vm1227_vm8, %v1215_v3, 0 }
 0x218   :  { %6418 = vmatpush3.bf16.msra.mxu1 %v6898_v17  ;;  %9856 = vst [vmem:[#allocation111_spill] sm:$0xff] %v7895_v29  ;;  %v7898_v17 = vpop.permute.xlu0 %1456 }
 0x219   :  { %6805 = vmatprep.subr.msk.bf16.mxu1 %vm1227_vm8, %v1215_v3  ;;  %9857 = vst [vmem:[#allocation112_spill] sm:$0xff] %v7898_v17  ;;  %v8098_v17 = vld [vmem:[%s9911_s12 + $0x2] sm:$0x3] }
 0x21b   :  { %6420 = vmatmul.mubr.bf16.vlgmr.msra.gmra.mrb[12].mxu1 %v7640_v0  ;;  %v7902_v0 = vpop.permute.xlu1 %2374 }
 0x21c   :  { %6444 = vmatpush3.bf16.msra.mxu1 %v1229_v11  ;;  %6445 = vmatprep.mubr.msk.bf16.mxu1 %vm1220_vm9, %v7882_v35  ;;  %9858 = vst [vmem:[#allocation113_spill] sm:$0xff] %v7902_v0  ;;  %v6900_v11 = vld [vmem:[%s9842_s14 + $0x48] sm:$0xff]   ;;  %v7908_v3 = vpop.permute.xlu0 %1571  ;;  %v6903_v35 = vld [vmem:[%s9842_s14 + $0x60] sm:$0xff]  }
 0x21d   :  { %6449 = vmatprep.subr.bf16.mxu1 %v9847_v18  ;;  %9859 = vst [vmem:[#allocation114_spill] sm:$0xff] %v7908_v3 }
 0x21f   :  { %v7912_v36 = vpop.permute.xlu1 %2399 }
 0x220   :  { %9860 = vst [vmem:[#allocation115_spill] sm:$0xff] %v7912_v36 }
 0x223   :  { %6446 = vmatmul.mubr.msk.bf16.vlgmr.msra.gmra.mrb[16].mxu1 %vm1220_vm9, %v7895_v29  ;;  %v7915_v29 = vpop.permute.xlu0 %2254 }
 0x224   :  { %6450 = vmatpush3.bf16.msra.mxu1 %v6899_v55  ;;  %6465 = vmatprep.mubr.msk.bf16.mxu1 %vm7207_vm2, %v9847_v18  ;;  %9861 = vst [vmem:[#allocation116_spill] sm:$0xff] %v7915_v29  ;;  %v7918_v55 = vpop.permute.xlu1 %1466 }
 0x225   :  { %6451 = vmatprep.subr.bf16.mxu1 %v9847_v18  ;;  %9862 = vst [vmem:[#allocation117_spill] sm:$0xff] %v7918_v55 }
 0x227   :  { %v7922_v0 = vpop.permute.xlu0 %2279 }
 0x228   :  { %6452 = vmatpush3.bf16.msra.mxu1 %v6900_v11  ;;  %9863 = vst [vmem:[#allocation118_spill] sm:$0xff] %v7922_v0  ;;  %v7926_v44 = vpop.permute.xlu1 %1566  ;;  %v2036_v0 = vld [vmem:[%s9864_s30 + $0x8] sm:$0xff] }
 0x229   :  { %6453 = vmatprep.subr.bf16.mxu1 %v9847_v18  ;;  %9865 = vst [vmem:[#allocation119_spill] sm:$0xff] %v7926_v44 }
 0x22b   :  { %v7929_v37 = vpop.permute.xlu0 %2394 }
 0x22c   :  { %6454 = vmatpush3.bf16.msra.mxu1 %v6901_v23  ;;  %v6904_v23 = vld [vmem:[%s9842_s14 + $0x68] sm:$0xff]   ;;  %9866 = vst [vmem:[#allocation120_spill] sm:$0xff] %v7929_v37  ;;  %v7932_v40 = vpop.permute.xlu1 %1591 }
 0x22d   :  { %6455 = vmatprep.subr.bf16.mxu1 %v9847_v18  ;;  %9867 = vst [vmem:[#allocation121_spill] sm:$0xff] %v7932_v40 }
 0x230   :  { %6456 = vmatpush3.bf16.msra.mxu1 %v6902_v41  ;;  %v6905_v41 = vld [vmem:[%s9842_s14 + $0x70] sm:$0xff]   ;;  %v7944_v45 = vpop.permute.xlu1 %2289 }
 0x231   :  { %6457 = vmatprep.subr.bf16.mxu1 %v9847_v18  ;;  %9870 = vst [vmem:[#allocation124_spill] sm:$0xff] %v7944_v45 }
 0x232   :  { %v2027_v11 = vpop.f32.mrb[16].mxu0 }
 0x233   :  { %v6487_v49 = vpop.f32.mrb[17].mxu0 }
 0x234   :  { %6458 = vmatpush3.bf16.msra.mxu1 %v6903_v35  ;;  %v2030_v36 = vpop.f32.mrb[18].mxu0  ;;  %v6906_v49 = vld [vmem:[%s9842_s14 + $0x78] sm:$0xff]   ;;  %v2040_v35 = vpack.c.bf16 %v2027_v11, %v2027_v11  ;;  %v2037_v11 = vld [vmem:[%s9864_s30 + $0x10] sm:$0xff] }
 0x235   :  { %6459 = vmatprep.subr.bf16.mxu1 %v9847_v18  ;;  %v6488_v29 = vpop.f32.mrb[19].mxu0  ;;  %v2035_v36 = vld [vmem:[%s9864_s30] sm:$0xff] }
 0x236   :  { %v7938_v29 = vpop.permute.xlu0 %1446  ;;  %v2052_v37 = vsel %vm157_vm0, %v2040_v35, 0 }
 0x237   :  { %9868 = vst [vmem:[#allocation122_spill] sm:$0xff] %v7938_v29 }
 0x238   :  { %6460 = vmatpush3.bf16.msra.mxu1 %v6904_v23  ;;  %v7940_v23 = vpack.c.bf16 %v2036_v0, %v2035_v36  ;;  %v7953_v0 = vpack.c.bf16 %v2037_v11, %v2037_v11  ;;  %v6907_v36 = vld [vmem:[%s9842_s14 + $0x80] sm:$0xff]   ;;  %v6909_v11 = vld [vmem:[%s9842_s14 + $0x90] sm:$0xff]  }
 0x239   :  { %6461 = vmatprep.subr.bf16.mxu1 %v9847_v18 }
 0x23a   :  { %9869 = vst [vmem:[#allocation123_spill] sm:$0xff] %v7940_v23  ;;  %9872 = vst [vmem:[#allocation126_spill] sm:$0xff] %v7953_v0 }
 0x23c   :  { %6462 = vmatpush3.bf16.msra.mxu1 %v6905_v41  ;;  %v7950_v41 = vpop.permute.xlu0 %1471 }
 0x23d   :  { %6463 = vmatprep.subr.bf16.mxu1 %v9847_v18  ;;  %9871 = vst [vmem:[#allocation125_spill] sm:$0xff] %v7950_v41 }
 0x240   :  { %6464 = vmatpush3.bf16.msra.mxu1 %v6906_v49  ;;  %v7955_v49 = vpop.permute.xlu1 %2389 }
 0x241   :  { %6806 = vmatprep.subr.msk.bf16.mxu1 %vm157_vm0, %v2040_v35  ;;  %9873 = vst [vmem:[#allocation127_spill] sm:$0xff] %v7955_v49  ;;  %v7958_v35 = vpop.permute.xlu0 %1586 }
 0x242   :  { %9874 = vst [vmem:[#allocation128_spill] sm:$0xff] %v7958_v35 }
 0x243   :  { %6466 = vmatmul.mubr.bf16.vlgmr.msra.gmra.mrb[20].mxu1 %v7622_v20 }
 0x244   :  { %6490 = vmatpush3.bf16.msra.mxu1 %v2052_v37  ;;  %6491 = vmatprep.mubr.msk.bf16.mxu1 %vm153_vm3, %v7940_v23  ;;  %v6908_v37 = vld [vmem:[%s9842_s14 + $0x88] sm:$0xff]   ;;  %v7966_v23 = vpop.permute.xlu1 %2414 }
 0x245   :  { %6495 = vmatprep.subr.bf16.mxu1 %v9847_v18  ;;  %9875 = vst [vmem:[#allocation129_spill] sm:$0xff] %v7966_v23  ;;  %v7969_v49 = vpop.permute.xlu0 %2269  ;;  %v6911_v23 = vld [vmem:[%s9842_s14 + $0xa0] sm:$0xff]  }
 0x246   :  { %9876 = vst [vmem:[#allocation130_spill] sm:$0xff] %v7969_v49 }
 0x24b   :  { %6492 = vmatmul.mubr.msk.bf16.vlgmr.msra.gmra.mrb[24].mxu1 %vm153_vm3, %v7953_v0  ;;  %v7972_v0 = vpop.permute.xlu1 %1581 }
 0x24c   :  { %6496 = vmatpush3.bf16.msra.mxu1 %v6907_v36  ;;  %6511 = vmatprep.mubr.msk.bf16.mxu1 %vm7207_vm2, %v9847_v18  ;;  %9877 = vst [vmem:[#allocation131_spill] sm:$0xff] %v7972_v0 }
 0x24d   :  { %6497 = vmatprep.subr.bf16.mxu1 %v9847_v18 }
 0x250   :  { %6498 = vmatpush3.bf16.msra.mxu1 %v6908_v37  ;;  %v7976_v37 = vpop.permute.xlu0 %2294 }
 0x251   :  { %6499 = vmatprep.subr.bf16.mxu1 %v9847_v18  ;;  %9878 = vst [vmem:[#allocation132_spill] sm:$0xff] %v7976_v37 }
 0x252   :  { %v2849_v45 = vpop.f32.mrb[20].mxu0 }
 0x253   :  { %v6533_v13 = vpop.f32.mrb[21].mxu0 }
 0x254   :  { %6500 = vmatpush3.bf16.msra.mxu1 %v6909_v11  ;;  %v2852_v36 = vpop.f32.mrb[22].mxu0  ;;  %v7980_v13 = vpop.permute.xlu1 %2404  ;;  %v6912_v11 = vld [vmem:[%s9842_s14 + $0xa8] sm:$0xff]  }
 0x255   :  { %v2863_v53 = vpack.c.bf16 %v2852_v36, %v2849_v45  ;;  %v6534_v7 = vpop.f32.mrb[23].mxu0  ;;  %6501 = vmatprep.subr.bf16.mxu1 %v9847_v18  ;;  %9880 = vst [vmem:[#allocation133_spill] sm:$0xff] %v7980_v13  ;;  %v7983_v49 = vpop.permute.xlu0 %2409  ;;  %v6913_v45 = vld [vmem:[%s9842_s14 + $0xb0] sm:$0xff]   ;;  %v6914_v36 = vld [vmem:[%s9842_s14 + $0xb8] sm:$0xff]   ;;  %v2858_v13 = vld [vmem:[%s9879_s6] sm:$0xff] }
 0x256   :  { %9881 = vst [vmem:[#allocation134_spill] sm:$0xff] %v7983_v49 }
 0x258   :  { %6502 = vmatpush3.bf16.msra.mxu1 %v6910_v14  ;;  %v7986_v7 = vpop.permute.xlu1 %1596 }
 0x259   :  { %6503 = vmatprep.subr.bf16.mxu1 %v9847_v18  ;;  %9882 = vst [vmem:[#allocation135_spill] sm:$0xff] %v7986_v7  ;;  %v7990_v14 = vpop.permute.xlu0 %1461 }
 0x25a   :  { %9883 = vst [vmem:[#allocation136_spill] sm:$0xff] %v7990_v14 }
 0x25c   :  { %6504 = vmatpush3.bf16.msra.mxu1 %v6911_v23  ;;  %v2859_v23 = vld [vmem:[%s9879_s6 + $0x8] sm:$0xff]  ;;  %v7996_v37 = vpop.permute.xlu1 %2419 }
 0x25d   :  { %6505 = vmatprep.subr.bf16.mxu1 %v9847_v18  ;;  %9884 = vst [vmem:[#allocation137_spill] sm:$0xff] %v7996_v37  ;;  %v7998_v49 = vpack.c.bf16 %v2859_v23, %v2858_v13  ;;  %v8000_v8 = vpop.permute.xlu0 %2284 }
 0x25e   :  { %9886 = vst [vmem:[#allocation139_spill] sm:$0xff] %v8000_v8 }
 0x25f   :  { %9885 = vst [vmem:[#allocation138_spill] sm:$0xff] %v7998_v49 }
 0x260   :  { %6506 = vmatpush3.bf16.msra.mxu1 %v6912_v11  ;;  %v2875_v11 = vsel %vm1227_vm8, %v2863_v53, 0  ;;  %v8005_v46 = vpop.permute.xlu1 %586 }
 0x261   :  { %6507 = vmatprep.subr.bf16.mxu1 %v9847_v18  ;;  %9887 = vst [vmem:[#allocation140_spill] sm:$0xff] %v8005_v46 }
 0x264   :  { %6508 = vmatpush3.bf16.msra.mxu1 %v6913_v45  ;;  %v2860_v45 = vld [vmem:[%s9879_s6 + $0x10] sm:$0xff]  ;;  %v8015_v23 = vpop.permute.xlu1 %642 }
 0x265   :  { %6509 = vmatprep.subr.bf16.mxu1 %v9847_v18  ;;  %v8013_v13 = vpack.c.bf16 %v2860_v45, %v2860_v45  ;;  %9890 = vst [vmem:[#allocation143_spill] sm:$0xff] %v8015_v23 }
 0x267   :  { %9889 = vst [vmem:[#allocation142_spill] sm:$0xff] %v8013_v13 }
 0x268   :  { %6510 = vmatpush3.bf16.msra.mxu1 %v6914_v36  ;;  %v8011_v36 = vpop.permute.xlu0 %1476 }
 0x269   :  { %6807 = vmatprep.subr.msk.bf16.mxu1 %vm1227_vm8, %v2863_v53  ;;  %9888 = vst [vmem:[#allocation141_spill] sm:$0xff] %v8011_v36  ;;  %v8023_v53 = vpop.permute.xlu1 %657 }
 0x26a   :  { %9892 = vst [vmem:[#allocation145_spill] sm:$0xff] %v8023_v53 }
 0x26b   :  { %6512 = vmatmul.mubr.bf16.vlgmr.msra.gmra.mrb[28].mxu1 %v7622_v20 }
 0x26c   :  { %6536 = vmatpush3.bf16.msra.mxu1 %v2875_v11  ;;  %6537 = vmatprep.mubr.msk.bf16.mxu1 %vm1220_vm9, %v7998_v49  ;;  %v8021_v20 = vpop.permute.xlu0 %2299 }
 0x26d   :  { %6561 = vmatprep.subr.bf16.mxu1 %v9847_v18  ;;  %9891 = vst [vmem:[#allocation144_spill] sm:$0xff] %v8021_v20  ;;  %v8027_v49 = vpop.permute.xlu1 %672 }
 0x26e   :  { %9894 = vst [vmem:[#allocation147_spill] sm:$0xff] %v8027_v49 }
 0x270   :  { %v8025_v11 = vpop.permute.xlu0 %581 }
 0x271   :  { %9893 = vst [vmem:[#allocation146_spill] sm:$0xff] %v8025_v11  ;;  %v8031_v45 = vpop.permute.xlu1 %652 }
 0x272   :  { %9896 = vst [vmem:[#allocation149_spill] sm:$0xff] %v8031_v45 }
 0x273   :  { %6538 = vmatmul.mubr.msk.bf16.vlgmr.msra.gmra.mrb[32].mxu1 %vm1220_vm9, %v8013_v13 }
 0x274   :  { %6577 = vmatprep.mubr.msk.bf16.mxu1 %vm7207_vm2, %v9847_v18  ;;  %v8029_v37 = vpop.permute.xlu0 %591  ;;  %6562 = vmatpush3.bf16.msra.mxu1 %v6923_v24  ;;  %v514_v24 = vshrl.u32 %v513_v15, 7  ;;  %v8095_v15 = vld [vmem:[%s9911_s12 + $0x4] sm:$0x3] }
 0x275   :  { %9895 = vst [vmem:[#allocation148_spill] sm:$0xff] %v8029_v37  ;;  %v8035_v42 = vpop.permute.xlu1 %687  ;;  %6563 = vmatprep.subr.bf16.mxu1 %v9847_v18  ;;  %9923 = vst [vmem:[#allocation175_spill] sm:$0xff] %v8095_v15  ;;  %v2106_v25 = vrot.slane %v8095_v15, 7 }
 0x276   :  { %9898 = vst [vmem:[#allocation151_spill] sm:$0xff] %v8035_v42  ;;  %v8087_v41 = vsub.s32 1, %v514_v24  ;;  %v8089_v55 = vsub.s32 0, %v514_v24 }
 0x278   :  { %v8033_v8 = vpop.permute.xlu0 %647  ;;  %6564 = vmatpush3.bf16.msra.mxu1 %v6924_v31  ;;  %v6927_v31 = vld [vmem:[%s7345_s3 + $0x120] sm:$0xff]   ;;  %9920 = vst [vmem:[#allocation172_spill] sm:$0xff] %v8087_v41  ;;  %9921 = vst [vmem:[#allocation173_spill] sm:$0xff] %v8089_v55  ;;  %v516_v54 = vrot.slane %v506_v4, %v8089_v55 }
 0x279   :  { %9897 = vst [vmem:[#allocation150_spill] sm:$0xff] %v8033_v8  ;;  %v8039_v7 = vpop.permute.xlu1 %682  ;;  %6565 = vmatprep.subr.bf16.mxu1 %v9847_v18 }
 0x27a   :  { %9900 = vst [vmem:[#allocation153_spill] sm:$0xff] %v8039_v7 }
 0x27c   :  { %v8037_v13 = vpop.permute.xlu0 %662  ;;  %6566 = vmatpush3.bf16.msra.mxu1 %v6925_v33  ;;  %v578_v33 = vsub.f32 %v506_v4, %v576_v60  ;;  %v1283_v60 = vrot.slane %v8098_v17, 7 }
 0x27d   :  { %9899 = vst [vmem:[#allocation152_spill] sm:$0xff] %v8037_v13  ;;  %v8043_v35 = vpop.permute.xlu1 %707  ;;  %6567 = vmatprep.subr.bf16.mxu1 %v9847_v18 }
 0x27e   :  { %9902 = vst [vmem:[#allocation155_spill] sm:$0xff] %v8043_v35  ;;  %v8116_v27 = vsub.f32 %v8098_v17, %v1283_v60 }
 0x280   :  { %v8041_v20 = vpop.permute.xlu0 %677  ;;  %6568 = vmatpush3.bf16.msra.mxu1 %v6926_v2  ;;  %v597_v2 = vrot.slane %v578_v33, %v8087_v41  ;;  %v8111_v33 = vsub.f32 %v8095_v15, %v2106_v25 }
 0x281   :  { %9901 = vst [vmem:[#allocation154_spill] sm:$0xff] %v8041_v20  ;;  %v8047_v0 = vpop.permute.xlu1 %717  ;;  %6569 = vmatprep.subr.bf16.mxu1 %v9847_v18 }
 0x282   :  { %9904 = vst [vmem:[#allocation157_spill] sm:$0xff] %v8047_v0  ;;  %v598_v58 = vmul.f32 %v597_v2, %v8025_v11  ;;  %v599_v56 = vmul.f32 %v597_v2, %v8005_v46 }
 0x284   :  { %v8045_v40 = vpop.permute.xlu0 %667  ;;  %6570 = vmatpush3.bf16.msra.mxu1 %v6927_v31  ;;  %v600_v31 = vmul.f32 %v597_v2, %v8029_v37 }
 0x285   :  { %9903 = vst [vmem:[#allocation156_spill] sm:$0xff] %v8045_v40  ;;  %v8051_v3 = vpop.permute.xlu1 %762  ;;  %6571 = vmatprep.subr.bf16.mxu1 %v9847_v18 }
 0x286   :  { %9906 = vst [vmem:[#allocation159_spill] sm:$0xff] %v8051_v3 }
 0x288   :  { %v8049_v48 = vpop.permute.xlu0 %692 }
 0x289   :  { %9905 = vst [vmem:[#allocation158_spill] sm:$0xff] %v8049_v48  ;;  %v8055_v12 = vpop.permute.xlu1 %777 }
 0x28a   :  { %9908 = vst [vmem:[#allocation161_spill] sm:$0xff] %v8055_v12 }
 0x28c   :  { %v8053_v44 = vpop.permute.xlu0 %702 }
 0x28d   :  { %9907 = vst [vmem:[#allocation160_spill] sm:$0xff] %v8053_v44  ;;  %v8059_v59 = vpop.permute.xlu1 %712 }
 0x28e   :  { %9910 = vst [vmem:[#allocation163_spill] sm:$0xff] %v8059_v59 }
 0x290   :  { %v8057_v52 = vpop.permute.xlu0 %697 }
 0x291   :  { %9909 = vst [vmem:[#allocation162_spill] sm:$0xff] %v8057_v52  ;;  %v8063_v10 = vpop.permute.xlu1 %737 }
 0x292   :  { %9913 = vst [vmem:[#allocation165_spill] sm:$0xff] %v8063_v10 }
 0x294   :  { %v8061_v63 = vpop.permute.xlu0 %722 }
 0x295   :  { %9912 = vst [vmem:[#allocation164_spill] sm:$0xff] %v8061_v63  ;;  %v8070_v16 = vpop.permute.xlu1 %797 }
 0x296   :  { %9915 = vst [vmem:[#allocation167_spill] sm:$0xff] %v8070_v16 }
 0x298   :  { %v8066_v30 = vpop.permute.xlu0 %767 }
 0x299   :  { %9914 = vst [vmem:[#allocation166_spill] sm:$0xff] %v8066_v30  ;;  %v8078_v19 = vpop.permute.xlu1 %747 }
 0x29a   :  { %9917 = vst [vmem:[#allocation169_spill] sm:$0xff] %v8078_v19 }
 0x29c   :  { %v8074_v34 = vpop.permute.xlu0 %782 }
 0x29d   :  { %9916 = vst [vmem:[#allocation168_spill] sm:$0xff] %v8074_v34  ;;  %v8085_v36 = vpop.permute.xlu1 %772 }
 0x29e   :  { %9919 = vst [vmem:[#allocation171_spill] sm:$0xff] %v8085_v36 }
 0x2a0   :  { %v8081_v61 = vpop.permute.xlu0 %732 }
 0x2a1   :  { %9918 = vst [vmem:[#allocation170_spill] sm:$0xff] %v8081_v61  ;;  %v8102_v29 = vpop.permute.xlu1 %807 }
 0x2a2   :  { %9924 = vst [vmem:[#allocation176_spill] sm:$0xff] %v8102_v29 }
 0x2a4   :  { %v8092_v14 = vpop.permute.xlu0 %792 }
 0x2a5   :  { %9922 = vst [vmem:[#allocation174_spill] sm:$0xff] %v8092_v14  ;;  %v8119_v37 = vpop.permute.xlu1 %742 }
 0x2a6   :  { %9926 = vst [vmem:[#allocation178_spill] sm:$0xff] %v8119_v37 }
 0x2a8   :  { %v8107_v32 = vpop.permute.xlu0 %727 }
 0x2a9   :  { %9925 = vst [vmem:[#allocation177_spill] sm:$0xff] %v8107_v32 }
 0x2ce   :  { %v6401_v24 = vpop.f32.mrb[8].mxu1 }
 0x2cf   :  { %v567_v62 = vadd.f32 %v6401_v24, %v516_v54  ;;  %v558_v26 = vpop.f32.mrb[9].mxu1 }
 0x2d0   :  { %v559_v9 = vadd.f32 %v558_v26, %v516_v54  ;;  %v6402_v1 = vpop.f32.mrb[10].mxu1 }
 0x2d1   :  { %v8113_v4 = vadd.f32 %v600_v31, %v567_v62  ;;  %v561_v5 = vpop.f32.mrb[11].mxu1 }
 0x2d2   :  { %v8121_v50 = vadd.f32 %v598_v58, %v559_v9  ;;  %v562_v24 = vadd.f32 %v561_v5, %v516_v54  ;;  %v8139_v9 = vpop.permute.xlu0 %752 }
 0x2d3   :  { %v822_v26 = vadd.f32 %v8031_v45, %v8113_v4  ;;  %v825_v1 = vadd.f32 %v8045_v40, %v8113_v4  ;;  %v828_v25 = vadd.f32 %v8039_v7, %v8113_v4  ;;  %v831_v62 = vadd.f32 %v8057_v52, %v8113_v4  ;;  %9927 = vst [vmem:[#allocation179_spill] sm:$0xff] %v8139_v9 }
 0x2d4   :  { %v8131_v60 = vadd.f32 %v599_v56, %v562_v24  ;;  %v820_v2 = vadd.f32 %v8015_v23, %v8121_v50  ;;  %v823_v5 = vadd.f32 %v8023_v53, %v8121_v50  ;;  %v826_v58 = vadd.f32 %v8027_v49, %v8121_v50  ;;  %v8165_v53 = vpop.permute.xlu1 %757 }
 0x2d5   :  { %v829_v54 = vadd.f32 %v8035_v42, %v8121_v50  ;;  %v832_v31 = vadd.f32 %v8053_v44, %v8121_v50  ;;  %v834_v56 = vadd.f32 %v8059_v59, %v8113_v4  ;;  %v835_v24 = vadd.f32 %v8047_v0, %v8121_v50  ;;  %9928 = vst [vmem:[#allocation180_spill] sm:$0xff] %v8165_v53 }
 0x2d6   :  { %v821_v52 = vadd.f32 %v8033_v8, %v8131_v60  ;;  %v824_v49 = vadd.f32 %v8037_v13, %v8131_v60  ;;  %v827_v7 = vadd.f32 %v8041_v20, %v8131_v60  ;;  %v830_v42 = vadd.f32 %v8049_v48, %v8131_v60 }
 0x2d7   :  { %v833_v44 = vadd.f32 %v8043_v35, %v8131_v60  ;;  %v836_v59 = vadd.f32 %v8061_v63, %v8131_v60  ;;  %v837_v0 = vadd.f32 %v8107_v32, %v8113_v4  ;;  %v838_v8 = vadd.f32 %v8081_v61, %v8121_v50 }
 0x2d8   :  { %v839_v20 = vadd.f32 %v8063_v10, %v8131_v60  ;;  %v840_v48 = vadd.f32 %v8119_v37, %v8113_v4  ;;  %v841_v35 = vadd.f32 %v8078_v19, %v8121_v50  ;;  %v842_v63 = vadd.f32 %v8139_v9, %v8131_v60  ;;  %v8177_v10 = vpop.permute.xlu0 %787 }
 0x2d9   :  { %v843_v32 = vadd.f32 %v8165_v53, %v8113_v4  ;;  %v856_v13 = vmax.f32 %v820_v2, %v821_v52  ;;  %v864_v23 = vmax.f32 %v823_v5, %v824_v49  ;;  %v872_v61 = vmax.f32 %v826_v58, %v827_v7  ;;  %9929 = vst [vmem:[#allocation181_spill] sm:$0xff] %v8177_v10 }
 0x2da   :  { %v880_v40 = vmax.f32 %v829_v54, %v830_v42  ;;  %v888_v45 = vmax.f32 %v832_v31, %v833_v44  ;;  %v896_v46 = vmax.f32 %v835_v24, %v836_v59  ;;  %v904_v11 = vmax.f32 %v838_v8, %v839_v20 }
 0x2db   :  { %v857_v15 = vmax.f32 %v856_v13, %v822_v26  ;;  %v865_v37 = vmax.f32 %v864_v23, %v825_v1  ;;  %v873_v6 = vmax.f32 %v872_v61, %v828_v25  ;;  %v912_v28 = vmax.f32 %v841_v35, %v842_v63 }
 0x2dc   :  { %v881_v19 = vmax.f32 %v880_v40, %v831_v62  ;;  %v889_v57 = vmax.f32 %v888_v45, %v834_v56  ;;  %v897_v51 = vmax.f32 %v896_v46, %v837_v0  ;;  %v905_v9 = vmax.f32 %v904_v11, %v840_v48  ;;  %v8179_v46 = vpop.permute.xlu0 %812 }
 0x2dd   :  { %v858_v21 = vrot.slane %v857_v15, 4  ;;  %v866_v22 = vrot.slane %v865_v37, 4  ;;  %v874_v53 = vrot.slane %v873_v6, 4  ;;  %v913_v52 = vmax.f32 %v912_v28, %v843_v32  ;;  %9930 = vst [vmem:[#allocation182_spill] sm:$0xff] %v8179_v46 }
 0x2de   :  { %v882_v49 = vrot.slane %v881_v19, 4  ;;  %v890_v7 = vrot.slane %v889_v57, 4  ;;  %v898_v42 = vrot.slane %v897_v51, 4  ;;  %v906_v44 = vrot.slane %v905_v9, 4 }
 0x2df   :  { %v859_v8 = vmax.f32 %v857_v15, %v858_v21  ;;  %v867_v59 = vmax.f32 %v865_v37, %v866_v22  ;;  %v875_v20 = vmax.f32 %v873_v6, %v874_v53  ;;  %v914_v13 = vrot.slane %v913_v52, 4 }
 0x2e0   :  { %v883_v61 = vmax.f32 %v881_v19, %v882_v49  ;;  %v891_v63 = vmax.f32 %v889_v57, %v890_v7  ;;  %v899_v40 = vmax.f32 %v897_v51, %v898_v42  ;;  %v907_v35 = vmax.f32 %v905_v9, %v906_v44  ;;  %v8181_v54 = vpop.permute.xlu0 %802 }
 0x2e1   :  { %v860_v48 = vrot.slane %v859_v8, 2  ;;  %v868_v0 = vrot.slane %v867_v59, 2  ;;  %v876_v28 = vrot.slane %v875_v20, 2  ;;  %v915_v32 = vmax.f32 %v913_v52, %v914_v13  ;;  %9931 = vst [vmem:[#allocation183_spill] sm:$0xff] %v8181_v54 }
 0x2e2   :  { %v884_v23 = vrot.slane %v883_v61, 2  ;;  %v892_v11 = vrot.slane %v891_v63, 2  ;;  %v900_v45 = vrot.slane %v899_v40, 2  ;;  %v908_v21 = vrot.slane %v907_v35, 2 }
 0x2e3   :  { %v861_v22 = vmax.f32 %v859_v8, %v860_v48  ;;  %v869_v6 = vmax.f32 %v867_v59, %v868_v0  ;;  %v877_v37 = vmax.f32 %v875_v20, %v876_v28  ;;  %v916_v19 = vrot.slane %v915_v32, 2 }
 0x2e4   :  { %v885_v51 = vmax.f32 %v883_v61, %v884_v23  ;;  %v893_v57 = vmax.f32 %v891_v63, %v892_v11  ;;  %v901_v53 = vmax.f32 %v899_v40, %v900_v45  ;;  %v909_v15 = vmax.f32 %v907_v35, %v908_v21 }
 0x2e5   :  { %v862_v26 = vrot.slane %v861_v22, 1  ;;  %v870_v1 = vrot.slane %v869_v6, 1  ;;  %v878_v25 = vrot.slane %v877_v37, 1  ;;  %v917_v62 = vmax.f32 %v915_v32, %v916_v19  ;;  %v8201_v32 = vld [vmem:[%s9932_s27] ss:$0 sm:$0xff] }
 0x2e6   :  { %v886_v2 = vrot.slane %v885_v51, 1  ;;  %v894_v5 = vrot.slane %v893_v57, 1  ;;  %v902_v58 = vrot.slane %v901_v53, 1  ;;  %v910_v9 = vrot.slane %v909_v15, 1 }
 0x2e7   :  { %v863_v31 = vmax.f32 %v861_v22, %v862_v26  ;;  %v871_v56 = vmax.f32 %v869_v6, %v870_v1  ;;  %v879_v24 = vmax.f32 %v877_v37, %v878_v25  ;;  %v918_v52 = vrot.slane %v917_v62, 1  ;;  %v8210_v22 = vpop.permute.xlu0 %817 }
 0x2e8   :  { %v887_v49 = vmax.f32 %v885_v51, %v886_v2  ;;  %v895_v7 = vmax.f32 %v893_v57, %v894_v5  ;;  %v903_v42 = vmax.f32 %v901_v53, %v902_v58  ;;  %v911_v44 = vmax.f32 %v909_v15, %v910_v9  ;;  %9933 = vst [vmem:[#allocation184_spill] sm:$0xff] %v8210_v22  ;;  %v6928_v57 = vld [vmem:[%s7345_s3 + $0x128] sm:$0xff]   ;;  %v6929_v58 = vld [vmem:[%s7345_s3 + $0x130] sm:$0xff]  }
 0x2e9   :  { %v919_v8 = vmax.f32 %v917_v62, %v918_v52  ;;  %v1061_v59 = vsel %vm1060_vm10, %v871_v56, %v863_v31  ;;  %v845_v20 = vadd.f32 %v8066_v30, %v8131_v60  ;;  %v844_v61 = vadd.f32 %v8051_v3, %v8121_v50  ;;  %6572 = vmatpush3.bf16.msra.mxu1 %v6928_v57  ;;  %v8227_v31 = vld [vmem:[%s9911_s12 + $0x6] sm:$0x3] }
 0x2ea   :  { %v1063_v13 = vsel %vm1062_vm11, %v879_v24, %v1061_v59  ;;  %v846_v63 = vadd.f32 %v8085_v36, %v8113_v4  ;;  %v848_v40 = vadd.f32 %v8074_v34, %v8131_v60  ;;  %v847_v48 = vadd.f32 %v8055_v12, %v8121_v50  ;;  %6573 = vmatprep.subr.bf16.mxu1 %v9847_v18 }
 0x2eb   :  { %v1065_v35 = vsel %vm1064_vm12, %v887_v49, %v1063_v13  ;;  %v849_v0 = vadd.f32 %v8177_v10, %v8113_v4  ;;  %v851_v28 = vadd.f32 %v8070_v16, %v8131_v60  ;;  %v850_v11 = vadd.f32 %v8092_v14, %v8121_v50 }
 0x2ec   :  { %v1067_v23 = vsel %vm1066_vm13, %v895_v7, %v1065_v35  ;;  %v853_v45 = vadd.f32 %v8102_v29, %v8121_v50  ;;  %v854_v21 = vadd.f32 %v8179_v46, %v8131_v60  ;;  %v852_v37 = vadd.f32 %v8181_v54, %v8113_v4 }
 0x2ed   :  { %v1069_v6 = vsel %vm1068_vm14, %v903_v42, %v1067_v23  ;;  %v920_v19 = vmax.f32 %v844_v61, %v845_v20  ;;  %v928_v51 = vmax.f32 %v847_v48, %v848_v40  ;;  %v855_v50 = vadd.f32 %v8210_v22, %v8113_v4  ;;  %6574 = vmatpush3.bf16.msra.mxu1 %v6929_v58 }
 0x2ee   :  { %v1041_v53 = vpop.f32.mrb[12].mxu1  ;;  %v1071_v15 = vsel %vm1070_vm15, %v911_v44, %v1069_v6  ;;  %v936_v26 = vmax.f32 %v850_v11, %v851_v28  ;;  %v944_v60 = vmax.f32 %v853_v45, %v854_v21  ;;  %v8224_v9 = vrot.slane %v8111_v33, %v8087_v41  ;;  %6575 = vmatprep.subr.bf16.mxu1 %v9847_v18 }
 0x2ef   :  { %v1042_v1 = vadd.f32 %v8201_v32, %v1041_v53  ;;  %v1073_v25 = vsel %vm1072_vm1, %v919_v8, %v1071_v15  ;;  %v6421_v62 = vpop.f32.mrb[13].mxu1  ;;  %v921_v2 = vmax.f32 %v920_v19, %v846_v63  ;;  %v929_v5 = vmax.f32 %v928_v51, %v849_v0  ;;  %v6930_v63 = vld [vmem:[%s7345_s3 + $0x138] sm:$0xff]  }
 0x2f0   :  { %v937_v56 = vmax.f32 %v936_v26, %v852_v37  ;;  %v945_v4 = vmax.f32 %v944_v60, %v855_v50  ;;  %v1044_v24 = vpop.f32.mrb[14].mxu1  ;;  %v1304_v52 = vrot.slane %v8116_v27, %v8087_v41  ;;  %v2929_v33 = vrot.slane %v8227_v31, 7 }
 0x2f1   :  { %v1079_v49 = vadd.f32 %v1073_v25, %v1042_v1  ;;  %v922_v7 = vrot.slane %v921_v2, 4  ;;  %v930_v42 = vrot.slane %v929_v5, 4  ;;  %v6422_v44 = vpop.f32.mrb[15].mxu1  ;;  %v1219_v61 = vrot.slane %v8098_v17, %v8089_v55  ;;  %6576 = vmatpush3.bf16.msra.mxu1 %v6930_v63 }
 0x2f2   :  { %v938_v8 = vrot.slane %v937_v56, 4  ;;  %v946_v59 = vrot.slane %v945_v4, 4  ;;  %v8238_v40 = vmul.f32 %v8224_v9, %v7516_v38  ;;  %v1305_v48 = vmul.f32 %v1304_v52, %v7518_v39  ;;  %6587 = vmatprep.subr.bf16.mxu1 %v9847_v18  ;;  %v9934_v44 = vld [vmem:[#allocation65_spill] sm:$0xff]  ;;  %v9951_v38 = vld [vmem:[#allocation122_spill] sm:$0xff] }
 0x2f3   :  { %v923_v20 = vmax.f32 %v921_v2, %v922_v7  ;;  %v931_v13 = vmax.f32 %v929_v5, %v930_v42  ;;  %v1081_v0 = vmax.f32 %v1079_v49, 0.0  ;;  %v1306_v11 = vmul.f32 %v1304_v52, %v7524_v43 }
 0x2f4   :  { %v939_v27 = vmax.f32 %v937_v56, %v938_v8  ;;  %v947_v35 = vmax.f32 %v945_v4, %v946_v59  ;;  %v1307_v45 = vmul.f32 %v1304_v52, %v7530_v47  ;;  %v8245_v37 = vsub.f32 %v8227_v31, %v2929_v33 }
 0x2f5   :  { %v924_v28 = vrot.slane %v923_v20, 2  ;;  %v932_v23 = vrot.slane %v931_v13, 2  ;;  %v1045_v26 = vadd.f32 %v8201_v32, %v1044_v24  ;;  %v3306_v25 = vmax.f32 %v1081_v0, 0.0  ;;  %v9935_v24 = vld [vmem:[#allocation64_spill] sm:$0xff] }
 0x2f6   :  { %v940_v17 = vrot.slane %v939_v27, 2  ;;  %v948_v21 = vrot.slane %v947_v35, 2  ;;  %v6447_v6 = vpop.f32.mrb[16].mxu1 }
 0x2f7   :  { %v925_v19 = vmax.f32 %v923_v20, %v924_v28  ;;  %v933_v51 = vmax.f32 %v931_v13, %v932_v23  ;;  %v1274_v57 = vadd.f32 %v6447_v6, %v1219_v61  ;;  %v1265_v53 = vpop.f32.mrb[17].mxu1  ;;  %v9936_v13 = vld [vmem:[#allocation41_spill] sm:$0xff] }
 0x2f8   :  { %v941_v15 = vmax.f32 %v939_v27, %v940_v17  ;;  %v949_v50 = vmax.f32 %v947_v35, %v948_v21  ;;  %v1266_v60 = vadd.f32 %v1265_v53, %v1219_v61  ;;  %v6448_v1 = vpop.f32.mrb[18].mxu1  ;;  %v9937_v35 = vld [vmem:[#allocation43_spill] sm:$0xff]  ;;  %v9939_v28 = vld [vmem:[#allocation81_spill] sm:$0xff]  ;;  %v9940_v17 = vld [vmem:[#allocation40_spill] sm:$0xff] }
 0x2f9   :  { %v926_v62 = vrot.slane %v925_v19, 1  ;;  %v934_v2 = vrot.slane %v933_v51, 1  ;;  %v8249_v5 = vadd.f32 %v1307_v45, %v1274_v57  ;;  %v1268_v58 = vpop.f32.mrb[19].mxu1  ;;  %v9941_v21 = vld [vmem:[#allocation42_spill] sm:$0xff]  ;;  %v9943_v53 = vld [vmem:[#allocation67_spill] sm:$0xff]  ;;  %v9945_v1 = vld [vmem:[#allocation93_spill] sm:$0xff] }
 0x2fa   :  { %v942_v56 = vrot.slane %v941_v15, 1  ;;  %v950_v4 = vrot.slane %v949_v50, 1  ;;  %v8251_v52 = vadd.f32 %v1305_v48, %v1266_v60  ;;  %v1269_v49 = vadd.f32 %v1268_v58, %v1219_v61  ;;  %v9938_v48 = vld [vmem:[#allocation57_spill] sm:$0xff]  ;;  %v9946_v58 = vld [vmem:[#allocation80_spill] sm:$0xff] }
 0x2fb   :  { %v927_v7 = vmax.f32 %v925_v19, %v926_v62  ;;  %v935_v42 = vmax.f32 %v933_v51, %v934_v2  ;;  %v1601_v32 = vadd.f32 %v9934_v44, %v8249_v5  ;;  %v1604_v8 = vadd.f32 %v9935_v24, %v8249_v5  ;;  %v9942_v19 = vld [vmem:[#allocation56_spill] sm:$0xff] }
 0x2fc   :  { %v943_v59 = vmax.f32 %v941_v15, %v942_v56  ;;  %v951_v33 = vmax.f32 %v949_v50, %v950_v4  ;;  %v8257_v20 = vadd.f32 %v1306_v11, %v1269_v49  ;;  %v1599_v63 = vadd.f32 %v9936_v13, %v8251_v52  ;;  %v9944_v50 = vld [vmem:[#allocation66_spill] sm:$0xff]  ;;  %v9947_v4 = vld [vmem:[#allocation83_spill] sm:$0xff] }
 0x2fd   :  { %v1074_v27 = vsel %vm1060_vm10, %v935_v42, %v927_v7  ;;  %v1602_v61 = vadd.f32 %v9937_v35, %v8251_v52  ;;  %v1605_v0 = vadd.f32 %v9938_v48, %v8251_v52  ;;  %v1607_v23 = vadd.f32 %v9939_v28, %v8249_v5  ;;  %v9948_v7 = vld [vmem:[#allocation109_spill] sm:$0xff] }
 0x2fe   :  { %v1075_v45 = vsel %vm1062_vm11, %v943_v59, %v1074_v27  ;;  %v1600_v11 = vadd.f32 %v9940_v17, %v8257_v20  ;;  %v1603_v6 = vadd.f32 %v9941_v21, %v8257_v20  ;;  %v1606_v51 = vadd.f32 %v9942_v19, %v8257_v20  ;;  %v9949_v59 = vld [vmem:[#allocation92_spill] sm:$0xff]  ;;  %v9950_v27 = vld [vmem:[#allocation95_spill] sm:$0xff] }
 0x2ff   :  { %v1076_v57 = vsel %vm1064_vm12, %v951_v33, %v1075_v45  ;;  %v1608_v15 = vadd.f32 %v9943_v53, %v8251_v52  ;;  %v1609_v60 = vadd.f32 %v9944_v50, %v8257_v20  ;;  %v1610_v62 = vadd.f32 %v9945_v1, %v8249_v5  ;;  %v9953_v21 = vld [vmem:[#allocation112_spill] sm:$0xff] }
 0x300   :  { %v1080_v2 = vadd.f32 %v1076_v57, %v1045_v26  ;;  %v1611_v56 = vadd.f32 %v9946_v58, %v8251_v52  ;;  %v1612_v49 = vadd.f32 %v9947_v4, %v8257_v20  ;;  %v1613_v42 = vadd.f32 %v9948_v7, %v8249_v5  ;;  %v9952_v26 = vld [vmem:[#allocation105_spill] sm:$0xff]  ;;  %v9954_v4 = vld [vmem:[#allocation136_spill] sm:$0xff] }
 0x301   :  { %v1614_v33 = vadd.f32 %v9949_v59, %v8251_v52  ;;  %v1615_v45 = vadd.f32 %v9950_v27, %v8257_v20  ;;  %v1616_v50 = vadd.f32 %v9951_v38, %v8249_v5  ;;  %v1617_v57 = vadd.f32 %v9952_v26, %v8251_v52  ;;  %v9955_v7 = vld [vmem:[#allocation117_spill] sm:$0xff] }
 0x302   :  { %v1082_v19 = vmax.f32 %v1080_v2, 0.0  ;;  %v1618_v17 = vadd.f32 %v9953_v21, %v8257_v20  ;;  %v1619_v58 = vadd.f32 %v9954_v4, %v8249_v5  ;;  %v1620_v53 = vadd.f32 %v9955_v7, %v8251_v52  ;;  %v9956_v59 = vld [vmem:[#allocation125_spill] sm:$0xff] }
 0x303   :  { %v1621_v48 = vadd.f32 %v9956_v59, %v8257_v20  ;;  %v9957_v27 = vld [vmem:[#allocation141_spill] sm:$0xff]  ;;  %v1647_v38 = vmax.f32 %v1599_v63, %v1600_v11  ;;  %v1655_v28 = vmax.f32 %v1602_v61, %v1603_v6  ;;  %v1663_v26 = vmax.f32 %v1605_v0, %v1606_v51 }
 0x304   :  { %v1622_v1 = vadd.f32 %v9957_v27, %v8249_v5  ;;  %v3307_v35 = vmax.f32 %v1082_v19, 0.0  ;;  %v1671_v2 = vmax.f32 %v1608_v15, %v1609_v60  ;;  %v1679_v13 = vmax.f32 %v1611_v56, %v1612_v49  ;;  %v8308_v27 = vpop.f32.mrb[24].mxu0 }
 0x305   :  { %v1648_v24 = vmax.f32 %v1647_v38, %v1601_v32  ;;  %v1656_v21 = vmax.f32 %v1655_v28, %v1604_v8  ;;  %v1687_v44 = vmax.f32 %v1614_v33, %v1615_v45  ;;  %v1695_v43 = vmax.f32 %v1617_v57, %v1618_v17  ;;  %9959 = vst [vmem:[#allocation186_spill] sm:$0xff] %v8308_v27  ;;  %v6559_v6 = vpop.f32.mrb[25].mxu0 }
 0x306   :  { %v8306_v4 = vpack.c.bf16 %v3307_v35, %v3306_v25  ;;  %v1664_v39 = vmax.f32 %v1663_v26, %v1607_v23  ;;  %v1672_v7 = vmax.f32 %v1671_v2, %v1610_v62  ;;  %v1680_v47 = vmax.f32 %v1679_v13, %v1613_v42  ;;  %v3282_v25 = vpop.f32.mrb[26].mxu0 }
 0x307   :  { %v1649_v22 = vrot.slane %v1648_v24, 4  ;;  %v1657_v59 = vrot.slane %v1656_v21, 4  ;;  %v1688_v29 = vmax.f32 %v1687_v44, %v1616_v50  ;;  %v1696_v54 = vmax.f32 %v1695_v43, %v1619_v58  ;;  %v6560_v19 = vpop.f32.mrb[27].mxu0  ;;  %v8316_v25 = vld [vmem:[%s9932_s27 + $0x1] ss:$0 sm:$0xff] }
 0x308   :  { %9958 = vst [vmem:[#allocation185_spill] sm:$0xff] %v8306_v4  ;;  %v1665_v63 = vrot.slane %v1664_v39, 4  ;;  %v1673_v61 = vrot.slane %v1672_v7, 4  ;;  %v1681_v0 = vrot.slane %v1680_v47, 4  ;;  %v1703_v11 = vmax.f32 %v1620_v53, %v1621_v48 }
 0x309   :  { %v1650_v38 = vmax.f32 %v1648_v24, %v1649_v22  ;;  %v1658_v32 = vmax.f32 %v1656_v21, %v1657_v59  ;;  %v1689_v8 = vrot.slane %v1688_v29, 4  ;;  %v1697_v28 = vrot.slane %v1696_v54, 4 }
 0x30a   :  { %v1666_v35 = vmax.f32 %v1664_v39, %v1665_v63  ;;  %v1674_v23 = vmax.f32 %v1672_v7, %v1673_v61  ;;  %v1682_v17 = vmax.f32 %v1680_v47, %v1681_v0  ;;  %v1704_v13 = vmax.f32 %v1703_v11, %v1622_v1 }
 0x30b   :  { %v1651_v51 = vrot.slane %v1650_v38, 2  ;;  %v1659_v44 = vrot.slane %v1658_v32, 2  ;;  %v1690_v43 = vmax.f32 %v1688_v29, %v1689_v8  ;;  %v1698_v15 = vmax.f32 %v1696_v54, %v1697_v28 }
 0x30c   :  { %v1667_v50 = vrot.slane %v1666_v35, 2  ;;  %v1675_v60 = vrot.slane %v1674_v23, 2  ;;  %v1683_v62 = vrot.slane %v1682_v17, 2  ;;  %v1705_v58 = vrot.slane %v1704_v13, 4 }
 0x30d   :  { %v1652_v48 = vmax.f32 %v1650_v38, %v1651_v51  ;;  %v1660_v53 = vmax.f32 %v1658_v32, %v1659_v44  ;;  %v1691_v22 = vrot.slane %v1690_v43, 2  ;;  %v1699_v24 = vrot.slane %v1698_v15, 2  ;;  %v9962_v51 = vld [vmem:[#allocation69_spill] sm:$0xff] }
 0x30e   :  { %v1668_v21 = vmax.f32 %v1666_v35, %v1667_v50  ;;  %v1676_v56 = vmax.f32 %v1674_v23, %v1675_v60  ;;  %v1684_v49 = vmax.f32 %v1682_v17, %v1683_v62  ;;  %v1706_v39 = vmax.f32 %v1704_v13, %v1705_v58  ;;  %v9960_v23 = vld [vmem:[#allocation45_spill] sm:$0xff]  ;;  %v9961_v13 = vld [vmem:[#allocation44_spill] sm:$0xff]  ;;  %v9964_v50 = vld [vmem:[#allocation46_spill] sm:$0xff] }
 0x30f   :  { %v1653_v7 = vrot.slane %v1652_v48, 1  ;;  %v1661_v47 = vrot.slane %v1660_v53, 1  ;;  %v1692_v1 = vmax.f32 %v1690_v43, %v1691_v22  ;;  %v1700_v42 = vmax.f32 %v1698_v15, %v1699_v24  ;;  %v9963_v43 = vld [vmem:[#allocation47_spill] sm:$0xff] }
 0x310   :  { %v1669_v59 = vrot.slane %v1668_v21, 1  ;;  %v1677_v33 = vrot.slane %v1676_v56, 1  ;;  %v1685_v29 = vrot.slane %v1684_v49, 1  ;;  %v1707_v54 = vrot.slane %v1706_v39, 2  ;;  %v9966_v24 = vld [vmem:[#allocation59_spill] sm:$0xff] }
 0x311   :  { %v1654_v45 = vmax.f32 %v1652_v48, %v1653_v7  ;;  %v1662_v26 = vmax.f32 %v1660_v53, %v1661_v47  ;;  %v1693_v57 = vrot.slane %v1692_v1, 1  ;;  %v1701_v2 = vrot.slane %v1700_v42, 1  ;;  %v9965_v53 = vld [vmem:[#allocation68_spill] sm:$0xff]  ;;  %v9967_v7 = vld [vmem:[#allocation58_spill] sm:$0xff] }
 0x312   :  { %v8312_v63 = vrot.slane %v8245_v37, %v8087_v41  ;;  %v1670_v61 = vmax.f32 %v1668_v21, %v1669_v59  ;;  %v1678_v0 = vmax.f32 %v1676_v56, %v1677_v33  ;;  %v1708_v11 = vmax.f32 %v1706_v39, %v1707_v54  ;;  %v9969_v33 = vld [vmem:[#allocation71_spill] sm:$0xff]  ;;  %v9970_v54 = vld [vmem:[#allocation70_spill] sm:$0xff] }
 0x313   :  { %v1686_v6 = vmax.f32 %v1684_v49, %v1685_v29  ;;  %v1694_v38 = vmax.f32 %v1692_v1, %v1693_v57  ;;  %v1702_v32 = vmax.f32 %v1700_v42, %v1701_v2  ;;  %v1888_v8 = vsel %vm1060_vm10, %v1662_v26, %v1654_v45  ;;  %v9968_v1 = vld [vmem:[#allocation82_spill] sm:$0xff] }
 0x314   :  { %v1709_v28 = vrot.slane %v1708_v11, 1  ;;  %v1889_v35 = vsel %vm1062_vm11, %v1670_v61, %v1888_v8  ;;  %v1623_v17 = vadd.f32 %v9960_v23, %v8251_v52  ;;  %v1624_v37 = vadd.f32 %v9961_v13, %v8257_v20  ;;  %v9971_v26 = vld [vmem:[#allocation94_spill] sm:$0xff] }
 0x315   :  { %v1890_v19 = vsel %vm1064_vm12, %v1678_v0, %v1889_v35  ;;  %v1625_v44 = vadd.f32 %v9962_v51, %v8249_v5  ;;  %v1626_v15 = vadd.f32 %v9963_v43, %v8251_v52  ;;  %v1627_v60 = vadd.f32 %v9964_v50, %v8257_v20  ;;  %v9972_v0 = vld [vmem:[#allocation85_spill] sm:$0xff] }
 0x316   :  { %v1710_v62 = vmax.f32 %v1708_v11, %v1709_v28  ;;  %v1865_v58 = vpop.f32.mrb[20].mxu1  ;;  %v1891_v48 = vsel %vm1066_vm13, %v1686_v6, %v1890_v19  ;;  %v1628_v22 = vadd.f32 %v9965_v53, %v8249_v5  ;;  %v1629_v21 = vadd.f32 %v9966_v24, %v8251_v52  ;;  %v9973_v6 = vld [vmem:[#allocation84_spill] sm:$0xff]  ;;  %v9975_v19 = vld [vmem:[#allocation97_spill] sm:$0xff] }
 0x317   :  { %v1866_v56 = vadd.f32 %v8316_v25, %v1865_v58  ;;  %v1892_v49 = vsel %vm1068_vm14, %v1694_v38, %v1891_v48  ;;  %v6467_v39 = vpop.f32.mrb[21].mxu1  ;;  %v1630_v47 = vadd.f32 %v9967_v7, %v8257_v20  ;;  %v1631_v42 = vadd.f32 %v9968_v1, %v8249_v5  ;;  %v9976_v48 = vld [vmem:[#allocation96_spill] sm:$0xff] }
 0x318   :  { %v1893_v59 = vsel %vm1070_vm15, %v1702_v32, %v1892_v49  ;;  %v1632_v29 = vadd.f32 %v9969_v33, %v8251_v52  ;;  %v1633_v45 = vadd.f32 %v9970_v54, %v8257_v20  ;;  %v1634_v57 = vadd.f32 %v9971_v26, %v8249_v5  ;;  %v8348_v2 = vpop.f32.mrb[22].mxu1  ;;  %v9974_v32 = vld [vmem:[#allocation106_spill] sm:$0xff]  ;;  %v8373_v54 = vpop.permute.xlu1 %2934  ;;  %v9984_v33 = vld [vmem:[#allocation135_spill] sm:$0xff] }
 0x319   :  { %v1894_v61 = vsel %vm1072_vm1, %v1710_v62, %v1893_v59  ;;  %v1635_v11 = vadd.f32 %v9972_v0, %v8251_v52  ;;  %v1636_v38 = vadd.f32 %v9973_v6, %v8257_v20  ;;  %v1637_v8 = vadd.f32 %v9974_v32, %v8249_v5  ;;  %v6468_v28 = vpop.f32.mrb[23].mxu1  ;;  %v9977_v62 = vld [vmem:[#allocation119_spill] sm:$0xff]  ;;  %v9978_v59 = vld [vmem:[#allocation114_spill] sm:$0xff]  ;;  %9982 = vst [vmem:[#allocation187_spill] sm:$0xff] %v8373_v54 }
 0x31a   :  { %v8357_v35 = vadd.f32 %v1894_v61, %v1866_v56  ;;  %v1638_v58 = vadd.f32 %v9975_v19, %v8251_v52  ;;  %v1639_v49 = vadd.f32 %v9976_v48, %v8257_v20  ;;  %v1640_v39 = vadd.f32 %v9977_v62, %v8249_v5  ;;  %v9979_v6 = vld [vmem:[#allocation107_spill] sm:$0xff]  ;;  %v9981_v56 = vld [vmem:[#allocation121_spill] sm:$0xff]  ;;  %v9983_v19 = vld [vmem:[#allocation128_spill] sm:$0xff] }
 0x31b   :  { %v1641_v0 = vadd.f32 %v9978_v59, %v8251_v52  ;;  %v1642_v26 = vadd.f32 %v9979_v6, %v8257_v20  ;;  %v9980_v32 = vld [vmem:[#allocation131_spill] sm:$0xff]  ;;  %v1645_v61 = vadd.f32 %v9981_v56, %v8257_v20  ;;  %v1644_v48 = vadd.f32 %v9983_v19, %v8251_v52 }
 0x31c   :  { %v1643_v28 = vadd.f32 %v9980_v32, %v8249_v5  ;;  %v1646_v62 = vadd.f32 %v9984_v33, %v8249_v5  ;;  %v1711_v1 = vmax.f32 %v1623_v17, %v1624_v37  ;;  %v1719_v7 = vmax.f32 %v1626_v15, %v1627_v60  ;;  %v8381_v15 = vpop.permute.xlu0 %2939 }
 0x31d   :  { %v1727_v59 = vmax.f32 %v1629_v21, %v1630_v47  ;;  %v1735_v24 = vmax.f32 %v1632_v29, %v1633_v45  ;;  %v1743_v53 = vmax.f32 %v1635_v11, %v1636_v38  ;;  %v1751_v6 = vmax.f32 %v1638_v58, %v1639_v49  ;;  %9985 = vst [vmem:[#allocation188_spill] sm:$0xff] %v8381_v15  ;;  %v8383_v47 = vpop.permute.xlu1 %2944 }
 0x31e   :  { %v1712_v50 = vmax.f32 %v1711_v1, %v1625_v44  ;;  %v1720_v43 = vmax.f32 %v1719_v7, %v1628_v22  ;;  %v1759_v32 = vmax.f32 %v1641_v0, %v1642_v26  ;;  %v1767_v51 = vmax.f32 %v1644_v48, %v1645_v61  ;;  %v8379_v13 = vpop.f32.mrb[24].mxu1  ;;  %9986 = vst [vmem:[#allocation189_spill] sm:$0xff] %v8383_v47 }
 0x31f   :  { %v1728_v20 = vmax.f32 %v1727_v59, %v1631_v42  ;;  %v1736_v56 = vmax.f32 %v1735_v24, %v1634_v57  ;;  %v1744_v23 = vmax.f32 %v1743_v53, %v1637_v8  ;;  %v1752_v46 = vmax.f32 %v1751_v6, %v1640_v39  ;;  %v2088_v52 = vpop.f32.mrb[25].mxu1 }
 0x320   :  { %v1713_v19 = vrot.slane %v1712_v50, 4  ;;  %v1721_v14 = vrot.slane %v1720_v43, 4  ;;  %v1760_v5 = vmax.f32 %v1759_v32, %v1643_v28  ;;  %v1768_v17 = vmax.f32 %v1767_v51, %v1646_v62  ;;  %v6494_v37 = vpop.f32.mrb[26].mxu1 }
 0x321   :  { %v1729_v60 = vrot.slane %v1728_v20, 4  ;;  %v1737_v21 = vrot.slane %v1736_v56, 4  ;;  %v1745_v44 = vrot.slane %v1744_v23, 4  ;;  %v1753_v22 = vrot.slane %v1752_v46, 4  ;;  %v2091_v7 = vpop.f32.mrb[27].mxu1  ;;  %v9989_v37 = vld [vmem:[#allocation175_spill] sm:$0xff] }
 0x322   :  { %v1714_v1 = vmax.f32 %v1712_v50, %v1713_v19  ;;  %v1722_v42 = vmax.f32 %v1720_v43, %v1721_v14  ;;  %v1761_v24 = vrot.slane %v1760_v5, 4  ;;  %v1769_v53 = vrot.slane %v1768_v17, 4  ;;  %v8385_v50 = vpop.permute.xlu0 %2983 }
 0x323   :  { %v1730_v29 = vmax.f32 %v1728_v20, %v1729_v60  ;;  %v1738_v45 = vmax.f32 %v1736_v56, %v1737_v21  ;;  %v1746_v26 = vmax.f32 %v1744_v23, %v1745_v44  ;;  %v1754_v57 = vmax.f32 %v1752_v46, %v1753_v22  ;;  %9987 = vst [vmem:[#allocation190_spill] sm:$0xff] %v8385_v50  ;;  %v8387_v23 = vpop.permute.xlu1 %2988 }
 0x324   :  { %v1715_v0 = vrot.slane %v1714_v1, 2  ;;  %v1723_v51 = vrot.slane %v1722_v42, 2  ;;  %v1762_v11 = vmax.f32 %v1760_v5, %v1761_v24  ;;  %v1770_v6 = vmax.f32 %v1768_v17, %v1769_v53  ;;  %9988 = vst [vmem:[#allocation191_spill] sm:$0xff] %v8387_v23  ;;  %v9991_v53 = vld [vmem:[#allocation38_spill] sm:$0xff] }
 0x325   :  { %v1731_v38 = vrot.slane %v1730_v29, 2  ;;  %v1739_v32 = vrot.slane %v1738_v45, 2  ;;  %v1747_v8 = vrot.slane %v1746_v26, 2  ;;  %v1755_v58 = vrot.slane %v1754_v57, 2 }
 0x326   :  { %v1716_v48 = vmax.f32 %v1714_v1, %v1715_v0  ;;  %v1724_v49 = vmax.f32 %v1722_v42, %v1723_v51  ;;  %v1763_v62 = vrot.slane %v1762_v11, 2  ;;  %v1771_v39 = vrot.slane %v1770_v6, 2  ;;  %v9990_v42 = vld [vmem:[#allocation36_spill] sm:$0xff] }
 0x327   :  { %v1732_v14 = vmax.f32 %v1730_v29, %v1731_v38  ;;  %v1740_v43 = vmax.f32 %v1738_v45, %v1739_v32  ;;  %v1748_v19 = vmax.f32 %v1746_v26, %v1747_v8  ;;  %v1756_v59 = vmax.f32 %v1754_v57, %v1755_v58 }
 0x328   :  { %v1717_v46 = vrot.slane %v1716_v48, 1  ;;  %v1725_v28 = vrot.slane %v1724_v49, 1  ;;  %v1764_v56 = vmax.f32 %v1762_v11, %v1763_v62  ;;  %v1772_v61 = vmax.f32 %v1770_v6, %v1771_v39  ;;  %v8400_v6 = vpop.permute.xlu0 %2998 }
 0x329   :  { %v1733_v20 = vrot.slane %v1732_v14, 1  ;;  %v1741_v5 = vrot.slane %v1740_v43, 1  ;;  %v1749_v17 = vrot.slane %v1748_v19, 1  ;;  %v2044_v60 = vrot.slane %v9989_v37, %v8089_v55  ;;  %9992 = vst [vmem:[#allocation175_spill] sm:$0xff] %v8400_v6 }
 0x32a   :  { %v1718_v21 = vmax.f32 %v1716_v48, %v1717_v46  ;;  %v1726_v44 = vmax.f32 %v1724_v49, %v1725_v28  ;;  %v1757_v22 = vrot.slane %v1756_v59, 1  ;;  %v1765_v1 = vrot.slane %v1764_v56, 1  ;;  %v8404_v48 = vpop.permute.xlu1 %3003 }
 0x32b   :  { %v2129_v24 = vmul.f32 %v8224_v9, %v9990_v42  ;;  %v2130_v29 = vmul.f32 %v8224_v9, %v9991_v53  ;;  %v8397_v45 = vmul.f32 %v8312_v63, %v8373_v54  ;;  %v1734_v26 = vmax.f32 %v1732_v14, %v1733_v20  ;;  %9993 = vst [vmem:[#allocation192_spill] sm:$0xff] %v8404_v48  ;;  %v10012_v54 = vld [vmem:[#allocation101_spill] sm:$0xff] }
 0x32c   :  { %v1742_v57 = vmax.f32 %v1740_v43, %v1741_v5  ;;  %v1750_v0 = vmax.f32 %v1748_v19, %v1749_v17  ;;  %v1773_v51 = vrot.slane %v1772_v61, 1  ;;  %v1895_v11 = vsel %vm1060_vm10, %v1726_v44, %v1718_v21  ;;  %v8442_v44 = vpop.permute.xlu0 %3013 }
 0x32d   :  { %v1896_v38 = vsel %vm1062_vm11, %v1734_v26, %v1895_v11  ;;  %v2097_v32 = vadd.f32 %v8379_v13, %v2044_v60  ;;  %v2089_v8 = vadd.f32 %v2088_v52, %v2044_v60  ;;  %v2092_v58 = vadd.f32 %v2091_v7, %v2044_v60  ;;  %v9998_v60 = vld [vmem:[#allocation50_spill] sm:$0xff]  ;;  %9999 = vst [vmem:[#allocation193_spill] sm:$0xff] %v8442_v44  ;;  %v10002_v26 = vld [vmem:[#allocation60_spill] sm:$0xff] }
 0x32e   :  { %v1758_v9 = vmax.f32 %v1756_v59, %v1757_v22  ;;  %v1766_v49 = vmax.f32 %v1764_v56, %v1765_v1  ;;  %v1869_v62 = vadd.f32 %v8316_v25, %v8348_v2  ;;  %v1897_v39 = vsel %vm1064_vm12, %v1742_v57, %v1896_v38  ;;  %v9994_v59 = vld [vmem:[#allocation49_spill] sm:$0xff]  ;;  %v10000_v1 = vld [vmem:[#allocation72_spill] sm:$0xff]  ;;  %v10005_v38 = vld [vmem:[#allocation75_spill] sm:$0xff] }
 0x32f   :  { %v1898_v14 = vsel %vm1066_vm13, %v1750_v0, %v1897_v39  ;;  %v8410_v43 = vadd.f32 %v2130_v29, %v2097_v32  ;;  %v8413_v19 = vadd.f32 %v8238_v40, %v2089_v8  ;;  %v8415_v46 = vadd.f32 %v2129_v24, %v2092_v58  ;;  %v9995_v40 = vld [vmem:[#allocation48_spill] sm:$0xff]  ;;  %v8452_v0 = vpop.permute.xlu1 %3018  ;;  %v10006_v8 = vld [vmem:[#allocation74_spill] sm:$0xff] }
 0x330   :  { %v8419_v13 = vmul.f32 %v8312_v63, %v8383_v47  ;;  %v8423_v52 = vmul.f32 %v8312_v63, %v8381_v15  ;;  %v1774_v25 = vmax.f32 %v1772_v61, %v1773_v51  ;;  %v1899_v2 = vsel %vm1068_vm14, %v1758_v9, %v1898_v14  ;;  %v9996_v63 = vld [vmem:[#allocation73_spill] sm:$0xff]  ;;  %v9997_v61 = vld [vmem:[#allocation51_spill] sm:$0xff]  ;;  %10003 = vst [vmem:[#allocation194_spill] sm:$0xff] %v8452_v0 }
 0x331   :  { %v1900_v7 = vsel %vm1070_vm15, %v1766_v49, %v1899_v2  ;;  %v2422_v28 = vadd.f32 %v9994_v59, %v8413_v19  ;;  %v2423_v56 = vadd.f32 %v9995_v40, %v8415_v46  ;;  %v8433_v20 = vrot.slane %v8227_v31, %v8089_v55  ;;  %v10001_v31 = vld [vmem:[#allocation61_spill] sm:$0xff]  ;;  %v10004_v51 = vld [vmem:[#allocation87_spill] sm:$0xff]  ;;  %v10010_v2 = vld [vmem:[#allocation116_spill] sm:$0xff] }
 0x332   :  { %v1901_v5 = vsel %vm1072_vm1, %v1774_v25, %v1900_v7  ;;  %v2424_v17 = vadd.f32 %v9996_v63, %v8410_v43  ;;  %v2425_v37 = vadd.f32 %v9997_v61, %v8413_v19  ;;  %v2426_v21 = vadd.f32 %v9998_v60, %v8415_v46  ;;  %v10007_v9 = vld [vmem:[#allocation99_spill] sm:$0xff]  ;;  %v10009_v14 = vld [vmem:[#allocation89_spill] sm:$0xff]  ;;  %v10014_v60 = vld [vmem:[#allocation110_spill] sm:$0xff] }
 0x333   :  { %v8444_v22 = vadd.f32 %v1901_v5, %v1869_v62  ;;  %v2427_v24 = vadd.f32 %v10000_v1, %v8410_v43  ;;  %v2428_v29 = vadd.f32 %v10001_v31, %v8413_v19  ;;  %v2429_v57 = vadd.f32 %v10002_v26, %v8415_v46  ;;  %v10008_v62 = vld [vmem:[#allocation86_spill] sm:$0xff] }
 0x334   :  { %v2430_v11 = vadd.f32 %v10004_v51, %v8410_v43  ;;  %v2431_v32 = vadd.f32 %v10005_v38, %v8413_v19  ;;  %v2432_v58 = vadd.f32 %v10006_v8, %v8415_v46  ;;  %v2433_v49 = vadd.f32 %v10007_v9, %v8410_v43  ;;  %v10011_v5 = vld [vmem:[#allocation98_spill] sm:$0xff] }
 0x335   :  { %v2434_v39 = vadd.f32 %v10008_v62, %v8413_v19  ;;  %v2435_v25 = vadd.f32 %v10009_v14, %v8415_v46  ;;  %v2436_v7 = vadd.f32 %v10010_v2, %v8410_v43  ;;  %v2437_v15 = vadd.f32 %v10011_v5, %v8413_v19  ;;  %v10013_v8 = vld [vmem:[#allocation130_spill] sm:$0xff]  ;;  %v10016_v14 = vld [vmem:[#allocation139_spill] sm:$0xff]  ;;  %v10017_v2 = vld [vmem:[#allocation124_spill] sm:$0xff] }
 0x336   :  { %v2438_v47 = vadd.f32 %v10012_v54, %v8415_v46  ;;  %v2439_v26 = vadd.f32 %v10013_v8, %v8410_v43  ;;  %v2440_v40 = vadd.f32 %v10014_v60, %v8413_v19  ;;  %v10015_v62 = vld [vmem:[#allocation118_spill] sm:$0xff]  ;;  %v2442_v31 = vadd.f32 %v10016_v14, %v8410_v43  ;;  %v10018_v5 = vld [vmem:[#allocation132_spill] sm:$0xff]  ;;  %v8486_v60 = vpop.permute.xlu0 %2993  ;;  %v8488_v14 = vpop.permute.xlu1 %3008 }
 0x337   :  { %v2441_v38 = vadd.f32 %v10015_v62, %v8415_v46  ;;  %v2443_v61 = vadd.f32 %v10017_v2, %v8413_v19  ;;  %v2444_v59 = vadd.f32 %v10018_v5, %v8415_v46  ;;  %v10019_v54 = vld [vmem:[#allocation144_spill] sm:$0xff]  ;;  %v2470_v51 = vmax.f32 %v2422_v28, %v2423_v56  ;;  %10020 = vst [vmem:[#allocation195_spill] sm:$0xff] %v8486_v60 }
 0x338   :  { %v2445_v9 = vadd.f32 %v10019_v54, %v8410_v43  ;;  %v2478_v8 = vmax.f32 %v2425_v37, %v2426_v21  ;;  %v2486_v1 = vmax.f32 %v2428_v29, %v2429_v57  ;;  %v2494_v63 = vmax.f32 %v2431_v32, %v2432_v58  ;;  %10021 = vst [vmem:[#allocation196_spill] sm:$0xff] %v8488_v14 }
 0x339   :  { %v2502_v42 = vmax.f32 %v2434_v39, %v2435_v25  ;;  %v2510_v62 = vmax.f32 %v2437_v15, %v2438_v47  ;;  %v2518_v53 = vmax.f32 %v2440_v40, %v2441_v38  ;;  %v2526_v33 = vmax.f32 %v2443_v61, %v2444_v59 }
 0x33a   :  { %v2471_v16 = vmax.f32 %v2470_v51, %v2424_v17  ;;  %v2479_v2 = vmax.f32 %v2478_v8, %v2427_v24  ;;  %v2487_v10 = vmax.f32 %v2486_v1, %v2430_v11  ;;  %v2495_v34 = vmax.f32 %v2494_v63, %v2433_v49  ;;  %v8490_v24 = vpop.permute.xlu0 %3028 }
 0x33b   :  { %v2503_v5 = vmax.f32 %v2502_v42, %v2436_v7  ;;  %v2511_v12 = vmax.f32 %v2510_v62, %v2439_v26  ;;  %v2519_v36 = vmax.f32 %v2518_v53, %v2442_v31  ;;  %v2527_v54 = vmax.f32 %v2526_v33, %v2445_v9  ;;  %10022 = vst [vmem:[#allocation197_spill] sm:$0xff] %v8490_v24  ;;  %v8492_v31 = vpop.permute.xlu1 %3033 }
 0x33c   :  { %v2472_v28 = vrot.slane %v2471_v16, 4  ;;  %v2480_v56 = vrot.slane %v2479_v2, 4  ;;  %v2488_v37 = vrot.slane %v2487_v10, 4  ;;  %v2496_v21 = vrot.slane %v2495_v34, 4  ;;  %10023 = vst [vmem:[#allocation198_spill] sm:$0xff] %v8492_v31 }
 0x33d   :  { %v2504_v29 = vrot.slane %v2503_v5, 4  ;;  %v2512_v57 = vrot.slane %v2511_v12, 4  ;;  %v2520_v32 = vrot.slane %v2519_v36, 4  ;;  %v2528_v15 = vrot.slane %v2527_v54, 4 }
 0x33e   :  { %v2473_v47 = vmax.f32 %v2471_v16, %v2472_v28  ;;  %v2481_v59 = vmax.f32 %v2479_v2, %v2480_v56  ;;  %v2489_v40 = vmax.f32 %v2487_v10, %v2488_v37  ;;  %v2497_v61 = vmax.f32 %v2495_v34, %v2496_v21  ;;  %v2688_v17 = vpop.f32.mrb[28].mxu1  ;;  %v8496_v37 = vpop.permute.xlu0 %3023 }
 0x33f   :  { %v2505_v63 = vmax.f32 %v2503_v5, %v2504_v29  ;;  %v2513_v42 = vmax.f32 %v2511_v12, %v2512_v57  ;;  %v2521_v1 = vmax.f32 %v2519_v36, %v2520_v32  ;;  %v2529_v53 = vmax.f32 %v2527_v54, %v2528_v15  ;;  %v6513_v33 = vpop.f32.mrb[29].mxu1  ;;  %10024 = vst [vmem:[#allocation199_spill] sm:$0xff] %v8496_v37  ;;  %v8499_v15 = vld [vmem:[%s9932_s27 + $0x2] ss:$0 sm:$0xff] }
 0x340   :  { %v2474_v26 = vrot.slane %v2473_v47, 2  ;;  %v2482_v51 = vrot.slane %v2481_v59, 2  ;;  %v2490_v11 = vrot.slane %v2489_v40, 2  ;;  %v2498_v38 = vrot.slane %v2497_v61, 2  ;;  %v8494_v8 = vpop.f32.mrb[30].mxu1 }
 0x341   :  { %v2506_v16 = vrot.slane %v2505_v63, 2  ;;  %v2514_v58 = vrot.slane %v2513_v42, 2  ;;  %v2522_v10 = vrot.slane %v2521_v1, 2  ;;  %v2530_v34 = vrot.slane %v2529_v53, 2  ;;  %v6514_v9 = vpop.f32.mrb[31].mxu1 }
 0x342   :  { %v2475_v49 = vmax.f32 %v2473_v47, %v2474_v26  ;;  %v2483_v62 = vmax.f32 %v2481_v59, %v2482_v51  ;;  %v2491_v12 = vmax.f32 %v2489_v40, %v2490_v11  ;;  %v2499_v36 = vmax.f32 %v2497_v61, %v2498_v38  ;;  %v8501_v47 = vpop.permute.xlu1 %3043  ;;  %v10027_v9 = vld [vmem:[#allocation52_spill] sm:$0xff] }
 0x343   :  { %v2507_v54 = vmax.f32 %v2505_v63, %v2506_v16  ;;  %v2515_v39 = vmax.f32 %v2513_v42, %v2514_v58  ;;  %v2523_v25 = vmax.f32 %v2521_v1, %v2522_v10  ;;  %v2531_v2 = vmax.f32 %v2529_v53, %v2530_v34  ;;  %10025 = vst [vmem:[#allocation200_spill] sm:$0xff] %v8501_v47  ;;  %v10026_v58 = vld [vmem:[#allocation53_spill] sm:$0xff] }
 0x344   :  { %v2476_v7 = vrot.slane %v2475_v49, 1  ;;  %v2484_v5 = vrot.slane %v2483_v62, 1  ;;  %v2492_v28 = vrot.slane %v2491_v12, 1  ;;  %v2500_v56 = vrot.slane %v2499_v36, 1 }
 0x345   :  { %v2508_v21 = vrot.slane %v2507_v54, 1  ;;  %v2516_v29 = vrot.slane %v2515_v39, 1  ;;  %v2524_v57 = vrot.slane %v2523_v25, 1  ;;  %v2532_v32 = vrot.slane %v2531_v2, 1 }
 0x346   :  { %v1906_v59 = vmax.f32 %v8357_v35, 0.0  ;;  %v2477_v40 = vmax.f32 %v2475_v49, %v2476_v7  ;;  %v2485_v61 = vmax.f32 %v2483_v62, %v2484_v5  ;;  %v2493_v63 = vmax.f32 %v2491_v12, %v2492_v28  ;;  %v8504_v42 = vpop.f32.mrb[32].mxu1  ;;  %v10028_v62 = vld [vmem:[#allocation77_spill] sm:$0xff]  ;;  %v10031_v7 = vld [vmem:[#allocation76_spill] sm:$0xff]  ;;  %v10032_v28 = vld [vmem:[#allocation63_spill] sm:$0xff] }
 0x347   :  { %v2501_v1 = vmax.f32 %v2499_v36, %v2500_v56  ;;  %v2509_v53 = vmax.f32 %v2507_v54, %v2508_v21  ;;  %v2517_v33 = vmax.f32 %v2515_v39, %v2516_v29  ;;  %v2525_v26 = vmax.f32 %v2523_v25, %v2524_v57  ;;  %v8506_v51 = vpop.f32.mrb[33].mxu1  ;;  %v10029_v36 = vld [vmem:[#allocation55_spill] sm:$0xff]  ;;  %v10030_v25 = vld [vmem:[#allocation54_spill] sm:$0xff]  ;;  %v8528_v21 = vpop.permute.xlu0 %3048 }
 0x348   :  { %v2533_v11 = vmax.f32 %v2531_v2, %v2532_v32  ;;  %v2689_v38 = vadd.f32 %v8499_v15, %v2688_v17  ;;  %v2711_v16 = vsel %vm1060_vm10, %v2485_v61, %v2477_v40  ;;  %v2446_v10 = vadd.f32 %v10026_v58, %v8413_v19  ;;  %v6540_v35 = vpop.f32.mrb[34].mxu1  ;;  %10033 = vst [vmem:[#allocation201_spill] sm:$0xff] %v8528_v21  ;;  %v10034_v57 = vld [vmem:[#allocation62_spill] sm:$0xff]  ;;  %v10035_v40 = vld [vmem:[#allocation88_spill] sm:$0xff] }
 0x349   :  { %v2712_v34 = vsel %vm1062_vm11, %v2493_v63, %v2711_v16  ;;  %v2447_v49 = vadd.f32 %v10027_v9, %v8415_v46  ;;  %v2448_v12 = vadd.f32 %v10028_v62, %v8410_v43  ;;  %v2449_v54 = vadd.f32 %v10029_v36, %v8413_v19  ;;  %v8519_v39 = vpop.f32.mrb[35].mxu1  ;;  %v10036_v63 = vld [vmem:[#allocation79_spill] sm:$0xff]  ;;  %v8537_v16 = vpop.permute.xlu1 %3038  ;;  %v10043_v9 = vld [vmem:[#allocation102_spill] sm:$0xff] }
 0x34a   :  { %v2713_v17 = vsel %vm1064_vm12, %v2501_v1, %v2712_v34  ;;  %v2450_v2 = vadd.f32 %v10030_v25, %v8415_v46  ;;  %v2451_v5 = vadd.f32 %v10031_v7, %v8410_v43  ;;  %v2452_v56 = vadd.f32 %v10032_v28, %v8413_v19  ;;  %10037 = vst [vmem:[#allocation202_spill] sm:$0xff] %v8537_v16  ;;  %v10038_v34 = vld [vmem:[#allocation78_spill] sm:$0xff]  ;;  %v10039_v7 = vld [vmem:[#allocation100_spill] sm:$0xff] }
 0x34b   :  { %v2714_v29 = vsel %vm1066_vm13, %v2509_v53, %v2713_v17  ;;  %v2453_v32 = vadd.f32 %v10034_v57, %v8415_v46  ;;  %v2454_v61 = vadd.f32 %v10035_v40, %v8410_v43  ;;  %v2455_v1 = vadd.f32 %v10036_v63, %v8413_v19  ;;  %v10040_v53 = vld [vmem:[#allocation91_spill] sm:$0xff]  ;;  %v10041_v40 = vld [vmem:[#allocation90_spill] sm:$0xff]  ;;  %v10042_v63 = vld [vmem:[#allocation113_spill] sm:$0xff] }
 0x34c   :  { %v2715_v35 = vsel %vm1068_vm14, %v2517_v33, %v2714_v29  ;;  %v2456_v28 = vadd.f32 %v10038_v34, %v8415_v46  ;;  %v2457_v25 = vadd.f32 %v10039_v7, %v8410_v43  ;;  %v2458_v17 = vadd.f32 %v10040_v53, %v8413_v19  ;;  %v10044_v34 = vld [vmem:[#allocation103_spill] sm:$0xff] }
 0x34d   :  { %v2716_v57 = vsel %vm1070_vm15, %v2525_v26, %v2715_v35  ;;  %v2459_v36 = vadd.f32 %v10041_v40, %v8415_v46  ;;  %v2460_v62 = vadd.f32 %v10042_v63, %v8410_v43  ;;  %v2462_v33 = vadd.f32 %v10043_v9, %v8415_v46  ;;  %v10045_v7 = vld [vmem:[#allocation127_spill] sm:$0xff]  ;;  %v10047_v40 = vld [vmem:[#allocation120_spill] sm:$0xff]  ;;  %v10048_v63 = vld [vmem:[#allocation133_spill] sm:$0xff]  ;;  %v8570_v21 = vpop.permute.xlu1 %3063 }
 0x34e   :  { %v2717_v29 = vsel %vm1072_vm1, %v2533_v11, %v2716_v57  ;;  %v2461_v58 = vadd.f32 %v10044_v34, %v8413_v19  ;;  %v2463_v30 = vadd.f32 %v10045_v7, %v8410_v43  ;;  %v10046_v53 = vld [vmem:[#allocation115_spill] sm:$0xff]  ;;  %v2464_v3 = vadd.f32 %v10047_v40, %v8413_v19  ;;  %v10049_v9 = vld [vmem:[#allocation134_spill] sm:$0xff]  ;;  %v10050_v11 = vld [vmem:[#allocation129_spill] sm:$0xff]  ;;  %v8568_v7 = vpop.permute.xlu0 %3058  ;;  %10052 = vst [vmem:[#allocation204_spill] sm:$0xff] %v8570_v21 }
 0x34f   :  { %v2465_v26 = vadd.f32 %v10046_v53, %v8415_v46  ;;  %v2727_v35 = vadd.f32 %v2717_v29, %v2689_v38  ;;  %v2466_v55 = vadd.f32 %v10048_v63, %v8410_v43  ;;  %v2467_v41 = vadd.f32 %v10049_v9, %v8413_v19  ;;  %10051 = vst [vmem:[#allocation203_spill] sm:$0xff] %v8568_v7 }
 0x350   :  { %v2468_v57 = vadd.f32 %v10050_v11, %v8415_v46  ;;  %v2534_v34 = vmax.f32 %v2446_v10, %v2447_v49  ;;  %v2542_v4 = vmax.f32 %v2449_v54, %v2450_v2  ;;  %v2550_v27 = vmax.f32 %v2452_v56, %v2453_v32  ;;  %v10053_v56 = vld [vmem:[#allocation137_spill] sm:$0xff] }
 0x351   :  { %v2729_v18 = vmax.f32 %v2727_v35, 0.0  ;;  %v2558_v53 = vmax.f32 %v2455_v1, %v2456_v28  ;;  %v2566_v38 = vmax.f32 %v2458_v17, %v2459_v36  ;;  %v2574_v29 = vmax.f32 %v2461_v58, %v2462_v33 }
 0x352   :  { %v2535_v40 = vmax.f32 %v2534_v34, %v2448_v12  ;;  %v2543_v47 = vmax.f32 %v2542_v4, %v2451_v5  ;;  %v2551_v63 = vmax.f32 %v2550_v27, %v2454_v61  ;;  %v2582_v16 = vmax.f32 %v2464_v3, %v2465_v26  ;;  %v8576_v3 = vpop.permute.xlu0 %3053 }
 0x353   :  { %v8572_v31 = vadd.f32 %v2729_v18, %v1906_v59  ;;  %v2559_v19 = vmax.f32 %v2558_v53, %v2457_v25  ;;  %v2567_v9 = vmax.f32 %v2566_v38, %v2460_v62  ;;  %v2575_v46 = vmax.f32 %v2574_v29, %v2463_v30  ;;  %10054 = vst [vmem:[#allocation205_spill] sm:$0xff] %v8576_v3  ;;  %v8578_v25 = vpop.permute.xlu1 %3073 }
 0x354   :  { %v2536_v10 = vrot.slane %v2535_v40, 4  ;;  %v2544_v49 = vrot.slane %v2543_v47, 4  ;;  %v2552_v54 = vrot.slane %v2551_v63, 4  ;;  %v2583_v2 = vmax.f32 %v2582_v16, %v2466_v55  ;;  %10055 = vst [vmem:[#allocation206_spill] sm:$0xff] %v8578_v25 }
 0x355   :  { %v2469_v28 = vadd.f32 %v10053_v56, %v8410_v43  ;;  %v2560_v36 = vrot.slane %v2559_v19, 4  ;;  %v2568_v58 = vrot.slane %v2567_v9, 4  ;;  %v2576_v32 = vrot.slane %v2575_v46, 4 }
 0x356   :  { %v2537_v1 = vmax.f32 %v2535_v40, %v2536_v10  ;;  %v2545_v12 = vmax.f32 %v2543_v47, %v2544_v49  ;;  %v2553_v4 = vmax.f32 %v2551_v63, %v2552_v54  ;;  %v2584_v27 = vrot.slane %v2583_v2, 4 }
 0x357   :  { %v2561_v18 = vmax.f32 %v2559_v19, %v2560_v36  ;;  %v2569_v59 = vmax.f32 %v2567_v9, %v2568_v58  ;;  %v2577_v62 = vmax.f32 %v2575_v46, %v2576_v32  ;;  %v2590_v30 = vmax.f32 %v2467_v41, %v2468_v57  ;;  %v8580_v46 = vpop.permute.xlu0 %3078  ;;  %v8582_v36 = vpop.permute.xlu1 %3068 }
 0x358   :  { %v2538_v5 = vrot.slane %v2537_v1, 2  ;;  %v2546_v55 = vrot.slane %v2545_v12, 2  ;;  %v2554_v61 = vrot.slane %v2553_v4, 2  ;;  %v2585_v16 = vmax.f32 %v2583_v2, %v2584_v27  ;;  %10056 = vst [vmem:[#allocation207_spill] sm:$0xff] %v8580_v46  ;;  %10057 = vst [vmem:[#allocation208_spill] sm:$0xff] %v8582_v36 }
 0x359   :  { %v2562_v43 = vrot.slane %v2561_v18, 2  ;;  %v2570_v34 = vrot.slane %v2569_v59, 2  ;;  %v2578_v53 = vrot.slane %v2577_v62, 2  ;;  %v2591_v17 = vmax.f32 %v2590_v30, %v2469_v28 }
 0x35a   :  { %v2539_v40 = vmax.f32 %v2537_v1, %v2538_v5  ;;  %v2547_v47 = vmax.f32 %v2545_v12, %v2546_v55  ;;  %v2555_v63 = vmax.f32 %v2553_v4, %v2554_v61  ;;  %v2586_v33 = vrot.slane %v2585_v16, 2 }
 0x35b   :  { %v2563_v26 = vmax.f32 %v2561_v18, %v2562_v43  ;;  %v2571_v35 = vmax.f32 %v2569_v59, %v2570_v34  ;;  %v2579_v38 = vmax.f32 %v2577_v62, %v2578_v53  ;;  %v2592_v9 = vrot.slane %v2591_v17, 4 }
 0x35c   :  { %v2540_v29 = vrot.slane %v2539_v40, 1  ;;  %v2548_v41 = vrot.slane %v2547_v47, 1  ;;  %v2556_v57 = vrot.slane %v2555_v63, 1  ;;  %v2587_v19 = vmax.f32 %v2585_v16, %v2586_v33  ;;  %v8603_v33 = vpop.permute.xlu1 %3093 }
 0x35d   :  { %v2564_v10 = vrot.slane %v2563_v26, 1  ;;  %v2572_v49 = vrot.slane %v2571_v35, 1  ;;  %v2580_v54 = vrot.slane %v2579_v38, 1  ;;  %v2593_v2 = vmax.f32 %v2591_v17, %v2592_v9  ;;  %10059 = vst [vmem:[#allocation210_spill] sm:$0xff] %v8603_v33 }
 0x35e   :  { %v2541_v28 = vmax.f32 %v2539_v40, %v2540_v29  ;;  %v2549_v58 = vmax.f32 %v2547_v47, %v2548_v41  ;;  %v2557_v32 = vmax.f32 %v2555_v63, %v2556_v57  ;;  %v2588_v1 = vrot.slane %v2587_v19, 1  ;;  %v8598_v40 = vpop.permute.xlu0 %3088 }
 0x35f   :  { %v1907_v12 = vmax.f32 %v8444_v22, 0.0  ;;  %v2565_v27 = vmax.f32 %v2563_v26, %v2564_v10  ;;  %v2594_v18 = vrot.slane %v2593_v2, 2  ;;  %v2573_v59 = vmax.f32 %v2571_v35, %v2572_v49  ;;  %10058 = vst [vmem:[#allocation209_spill] sm:$0xff] %v8598_v40  ;;  %v10061_v49 = vld [vmem:[#allocation202_spill] sm:$0xff] }
 0x360   :  { %v2581_v62 = vmax.f32 %v2579_v38, %v2580_v54  ;;  %v2718_v30 = vsel %vm1060_vm10, %v2549_v58, %v2541_v28  ;;  %v2920_v5 = vadd.f32 %v8504_v42, %v8433_v20  ;;  %v2912_v16 = vadd.f32 %v8506_v51, %v8433_v20  ;;  %v10062_v28 = vld [vmem:[#allocation200_spill] sm:$0xff] }
 0x361   :  { %v2595_v55 = vmax.f32 %v2593_v2, %v2594_v18  ;;  %v2719_v61 = vsel %vm1062_vm11, %v2557_v32, %v2718_v30  ;;  %v2915_v22 = vadd.f32 %v8519_v39, %v8433_v20  ;;  %v2589_v43 = vmax.f32 %v2587_v19, %v2588_v1  ;;  %v10060_v19 = vld [vmem:[#allocation198_spill] sm:$0xff]  ;;  %v10063_v32 = vld [vmem:[#allocation201_spill] sm:$0xff] }
 0x362   :  { %v2692_v34 = vadd.f32 %v8499_v15, %v8494_v8  ;;  %v2720_v53 = vsel %vm1064_vm12, %v2565_v27, %v2719_v61  ;;  %v2956_v17 = vadd.f32 %v8419_v13, %v2920_v5  ;;  %v2954_v63 = vadd.f32 %v8397_v45, %v2912_v16  ;;  %v8623_v18 = vpop.permute.xlu0 %3083 }
 0x363   :  { %v2596_v42 = vrot.slane %v2595_v55, 1  ;;  %v2721_v47 = vsel %vm1066_vm13, %v2573_v59, %v2720_v53  ;;  %v2955_v51 = vadd.f32 %v8423_v52, %v2915_v22  ;;  %10064 = vst [vmem:[#allocation211_spill] sm:$0xff] %v8623_v18 }
 0x364   :  { %v2722_v20 = vsel %vm1068_vm14, %v2581_v62, %v2721_v47  ;;  %v3103_v39 = vadd.f32 %v8486_v60, %v2956_v17  ;;  %v3106_v8 = vadd.f32 %v8488_v14, %v2956_v17  ;;  %v3109_v15 = vadd.f32 %v8496_v37, %v2956_v17 }
 0x365   :  { %v2597_v13 = vmax.f32 %v2595_v55, %v2596_v42  ;;  %v2723_v26 = vsel %vm1070_vm15, %v2589_v43, %v2722_v20  ;;  %v3101_v35 = vadd.f32 %v8385_v50, %v2954_v63  ;;  %v3102_v38 = vadd.f32 %v8387_v23, %v2955_v51  ;;  %v8629_v55 = vpop.permute.xlu1 %3098 }
 0x366   :  { %v3104_v45 = vadd.f32 %v8400_v6, %v2954_v63  ;;  %v3105_v52 = vadd.f32 %v8404_v48, %v2955_v51  ;;  %v3107_v9 = vadd.f32 %v8442_v44, %v2954_v63  ;;  %v3108_v29 = vadd.f32 %v8452_v0, %v2955_v51  ;;  %10065 = vst [vmem:[#allocation212_spill] sm:$0xff] %v8629_v55 }
 0x367   :  { %v2724_v41 = vsel %vm1072_vm1, %v2597_v13, %v2723_v26  ;;  %v3110_v57 = vadd.f32 %v8490_v24, %v2954_v63  ;;  %v3111_v10 = vadd.f32 %v10060_v19, %v2955_v51  ;;  %v3112_v54 = vadd.f32 %v10061_v49, %v2956_v17  ;;  %v10108_v19 = vld [vmem:[#allocation167_spill] sm:$0xff] }
 0x368   :  { %v2728_v2 = vadd.f32 %v2724_v41, %v2692_v34  ;;  %v3113_v58 = vadd.f32 %v10062_v28, %v2954_v63  ;;  %v3114_v1 = vadd.f32 %v10063_v32, %v2955_v51  ;;  %v3115_v27 = vadd.f32 %v8576_v3, %v2956_v17 }
 0x369   :  { %v3116_v59 = vadd.f32 %v8568_v7, %v2954_v63  ;;  %v3117_v62 = vadd.f32 %v8570_v21, %v2955_v51  ;;  %v3118_v30 = vadd.f32 %v8582_v36, %v2956_v17  ;;  %v3119_v5 = vadd.f32 %v8578_v25, %v2954_v63 }
 0x36a   :  { %v2730_v61 = vmax.f32 %v2728_v2, 0.0  ;;  %v3120_v16 = vadd.f32 %v8580_v46, %v2955_v51  ;;  %v3121_v22 = vadd.f32 %v8623_v18, %v2956_v17  ;;  %v3122_v43 = vadd.f32 %v8598_v40, %v2954_v63  ;;  %v6931_v63 = vld [vmem:[%s9842_s14 + $0x100] sm:$0xff]  }
 0x36b   :  { %v3123_v34 = vadd.f32 %v8603_v33, %v2955_v51  ;;  %v3124_v53 = vadd.f32 %v8629_v55, %v2956_v17  ;;  %v3125_v42 = vmax.f32 %v3101_v35, %v3102_v38  ;;  %v3133_v47 = vmax.f32 %v3104_v45, %v3105_v52 }
 0x36c   :  { %v2732_v20 = vadd.f32 %v2730_v61, %v1907_v12  ;;  %v3141_v13 = vmax.f32 %v3107_v9, %v3108_v29  ;;  %v3149_v26 = vmax.f32 %v3110_v57, %v3111_v10  ;;  %v3157_v41 = vmax.f32 %v3113_v58, %v3114_v1  ;;  %v6932_v58 = vld [vmem:[%s9842_s14 + $0x108] sm:$0xff]  }
 0x36d   :  { %v3126_v4 = vmax.f32 %v3125_v42, %v3103_v39  ;;  %v3134_v25 = vmax.f32 %v3133_v47, %v3106_v8  ;;  %v3165_v2 = vmax.f32 %v3116_v59, %v3117_v62  ;;  %v3173_v36 = vmax.f32 %v3119_v5, %v3120_v16 }
 0x36e   :  { %v3305_v46 = vmax.f32 %v2732_v20, 0.0  ;;  %v3142_v21 = vmax.f32 %v3141_v13, %v3109_v15  ;;  %v3150_v18 = vmax.f32 %v3149_v26, %v3112_v54  ;;  %v3158_v32 = vmax.f32 %v3157_v41, %v3115_v27 }
 0x36f   :  { %v3127_v40 = vrot.slane %v3126_v4, 4  ;;  %v3135_v51 = vrot.slane %v3134_v25, 4  ;;  %v3166_v33 = vmax.f32 %v3165_v2, %v3118_v30  ;;  %v3174_v17 = vmax.f32 %v3173_v36, %v3121_v22 }
 0x370   :  { %v10066_v35 = vmax.f32 %v8572_v31, 0.0  ;;  %v3143_v38 = vrot.slane %v3142_v21, 4  ;;  %v3151_v45 = vrot.slane %v3150_v18, 4  ;;  %v3159_v39 = vrot.slane %v3158_v32, 4 }
 0x371   :  { %v3128_v8 = vmax.f32 %v3126_v4, %v3127_v40  ;;  %v3136_v52 = vmax.f32 %v3134_v25, %v3135_v51  ;;  %v3167_v9 = vrot.slane %v3166_v33, 4  ;;  %v3175_v29 = vrot.slane %v3174_v17, 4 }
 0x372   :  { %v8639_v12 = vpack.c.bf16 %v3305_v46, %v10066_v35  ;;  %v3144_v15 = vmax.f32 %v3142_v21, %v3143_v38  ;;  %v3152_v57 = vmax.f32 %v3150_v18, %v3151_v45  ;;  %v3160_v10 = vmax.f32 %v3158_v32, %v3159_v39  ;;  %v6934_v35 = vld [vmem:[%s9842_s14 + $0x118] sm:$0xff]  }
 0x373   :  { %v3181_v54 = vmax.f32 %v3122_v43, %v3123_v34  ;;  %v3129_v36 = vrot.slane %v3128_v8, 2  ;;  %v3137_v1 = vrot.slane %v3136_v52, 2  ;;  %v3168_v31 = vmax.f32 %v3166_v33, %v3167_v9  ;;  %v6933_v33 = vld [vmem:[%s9842_s14 + $0x110] sm:$0xff]  }
 0x374   :  { %6578 = vmatmul.mubr.bf16.vlgmr.msra.gmra.mrb[36].mxu1 %v8639_v12  ;;  %v3176_v46 = vmax.f32 %v3174_v17, %v3175_v29  ;;  %v10067_v27 = vmov 0.0   ;;  %v3145_v25 = vrot.slane %v3144_v15, 2  ;;  %v3153_v4 = vrot.slane %v3152_v57, 2 }
 0x375   :  { %6588 = vmatpush3.bf16.msra.mxu1 %v6931_v63  ;;  %6603 = vmatprep.mubr.msk.bf16.mxu1 %vm7207_vm2, %v10067_v27  ;;  %v3161_v40 = vrot.slane %v3160_v10, 2  ;;  %v3182_v59 = vmax.f32 %v3181_v54, %v3124_v53  ;;  %v3130_v21 = vmax.f32 %v3128_v8, %v3129_v36  ;;  %v3138_v18 = vmax.f32 %v3136_v52, %v3137_v1  ;;  %v5899_v52 = vld [vmem:[%s9932_s27 + $0x3] ss:$0 sm:$0xff]  ;;  %v10068_v36 = vld [vmem:[#allocation186_spill] sm:$0xff] }
 0x376   :  { %6589 = vmatprep.subr.bf16.mxu1 %v10067_v27  ;;  %v3169_v32 = vrot.slane %v3168_v31, 2  ;;  %v3177_v62 = vrot.slane %v3176_v46, 2  ;;  %v3146_v30 = vmax.f32 %v3144_v15, %v3145_v25  ;;  %v3154_v5 = vmax.f32 %v3152_v57, %v3153_v4 }
 0x377   :  { %v3162_v61 = vmax.f32 %v3160_v10, %v3161_v40  ;;  %v3183_v16 = vrot.slane %v3182_v59, 4  ;;  %v3131_v22 = vrot.slane %v3130_v21, 1  ;;  %v3139_v43 = vrot.slane %v3138_v18, 1  ;;  %v6936_v40 = vld [vmem:[%s9842_s14 + $0x128] sm:$0xff]  }
 0x378   :  { %v3170_v34 = vmax.f32 %v3168_v31, %v3169_v32  ;;  %v3178_v42 = vmax.f32 %v3176_v46, %v3177_v62  ;;  %v3147_v47 = vrot.slane %v3146_v30, 1  ;;  %v3155_v20 = vrot.slane %v3154_v5, 1  ;;  %v10069_v32 = vld [vmem:[#allocation185_spill] sm:$0xff]  ;;  %v10070_v62 = vld [vmem:[#allocation108_spill] sm:$0xff] }
 0x379   :  { %6590 = vmatpush3.bf16.msra.mxu1 %v6932_v58  ;;  %v3163_v53 = vrot.slane %v3162_v61, 1  ;;  %v3184_v13 = vmax.f32 %v3182_v59, %v3183_v16  ;;  %v3132_v26 = vmax.f32 %v3130_v21, %v3131_v22  ;;  %v3140_v41 = vmax.f32 %v3138_v18, %v3139_v43  ;;  %v6935_v58 = vld [vmem:[%s9842_s14 + $0x120] sm:$0xff]   ;;  %v6937_v21 = vld [vmem:[%s9842_s14 + $0x130] sm:$0xff]   ;;  %v6938_v18 = vld [vmem:[%s9842_s14 + $0x138] sm:$0xff]  }
 0x37a   :  { %6591 = vmatprep.subr.bf16.mxu1 %v10067_v27  ;;  %v3171_v2 = vrot.slane %v3170_v34, 1  ;;  %v3148_v63 = vmax.f32 %v3146_v30, %v3147_v47  ;;  %v3179_v51 = vrot.slane %v3178_v42, 1  ;;  %v3156_v38 = vmax.f32 %v3154_v5, %v3155_v20  ;;  %v6939_v22 = vld [vmem:[%s7345_s3 + $0x140] sm:$0xff]   ;;  %v6942_v47 = vld [vmem:[%s7345_s3 + $0x158] sm:$0xff]  }
 0x37b   :  { %v3185_v17 = vrot.slane %v3184_v13, 2  ;;  %v3293_v45 = vsel %vm1060_vm10, %v3140_v41, %v3132_v26  ;;  %v3164_v39 = vmax.f32 %v3162_v61, %v3163_v53  ;;  %v3280_v1 = vadd.f32 %v5899_v52, %v10068_v36  ;;  %v10071_v43 = vld [vmem:[#allocation104_spill] sm:$0xff]  ;;  %v6944_v53 = vld [vmem:[%s7345_s3 + $0x168] sm:$0xff]   ;;  %v6953_v52 = vld [vmem:[%s9842_s14 + $0x170] sm:$0xff]  }
 0x37c   :  { %v3294_v9 = vsel %vm1062_vm11, %v3148_v63, %v3293_v45  ;;  %v3172_v29 = vmax.f32 %v3170_v34, %v3171_v2  ;;  %v3180_v57 = vmax.f32 %v3178_v42, %v3179_v51  ;;  %v6940_v34 = vld [vmem:[%s7345_s3 + $0x148] sm:$0xff]   ;;  %v6941_v42 = vld [vmem:[%s7345_s3 + $0x150] sm:$0xff]   ;;  %v6943_v20 = vld [vmem:[%s7345_s3 + $0x160] sm:$0xff]  }
 0x37d   :  { %6592 = vmatpush3.bf16.msra.mxu1 %v6933_v33  ;;  %v3186_v8 = vmax.f32 %v3184_v13, %v3185_v17  ;;  %v3295_v15 = vsel %vm1064_vm12, %v3156_v38, %v3294_v9  ;;  %v6945_v13 = vld [vmem:[%s7345_s3 + $0x170] sm:$0xff]   ;;  %v6946_v63 = vld [vmem:[%s7345_s3 + $0x178] sm:$0xff]   ;;  %v6947_v17 = vld [vmem:[%s9842_s14 + $0x140] sm:$0xff]  }
 0x37e   :  { %6593 = vmatprep.subr.bf16.mxu1 %v10067_v27  ;;  %v3296_v54 = vsel %vm1066_vm13, %v3164_v39, %v3295_v15  ;;  %v6949_v38 = vld [vmem:[%s9842_s14 + $0x150] sm:$0xff]   ;;  %v6950_v45 = vld [vmem:[%s9842_s14 + $0x158] sm:$0xff]   ;;  %v6951_v39 = vld [vmem:[%s9842_s14 + $0x160] sm:$0xff]  }
 0x37f   :  { %v3187_v10 = vrot.slane %v3186_v8, 1  ;;  %v3297_v31 = vsel %vm1068_vm14, %v3172_v29, %v3296_v54  ;;  %v6954_v9 = vld [vmem:[%s9842_s14 + $0x178] sm:$0xff]   ;;  %v5948_v15 = vld [vmem:[%s9911_s12 + $0x8] sm:$0x3]  ;;  %v10073_v54 = vld [vmem:[#allocation172_spill] sm:$0xff] }
 0x380   :  { %v3298_v25 = vsel %vm1070_vm15, %v3180_v57, %v3297_v31  ;;  %v10072_v29 = vld [vmem:[#allocation123_spill] sm:$0xff]  ;;  %v3490_v57 = vrot.slane %v5948_v15, 7  ;;  %v10074_v36 = vld [vmem:[#allocation173_spill] sm:$0xff] }
 0x381   :  { %6594 = vmatpush3.bf16.msra.mxu1 %v6934_v35  ;;  %v3188_v46 = vmax.f32 %v3186_v8, %v3187_v10  ;;  %v6948_v35 = vld [vmem:[%s9842_s14 + $0x148] sm:$0xff]  }
 0x382   :  { %6595 = vmatprep.subr.bf16.mxu1 %v10067_v27  ;;  %v6952_v8 = vld [vmem:[%s9842_s14 + $0x168] sm:$0xff]   ;;  %v3492_v10 = vsub.f32 %v5948_v15, %v3490_v57 }
 0x383   :  { %v3299_v4 = vsel %vm1072_vm1, %v3188_v46, %v3298_v25  ;;  %v10075_v46 = vld [vmem:[#allocation148_spill] sm:$0xff] }
 0x384   :  { %v8662_v59 = vadd.f32 %v3299_v4, %v3280_v1  ;;  %v3440_v1 = vrot.slane %v5948_v15, %v10074_v36  ;;  %v10086_v15 = vld [vmem:[#allocation160_spill] sm:$0xff] }
 0x385   :  { %6596 = vmatpush3.bf16.msra.mxu1 %v6935_v58  ;;  %v3496_v58 = vrot.slane %v3492_v10, %v10073_v54  ;;  %v10087_v10 = vld [vmem:[#allocation163_spill] sm:$0xff] }
 0x386   :  { %6597 = vmatprep.subr.bf16.mxu1 %v10067_v27 }
 0x387   :  { %v3499_v25 = vmul.f32 %v3496_v58, %v10075_v46  ;;  %v10089_v46 = vld [vmem:[#allocation152_spill] sm:$0xff] }
 0x389   :  { %6598 = vmatpush3.bf16.msra.mxu1 %v6936_v40 }
 0x38a   :  { %6599 = vmatprep.subr.bf16.mxu1 %v10067_v27 }
 0x38d   :  { %6600 = vmatpush3.bf16.msra.mxu1 %v6937_v21  ;;  %v10076_v21 = vld [vmem:[#allocation146_spill] sm:$0xff] }
 0x38e   :  { %6601 = vmatprep.subr.bf16.mxu1 %v10067_v27 }
 0x391   :  { %6602 = vmatpush3.bf16.msra.mxu1 %v6938_v18  ;;  %v3497_v18 = vmul.f32 %v3496_v58, %v10076_v21  ;;  %v10091_v21 = vld [vmem:[#allocation157_spill] sm:$0xff] }
 0x394   :  { %6604 = vmatmul.mubr.bf16.vlgmr.msra.gmra.mrb[40].mxu1 %v10069_v32 }
 0x395   :  { %6629 = vmatprep.mubr.msk.bf16.mxu1 %vm1220_vm9, %v10070_v62 }
 0x447   :  { %v3427_v30 = vpop.f32.mrb[36].mxu1 }
 0x448   :  { %v6579_v5 = vpop.f32.mrb[37].mxu1 }
 0x449   :  { %v3430_v61 = vpop.f32.mrb[38].mxu1  ;;  %v8722_v5 = vld [vmem:[%s9932_s27 + $0x4] ss:$0 sm:$0xff] }
 0x44a   :  { %v3436_v16 = vpack.c.bf16 %v3430_v61, %v3427_v30  ;;  %v6580_v33 = vpop.f32.mrb[39].mxu1 }
 0x44b   :  { %v10077_v33 = vld [vmem:[#allocation140_spill] sm:$0xff] }
 0x44c   :  { %6581 = vmatprep.subr.bf16.mxu0 %v3436_v16 }
 0x44d   :  { %6582 = vmatpush3.bf16.msra.mxu0 %v3436_v16 }
 0x44e   :  { %6607 = vmatprep.subr.bf16.mxu0 %v10067_v27 }
 0x450   :  { %6584 = vmatmul.mubr.msk.bf16.vlgmr.msra.gmra.mrb[28].mxu0 %vm517_vm7, %v10071_v43 }
 0x451   :  { %6608 = vmatpush3.bf16.msra.mxu0 %v6939_v22  ;;  %6623 = vmatprep.mubr.msk.bf16.mxu0 %vm7207_vm2, %v10067_v27  ;;  %v3498_v22 = vmul.f32 %v3496_v58, %v10077_v33 }
 0x452   :  { %6609 = vmatprep.subr.bf16.mxu0 %v10067_v27 }
 0x455   :  { %6610 = vmatpush3.bf16.msra.mxu0 %v6940_v34 }
 0x456   :  { %6611 = vmatprep.subr.bf16.mxu0 %v10067_v27 }
 0x459   :  { %6612 = vmatpush3.bf16.msra.mxu0 %v6941_v42 }
 0x45a   :  { %6613 = vmatprep.subr.bf16.mxu0 %v10067_v27 }
 0x45d   :  { %6614 = vmatpush3.bf16.msra.mxu0 %v6942_v47 }
 0x45e   :  { %6615 = vmatprep.subr.bf16.mxu0 %v10067_v27 }
 0x461   :  { %6616 = vmatpush3.bf16.msra.mxu0 %v6943_v20  ;;  %v10078_v20 = vld [vmem:[#allocation149_spill] sm:$0xff] }
 0x462   :  { %6617 = vmatprep.subr.bf16.mxu0 %v10067_v27 }
 0x465   :  { %6618 = vmatpush3.bf16.msra.mxu0 %v6944_v53 }
 0x466   :  { %6619 = vmatprep.subr.bf16.mxu0 %v10067_v27 }
 0x467   :  { %v3725_v26 = vpop.f32.mrb[40].mxu1 }
 0x468   :  { %v6605_v41 = vpop.f32.mrb[41].mxu1  ;;  %v8730_v42 = vadd.f32 %v8722_v5, %v3725_v26 }
 0x469   :  { %v8690_v2 = vpop.f32.mrb[42].mxu1  ;;  %6620 = vmatpush3.bf16.msra.mxu0 %v6945_v13  ;;  %v10079_v13 = vld [vmem:[#allocation156_spill] sm:$0xff] }
 0x46a   :  { %v6606_v51 = vpop.f32.mrb[43].mxu1  ;;  %6621 = vmatprep.subr.bf16.mxu0 %v10067_v27 }
 0x46d   :  { %6622 = vmatpush3.bf16.msra.mxu0 %v6946_v63  ;;  %v10080_v63 = vld [vmem:[#allocation143_spill] sm:$0xff] }
 0x46e   :  { %6633 = vmatprep.subr.bf16.mxu0 %v10067_v27 }
 0x470   :  { %6624 = vmatmul.mubr.bf16.vlgmr.msra.gmra.mrb[32].mxu0 %v10069_v32 }
 0x471   :  { %6634 = vmatpush3.bf16.msra.mxu0 %v6947_v17  ;;  %6649 = vmatprep.mubr.msk.bf16.mxu0 %vm7207_vm2, %v10067_v27  ;;  %v10081_v17 = vld [vmem:[#allocation145_spill] sm:$0xff] }
 0x472   :  { %6635 = vmatprep.subr.bf16.mxu0 %v10067_v27 }
 0x475   :  { %6636 = vmatpush3.bf16.msra.mxu0 %v6948_v35 }
 0x476   :  { %6637 = vmatprep.subr.bf16.mxu0 %v10067_v27 }
 0x479   :  { %6638 = vmatpush3.bf16.msra.mxu0 %v6949_v38  ;;  %v10082_v38 = vld [vmem:[#allocation153_spill] sm:$0xff] }
 0x47a   :  { %6639 = vmatprep.subr.bf16.mxu0 %v10067_v27 }
 0x47d   :  { %6640 = vmatpush3.bf16.msra.mxu0 %v6950_v45 }
 0x47e   :  { %6641 = vmatprep.subr.bf16.mxu0 %v10067_v27 }
 0x481   :  { %6642 = vmatpush3.bf16.msra.mxu0 %v6951_v39  ;;  %v10083_v39 = vld [vmem:[#allocation162_spill] sm:$0xff] }
 0x482   :  { %6643 = vmatprep.subr.bf16.mxu0 %v10067_v27 }
 0x485   :  { %6644 = vmatpush3.bf16.msra.mxu0 %v6952_v8  ;;  %v10084_v8 = vld [vmem:[#allocation147_spill] sm:$0xff] }
 0x486   :  { %6645 = vmatprep.subr.bf16.mxu0 %v10067_v27 }
 0x489   :  { %6646 = vmatpush3.bf16.msra.mxu0 %v6953_v52 }
 0x48a   :  { %6647 = vmatprep.subr.bf16.mxu0 %v10067_v27 }
 0x48d   :  { %6648 = vmatpush3.bf16.msra.mxu0 %v6954_v9  ;;  %v10085_v9 = vld [vmem:[#allocation151_spill] sm:$0xff] }
 0x490   :  { %6650 = vmatmul.mubr.bf16.vlgmr.msra.gmra.mrb[36].mxu0 %v8639_v12 }
 0x491   :  { %6675 = vmatprep.mubr.msk.bf16.mxu0 %vm153_vm3, %v10072_v29 }
 0x523   :  { %v6585_v31 = vpop.f32.mrb[28].mxu0 }
 0x524   :  { %v3484_v4 = vadd.f32 %v6585_v31, %v3440_v1  ;;  %v3475_v40 = vpop.f32.mrb[29].mxu0 }
 0x525   :  { %v3476_v62 = vadd.f32 %v3475_v40, %v3440_v1  ;;  %v6586_v30 = vpop.f32.mrb[30].mxu0 }
 0x526   :  { %v8724_v61 = vadd.f32 %v3499_v25, %v3484_v4  ;;  %v3478_v16 = vpop.f32.mrb[31].mxu0  ;;  %v10090_v4 = vld [vmem:[#allocation154_spill] sm:$0xff] }
 0x527   :  { %v8727_v43 = vadd.f32 %v3497_v18, %v3476_v62  ;;  %v3479_v34 = vadd.f32 %v3478_v16, %v3440_v1  ;;  %v10088_v1 = vld [vmem:[#allocation150_spill] sm:$0xff]  ;;  %v10093_v16 = vld [vmem:[#allocation155_spill] sm:$0xff] }
 0x528   :  { %v3505_v53 = vadd.f32 %v8724_v61, %v10078_v20  ;;  %v3508_v41 = vadd.f32 %v8724_v61, %v10079_v13  ;;  %v3511_v45 = vadd.f32 %v8724_v61, %v10082_v38  ;;  %v3514_v26 = vadd.f32 %v8724_v61, %v10083_v39  ;;  %v10092_v62 = vld [vmem:[#allocation158_spill] sm:$0xff]  ;;  %v10095_v20 = vld [vmem:[#allocation177_spill] sm:$0xff] }
 0x529   :  { %v8732_v47 = vadd.f32 %v3498_v22, %v3479_v34  ;;  %v3503_v51 = vadd.f32 %v8727_v43, %v10080_v63  ;;  %v3506_v35 = vadd.f32 %v8727_v43, %v10081_v17  ;;  %v3509_v52 = vadd.f32 %v8727_v43, %v10084_v8  ;;  %v10094_v22 = vld [vmem:[#allocation164_spill] sm:$0xff]  ;;  %v10096_v63 = vld [vmem:[#allocation170_spill] sm:$0xff]  ;;  %v10097_v38 = vld [vmem:[#allocation165_spill] sm:$0xff] }
 0x52a   :  { %v3512_v29 = vadd.f32 %v8727_v43, %v10085_v9  ;;  %v3515_v57 = vadd.f32 %v8727_v43, %v10086_v15  ;;  %v3517_v58 = vadd.f32 %v8724_v61, %v10087_v10  ;;  %v3518_v18 = vadd.f32 %v8727_v43, %v10091_v21  ;;  %v10098_v8 = vld [vmem:[#allocation178_spill] sm:$0xff]  ;;  %v10099_v15 = vld [vmem:[#allocation169_spill] sm:$0xff] }
 0x52b   :  { %v3504_v31 = vadd.f32 %v8732_v47, %v10088_v1  ;;  %v3507_v25 = vadd.f32 %v8732_v47, %v10089_v46  ;;  %v3510_v40 = vadd.f32 %v8732_v47, %v10090_v4  ;;  %v3513_v30 = vadd.f32 %v8732_v47, %v10092_v62  ;;  %v10100_v1 = vld [vmem:[#allocation179_spill] sm:$0xff]  ;;  %v10101_v4 = vld [vmem:[#allocation180_spill] sm:$0xff] }
 0x52c   :  { %v3516_v33 = vadd.f32 %v8732_v47, %v10093_v16  ;;  %v3519_v34 = vadd.f32 %v8732_v47, %v10094_v22  ;;  %v3520_v13 = vadd.f32 %v8724_v61, %v10095_v20  ;;  %v3521_v17 = vadd.f32 %v8727_v43, %v10096_v63  ;;  %v10102_v62 = vld [vmem:[#allocation159_spill] sm:$0xff]  ;;  %v10103_v22 = vld [vmem:[#allocation166_spill] sm:$0xff] }
 0x52d   :  { %v3522_v39 = vadd.f32 %v8732_v47, %v10097_v38  ;;  %v3523_v9 = vadd.f32 %v8724_v61, %v10098_v8  ;;  %v3524_v10 = vadd.f32 %v8727_v43, %v10099_v15  ;;  %v3525_v46 = vadd.f32 %v8732_v47, %v10100_v1  ;;  %v10104_v63 = vld [vmem:[#allocation171_spill] sm:$0xff]  ;;  %v10105_v8 = vld [vmem:[#allocation161_spill] sm:$0xff]  ;;  %v10106_v1 = vld [vmem:[#allocation168_spill] sm:$0xff] }
 0x52e   :  { %v3526_v21 = vadd.f32 %v8724_v61, %v10101_v4  ;;  %v8784_v16 = vadd.f32 %v8727_v43, %v10102_v62  ;;  %v8788_v20 = vadd.f32 %v8732_v47, %v10103_v22  ;;  %v8792_v38 = vadd.f32 %v8724_v61, %v10104_v63  ;;  %v10107_v4 = vld [vmem:[#allocation181_spill] sm:$0xff] }
 0x52f   :  { %v8796_v15 = vadd.f32 %v8727_v43, %v10105_v8  ;;  %v8800_v55 = vadd.f32 %v8732_v47, %v10106_v1  ;;  %v8804_v62 = vadd.f32 %v8724_v61, %v10107_v4  ;;  %v8808_v22 = vadd.f32 %v8732_v47, %v10108_v19 }
 0x530   :  { %v3539_v0 = vmax.f32 %v3503_v51, %v3504_v31  ;;  %v3547_v48 = vmax.f32 %v3506_v35, %v3507_v25  ;;  %v3555_v63 = vmax.f32 %v3509_v52, %v3510_v40  ;;  %v3563_v23 = vmax.f32 %v3512_v29, %v3513_v30 }
 0x531   :  { %v3571_v7 = vmax.f32 %v3515_v57, %v3516_v33  ;;  %v3579_v3 = vmax.f32 %v3518_v18, %v3519_v34  ;;  %v3587_v8 = vmax.f32 %v3521_v17, %v3522_v39  ;;  %v3595_v1 = vmax.f32 %v3524_v10, %v3525_v46  ;;  %v10110_v17 = vld [vmem:[#allocation182_spill] sm:$0xff]  ;;  %v10111_v46 = vld [vmem:[#allocation183_spill] sm:$0xff] }
 0x532   :  { %v3540_v28 = vmax.f32 %v3539_v0, %v3505_v53  ;;  %v3548_v24 = vmax.f32 %v3547_v48, %v3508_v41  ;;  %v3556_v44 = vmax.f32 %v3555_v63, %v3511_v45  ;;  %v3564_v6 = vmax.f32 %v3563_v23, %v3514_v26 }
 0x533   :  { %v3572_v50 = vmax.f32 %v3571_v7, %v3517_v58  ;;  %v3580_v49 = vmax.f32 %v3579_v3, %v3520_v13  ;;  %v3588_v4 = vmax.f32 %v3587_v8, %v3523_v9  ;;  %v3596_v19 = vmax.f32 %v3595_v1, %v3526_v21 }
 0x534   :  { %v3541_v37 = vrot.slane %v3540_v28, 4  ;;  %v3549_v14 = vrot.slane %v3548_v24, 4  ;;  %v3557_v60 = vrot.slane %v3556_v44, 4  ;;  %v3565_v56 = vrot.slane %v3564_v6, 4 }
 0x535   :  { %v3573_v51 = vrot.slane %v3572_v50, 4  ;;  %v3581_v35 = vrot.slane %v3580_v49, 4  ;;  %v3589_v52 = vrot.slane %v3588_v4, 4  ;;  %v3597_v25 = vrot.slane %v3596_v19, 4 }
 0x536   :  { %v3542_v29 = vmax.f32 %v3540_v28, %v3541_v37  ;;  %v3550_v57 = vmax.f32 %v3548_v24, %v3549_v14  ;;  %v3558_v31 = vmax.f32 %v3556_v44, %v3557_v60  ;;  %v3566_v0 = vmax.f32 %v3564_v6, %v3565_v56 }
 0x537   :  { %v3574_v48 = vmax.f32 %v3572_v50, %v3573_v51  ;;  %v3582_v53 = vmax.f32 %v3580_v49, %v3581_v35  ;;  %v3590_v41 = vmax.f32 %v3588_v4, %v3589_v52  ;;  %v3598_v45 = vmax.f32 %v3596_v19, %v3597_v25  ;;  %v10109_v49 = vld [vmem:[#allocation174_spill] sm:$0xff]  ;;  %v10112_v4 = vld [vmem:[#allocation176_spill] sm:$0xff] }
 0x538   :  { %v3543_v23 = vrot.slane %v3542_v29, 2  ;;  %v3551_v7 = vrot.slane %v3550_v57, 2  ;;  %v3559_v3 = vrot.slane %v3558_v31, 2  ;;  %v3567_v26 = vrot.slane %v3566_v0, 2  ;;  %v10113_v51 = vld [vmem:[#allocation184_spill] sm:$0xff] }
 0x539   :  { %v3575_v58 = vrot.slane %v3574_v48, 2  ;;  %v3583_v40 = vrot.slane %v3582_v53, 2  ;;  %v3591_v18 = vrot.slane %v3590_v41, 2  ;;  %v3599_v13 = vrot.slane %v3598_v45, 2 }
 0x53a   :  { %v3544_v30 = vmax.f32 %v3542_v29, %v3543_v23  ;;  %v3552_v33 = vmax.f32 %v3550_v57, %v3551_v7  ;;  %v3560_v34 = vmax.f32 %v3558_v31, %v3559_v3  ;;  %v3568_v37 = vmax.f32 %v3566_v0, %v3567_v26 }
 0x53b   :  { %v3576_v14 = vmax.f32 %v3574_v48, %v3575_v58  ;;  %v3584_v60 = vmax.f32 %v3582_v53, %v3583_v40  ;;  %v3592_v44 = vmax.f32 %v3590_v41, %v3591_v18  ;;  %v3600_v56 = vmax.f32 %v3598_v45, %v3599_v13 }
 0x53c   :  { %v3545_v6 = vrot.slane %v3544_v30, 1  ;;  %v3553_v50 = vrot.slane %v3552_v33, 1  ;;  %v3561_v24 = vrot.slane %v3560_v34, 1  ;;  %v3533_v28 = vadd.f32 %v8727_v43, %v10109_v49 }
 0x53d   :  { %v3537_v39 = vadd.f32 %v8732_v47, %v10110_v17  ;;  %v3569_v9 = vrot.slane %v3568_v37, 1  ;;  %v3577_v10 = vrot.slane %v3576_v14, 1  ;;  %v3535_v21 = vadd.f32 %v8724_v61, %v10111_v46 }
 0x53e   :  { %v3546_v63 = vmax.f32 %v3544_v30, %v3545_v6  ;;  %v3554_v8 = vmax.f32 %v3552_v33, %v3553_v50  ;;  %v3562_v1 = vmax.f32 %v3560_v34, %v3561_v24  ;;  %v3536_v19 = vadd.f32 %v8727_v43, %v10112_v4  ;;  %v6955_v24 = vld [vmem:[%s7345_s3 + $0x180] sm:$0xff]  }
 0x53f   :  { %v3538_v35 = vadd.f32 %v8724_v61, %v10113_v51  ;;  %v3585_v52 = vrot.slane %v3584_v60, 1  ;;  %v3593_v29 = vrot.slane %v3592_v44, 1  ;;  %v3601_v57 = vrot.slane %v3600_v56, 1 }
 0x540   :  { %v3603_v47 = vmax.f32 %v8784_v16, %v8788_v20  ;;  %v3611_v31 = vmax.f32 %v8796_v15, %v8800_v55  ;;  %v3619_v25 = vmax.f32 %v3533_v28, %v8808_v22  ;;  %v3570_v0 = vmax.f32 %v3568_v37, %v3569_v9 }
 0x541   :  { %v3578_v48 = vmax.f32 %v3576_v14, %v3577_v10  ;;  %v3627_v53 = vmax.f32 %v3536_v19, %v3537_v39  ;;  %v3744_v41 = vsel %vm1060_vm10, %v3554_v8, %v3546_v63  ;;  %v3586_v16 = vmax.f32 %v3584_v60, %v3585_v52  ;;  %v6956_v8 = vld [vmem:[%s7345_s3 + $0x188] sm:$0xff]  }
 0x542   :  { %v3604_v23 = vmax.f32 %v3603_v47, %v8792_v38  ;;  %v3612_v61 = vmax.f32 %v3611_v31, %v8804_v62  ;;  %v3620_v7 = vmax.f32 %v3619_v25, %v3535_v21  ;;  %v3745_v3 = vsel %vm1062_vm11, %v3562_v1, %v3744_v41  ;;  %v10114_v21 = vld [vmem:[#allocation111_spill] sm:$0xff] }
 0x543   :  { %v3878_v43 = vpop.f32.mrb[32].mxu0  ;;  %v3594_v20 = vmax.f32 %v3592_v44, %v3593_v29  ;;  %v3628_v26 = vmax.f32 %v3627_v53, %v3538_v35  ;;  %v3746_v55 = vsel %vm1064_vm12, %v3570_v0, %v3745_v3  ;;  %v3602_v33 = vmax.f32 %v3600_v56, %v3601_v57  ;;  %v6957_v29 = vld [vmem:[%s7345_s3 + $0x190] sm:$0xff]   ;;  %v6958_v41 = vld [vmem:[%s7345_s3 + $0x198] sm:$0xff]  }
 0x544   :  { %v6625_v45 = vpop.f32.mrb[33].mxu0  ;;  %v3605_v22 = vrot.slane %v3604_v23, 4  ;;  %v3613_v58 = vrot.slane %v3612_v61, 4  ;;  %v3621_v40 = vrot.slane %v3620_v7, 4  ;;  %v3747_v18 = vsel %vm1066_vm13, %v3578_v48, %v3746_v55  ;;  %v6961_v3 = vld [vmem:[%s7345_s3 + $0x1b0] sm:$0xff]   ;;  %v6962_v55 = vld [vmem:[%s7345_s3 + $0x1b8] sm:$0xff]  }
 0x545   :  { %v3881_v15 = vpop.f32.mrb[34].mxu0  ;;  %v3629_v62 = vrot.slane %v3628_v26, 4  ;;  %v3748_v34 = vsel %vm1068_vm14, %v3586_v16, %v3747_v18  ;;  %v3729_v31 = vadd.f32 %v8722_v5, %v8690_v2  ;;  %v6959_v2 = vld [vmem:[%s7345_s3 + $0x1a0] sm:$0xff]   ;;  %v3302_v45 = vmax.f32 %v8662_v59, 0.0  ;;  %v6965_v18 = vld [vmem:[%s9842_s14 + $0x190] sm:$0xff]  }
 0x546   :  { %v3887_v30 = vpack.c.bf16 %v3881_v15, %v3878_v43  ;;  %v6626_v38 = vpop.f32.mrb[35].mxu0  ;;  %v3606_v13 = vmax.f32 %v3604_v23, %v3605_v22  ;;  %v3614_v37 = vmax.f32 %v3612_v61, %v3613_v58  ;;  %v3622_v14 = vmax.f32 %v3620_v7, %v3621_v40  ;;  %v6960_v7 = vld [vmem:[%s7345_s3 + $0x1a8] sm:$0xff]   ;;  %v6963_v58 = vld [vmem:[%s9842_s14 + $0x180] sm:$0xff]  }
 0x547   :  { %v3749_v60 = vsel %vm1070_vm15, %v3594_v20, %v3748_v34  ;;  %v3630_v6 = vmax.f32 %v3628_v26, %v3629_v62  ;;  %v3308_v15 = vmax.f32 %v3302_v45, 0.0  ;;  %v6964_v40 = vld [vmem:[%s9842_s14 + $0x188] sm:$0xff]   ;;  %v6967_v38 = vld [vmem:[%s9842_s14 + $0x1a0] sm:$0xff]   ;;  %v6969_v62 = vld [vmem:[%s9842_s14 + $0x1b0] sm:$0xff]  }
 0x548   :  { %v3893_v44 = vsel %vm1227_vm8, %v3887_v30, 0  ;;  %6808 = vmatprep.subr.msk.bf16.mxu1 %vm1227_vm8, %v3887_v30  ;;  %v3750_v50 = vsel %vm1072_vm1, %v3602_v33, %v3749_v60  ;;  %v3607_v49 = vrot.slane %v3606_v13, 2  ;;  %v3615_v56 = vrot.slane %v3614_v37, 2  ;;  %v6966_v30 = vld [vmem:[%s9842_s14 + $0x198] sm:$0xff]   ;;  %v6968_v33 = vld [vmem:[%s9842_s14 + $0x1a8] sm:$0xff]  }
 0x549   :  { %6628 = vmatpush3.bf16.msra.mxu1 %v3893_v44  ;;  %v3623_v28 = vrot.slane %v3622_v14, 2  ;;  %v3756_v17 = vadd.f32 %v3750_v50, %v8730_v42  ;;  %v3631_v39 = vrot.slane %v3630_v6, 2  ;;  %v8874_v59 = vpack.c.bf16 %v3308_v15, %v3308_v15  ;;  %v6970_v34 = vld [vmem:[%s9842_s14 + $0x1b8] sm:$0xff]   ;;  %v10133_v45 = vld [vmem:[#allocation109_spill] sm:$0xff] }
 0x54a   :  { %6653 = vmatprep.subr.bf16.mxu1 %v10067_v27  ;;  %v3608_v9 = vmax.f32 %v3606_v13, %v3607_v49  ;;  %v3616_v10 = vmax.f32 %v3614_v37, %v3615_v56  ;;  %v10120_v13 = vld [vmem:[#allocation138_spill] sm:$0xff]  ;;  %v6001_v37 = vld [vmem:[%s9911_s12 + $0xa] sm:$0x3] }
 0x54b   :  { %v3624_v46 = vmax.f32 %v3622_v14, %v3623_v28  ;;  %v3632_v63 = vmax.f32 %v3630_v6, %v3631_v39  ;;  %v3758_v0 = vmax.f32 %v3756_v17, 0.0  ;;  %10119 = vst [vmem:[#allocation148_spill] sm:$0xff] %v8874_v59  ;;  %v3944_v14 = vrot.slane %v6001_v37, 7  ;;  %v10122_v17 = vld [vmem:[#allocation35_spill] sm:$0xff] }
 0x54c   :  { %6630 = vmatmul.mubr.msk.bf16.vlgmr.msra.gmra.mrb[44].mxu1 %vm1220_vm9, %v10114_v21  ;;  %v3609_v1 = vrot.slane %v3608_v9, 1  ;;  %v3617_v4 = vrot.slane %v3616_v10, 1  ;;  %v3891_v6 = vrot.slane %v6001_v37, %v10074_v36  ;;  %v10123_v21 = vld [vmem:[#allocation37_spill] sm:$0xff] }
 0x54d   :  { %6654 = vmatpush3.bf16.msra.mxu1 %v6955_v24  ;;  %6669 = vmatprep.mubr.msk.bf16.mxu1 %vm7207_vm2, %v10067_v27  ;;  %v3625_v19 = vrot.slane %v3624_v46, 1  ;;  %v3633_v42 = vrot.slane %v3632_v63, 1  ;;  %v8854_v23 = vmax.f32 %v3758_v0, 0.0  ;;  %v3946_v60 = vsub.f32 %v6001_v37, %v3944_v14  ;;  %v10121_v24 = vld [vmem:[#allocation39_spill] sm:$0xff]  ;;  %v10129_v0 = vld [vmem:[#allocation93_spill] sm:$0xff] }
 0x54e   :  { %6655 = vmatprep.subr.bf16.mxu1 %v10067_v27  ;;  %v3610_v51 = vmax.f32 %v3608_v9, %v3609_v1  ;;  %v3618_v35 = vmax.f32 %v3616_v10, %v3617_v4  ;;  %v10140_v37 = vld [vmem:[#allocation95_spill] sm:$0xff] }
 0x54f   :  { %v3626_v52 = vmax.f32 %v3624_v46, %v3625_v19  ;;  %v3634_v57 = vmax.f32 %v3632_v63, %v3633_v42  ;;  %10115 = vst [vmem:[#allocation186_spill] sm:$0xff] %v8854_v23  ;;  %v3950_v44 = vrot.slane %v3946_v60, %v10073_v54  ;;  %v10124_v19 = vld [vmem:[#allocation65_spill] sm:$0xff]  ;;  %v10141_v60 = vld [vmem:[#allocation122_spill] sm:$0xff] }
 0x550   :  { %v3751_v47 = vsel %vm1060_vm10, %v3618_v35, %v3610_v51  ;;  %v10125_v51 = vld [vmem:[#allocation64_spill] sm:$0xff] }
 0x551   :  { %6656 = vmatpush3.bf16.msra.mxu1 %v6956_v8  ;;  %v3752_v25 = vsel %vm1062_vm11, %v3626_v52, %v3751_v47  ;;  %v3953_v49 = vmul.f32 %v3950_v44, %v10121_v24  ;;  %v3951_v39 = vmul.f32 %v3950_v44, %v10122_v17  ;;  %v3952_v63 = vmul.f32 %v3950_v44, %v10123_v21  ;;  %v10126_v52 = vld [vmem:[#allocation41_spill] sm:$0xff]  ;;  %v10143_v24 = vld [vmem:[#allocation112_spill] sm:$0xff] }
 0x552   :  { %6657 = vmatprep.subr.bf16.mxu1 %v10067_v27  ;;  %v3753_v48 = vsel %vm1064_vm12, %v3634_v57, %v3752_v25  ;;  %v10127_v57 = vld [vmem:[#allocation43_spill] sm:$0xff]  ;;  %v10145_v17 = vld [vmem:[#allocation117_spill] sm:$0xff] }
 0x553   :  { %v3757_v53 = vadd.f32 %v3753_v48, %v3729_v31  ;;  %v10128_v31 = vld [vmem:[#allocation81_spill] sm:$0xff] }
 0x555   :  { %6658 = vmatpush3.bf16.msra.mxu1 %v6957_v29  ;;  %v3759_v43 = vmax.f32 %v3757_v53, 0.0  ;;  %v10130_v53 = vld [vmem:[#allocation57_spill] sm:$0xff] }
 0x556   :  { %6659 = vmatprep.subr.bf16.mxu1 %v10067_v27 }
 0x557   :  { %v8856_v61 = vmax.f32 %v3759_v43, 0.0  ;;  %v10131_v43 = vld [vmem:[#allocation67_spill] sm:$0xff] }
 0x559   :  { %10116 = vst [vmem:[#allocation108_spill] sm:$0xff] %v8856_v61  ;;  %6660 = vmatpush3.bf16.msra.mxu1 %v6958_v41 }
 0x55a   :  { %6661 = vmatprep.subr.bf16.mxu1 %v10067_v27 }
 0x55d   :  { %6662 = vmatpush3.bf16.msra.mxu1 %v6959_v2 }
 0x55e   :  { %6663 = vmatprep.subr.bf16.mxu1 %v10067_v27 }
 0x561   :  { %6664 = vmatpush3.bf16.msra.mxu1 %v6960_v7  ;;  %v10132_v7 = vld [vmem:[#allocation80_spill] sm:$0xff] }
 0x562   :  { %6665 = vmatprep.subr.bf16.mxu1 %v10067_v27 }
 0x563   :  { %v8867_v16 = vpop.f32.mrb[36].mxu0 }
 0x564   :  { %10117 = vst [vmem:[#allocation104_spill] sm:$0xff] %v8867_v16  ;;  %v6651_v20 = vpop.f32.mrb[37].mxu0 }
 0x565   :  { %v8869_v26 = vpop.f32.mrb[38].mxu0  ;;  %6666 = vmatpush3.bf16.msra.mxu1 %v6961_v3 }
 0x566   :  { %10118 = vst [vmem:[#allocation123_spill] sm:$0xff] %v8869_v26  ;;  %v6652_v22 = vpop.f32.mrb[39].mxu0  ;;  %6667 = vmatprep.subr.bf16.mxu1 %v10067_v27 }
 0x567   :  { %v10135_v22 = vld [vmem:[#allocation42_spill] sm:$0xff] }
 0x569   :  { %6668 = vmatpush3.bf16.msra.mxu1 %v6962_v55  ;;  %v10134_v55 = vld [vmem:[#allocation40_spill] sm:$0xff] }
 0x56a   :  { %6679 = vmatprep.subr.bf16.mxu1 %v10067_v27 }
 0x56c   :  { %6670 = vmatmul.mubr.bf16.vlgmr.msra.gmra.mrb[48].mxu1 %v8874_v59 }
 0x56d   :  { %6680 = vmatpush3.bf16.msra.mxu1 %v6963_v58  ;;  %6695 = vmatprep.mubr.msk.bf16.mxu1 %vm7207_vm2, %v10067_v27 }
 0x56e   :  { %6681 = vmatprep.subr.bf16.mxu1 %v10067_v27 }
 0x571   :  { %6682 = vmatpush3.bf16.msra.mxu1 %v6964_v40  ;;  %v10136_v40 = vld [vmem:[#allocation56_spill] sm:$0xff] }
 0x572   :  { %6683 = vmatprep.subr.bf16.mxu1 %v10067_v27 }
 0x575   :  { %6684 = vmatpush3.bf16.msra.mxu1 %v6965_v18 }
 0x576   :  { %6685 = vmatprep.subr.bf16.mxu1 %v10067_v27 }
 0x579   :  { %6686 = vmatpush3.bf16.msra.mxu1 %v6966_v30  ;;  %v10137_v30 = vld [vmem:[#allocation66_spill] sm:$0xff] }
 0x57a   :  { %6687 = vmatprep.subr.bf16.mxu1 %v10067_v27 }
 0x57d   :  { %6688 = vmatpush3.bf16.msra.mxu1 %v6967_v38 }
 0x57e   :  { %6689 = vmatprep.subr.bf16.mxu1 %v10067_v27 }
 0x581   :  { %6690 = vmatpush3.bf16.msra.mxu1 %v6968_v33  ;;  %v10138_v33 = vld [vmem:[#allocation83_spill] sm:$0xff] }
 0x582   :  { %6691 = vmatprep.subr.bf16.mxu1 %v10067_v27 }
 0x585   :  { %6692 = vmatpush3.bf16.msra.mxu1 %v6969_v62 }
 0x586   :  { %6693 = vmatprep.subr.bf16.mxu1 %v10067_v27 }
 0x589   :  { %6694 = vmatpush3.bf16.msra.mxu1 %v6970_v34  ;;  %v10139_v34 = vld [vmem:[#allocation92_spill] sm:$0xff] }
 0x58c   :  { %6696 = vmatmul.mubr.bf16.vlgmr.msra.gmra.mrb[52].mxu1 %v8639_v12 }
 0x58d   :  { %6721 = vmatprep.mubr.msk.bf16.mxu1 %vm1220_vm9, %v10120_v13 }
 0x61f   :  { %v6631_v50 = vpop.f32.mrb[44].mxu1 }
 0x620   :  { %v3938_v56 = vadd.f32 %v6631_v50, %v3891_v6  ;;  %v3929_v28 = vpop.f32.mrb[45].mxu1 }
 0x621   :  { %v3930_v9 = vadd.f32 %v3929_v28, %v3891_v6  ;;  %v6632_v10 = vpop.f32.mrb[46].mxu1 }
 0x622   :  { %v8902_v12 = vadd.f32 %v3953_v49, %v3938_v56  ;;  %v3932_v46 = vpop.f32.mrb[47].mxu1  ;;  %v10144_v56 = vld [vmem:[#allocation136_spill] sm:$0xff] }
 0x623   :  { %v8905_v8 = vadd.f32 %v3951_v39, %v3930_v9  ;;  %v3933_v1 = vadd.f32 %v3932_v46, %v3891_v6  ;;  %v10142_v6 = vld [vmem:[#allocation105_spill] sm:$0xff] }
 0x624   :  { %v3959_v42 = vadd.f32 %v8902_v12, %v10124_v19  ;;  %v3962_v35 = vadd.f32 %v8902_v12, %v10125_v51  ;;  %v3965_v25 = vadd.f32 %v8902_v12, %v10128_v31  ;;  %v3968_v48 = vadd.f32 %v8902_v12, %v10129_v0  ;;  %v10146_v9 = vld [vmem:[#allocation125_spill] sm:$0xff]  ;;  %v10149_v19 = vld [vmem:[#allocation44_spill] sm:$0xff]  ;;  %v10151_v31 = vld [vmem:[#allocation47_spill] sm:$0xff] }
 0x625   :  { %v8907_v4 = vadd.f32 %v3952_v63, %v3933_v1  ;;  %v3957_v29 = vadd.f32 %v8905_v8, %v10126_v52  ;;  %v3960_v47 = vadd.f32 %v8905_v8, %v10127_v57  ;;  %v3963_v41 = vadd.f32 %v8905_v8, %v10130_v53  ;;  %v10147_v46 = vld [vmem:[#allocation141_spill] sm:$0xff]  ;;  %v10152_v53 = vld [vmem:[#allocation46_spill] sm:$0xff] }
 0x626   :  { %v3966_v2 = vadd.f32 %v8905_v8, %v10131_v43  ;;  %v3969_v3 = vadd.f32 %v8905_v8, %v10132_v7  ;;  %v3971_v20 = vadd.f32 %v8902_v12, %v10133_v45  ;;  %v3972_v13 = vadd.f32 %v8905_v8, %v10139_v34  ;;  %v10148_v63 = vld [vmem:[#allocation45_spill] sm:$0xff]  ;;  %v10153_v7 = vld [vmem:[#allocation68_spill] sm:$0xff] }
 0x627   :  { %v3958_v15 = vadd.f32 %v8907_v4, %v10134_v55  ;;  %v3961_v58 = vadd.f32 %v8907_v4, %v10135_v22  ;;  %v3964_v18 = vadd.f32 %v8907_v4, %v10136_v40  ;;  %v3967_v38 = vadd.f32 %v8907_v4, %v10137_v30  ;;  %v10150_v52 = vld [vmem:[#allocation69_spill] sm:$0xff]  ;;  %v10154_v55 = vld [vmem:[#allocation59_spill] sm:$0xff]  ;;  %v10155_v40 = vld [vmem:[#allocation58_spill] sm:$0xff] }
 0x628   :  { %v3970_v62 = vadd.f32 %v8907_v4, %v10138_v33  ;;  %v3973_v14 = vadd.f32 %v8907_v4, %v10140_v37  ;;  %v3974_v44 = vadd.f32 %v8902_v12, %v10141_v60  ;;  %v3975_v50 = vadd.f32 %v8905_v8, %v10142_v6  ;;  %v10156_v33 = vld [vmem:[#allocation82_spill] sm:$0xff]  ;;  %v10157_v37 = vld [vmem:[#allocation71_spill] sm:$0xff] }
 0x629   :  { %v3976_v49 = vadd.f32 %v8907_v4, %v10143_v24  ;;  %v3977_v28 = vadd.f32 %v8902_v12, %v10144_v56  ;;  %v3978_v39 = vadd.f32 %v8905_v8, %v10145_v17  ;;  %v3979_v10 = vadd.f32 %v8907_v4, %v10146_v9  ;;  %v10158_v6 = vld [vmem:[#allocation70_spill] sm:$0xff]  ;;  %v10160_v9 = vld [vmem:[#allocation85_spill] sm:$0xff] }
 0x62a   :  { %v3980_v21 = vadd.f32 %v8902_v12, %v10147_v46  ;;  %v8959_v1 = vadd.f32 %v8905_v8, %v10148_v63  ;;  %v8963_v51 = vadd.f32 %v8907_v4, %v10149_v19  ;;  %v8967_v57 = vadd.f32 %v8902_v12, %v10150_v52  ;;  %v10159_v56 = vld [vmem:[#allocation94_spill] sm:$0xff]  ;;  %v10161_v63 = vld [vmem:[#allocation84_spill] sm:$0xff] }
 0x62b   :  { %v8971_v0 = vadd.f32 %v8905_v8, %v10151_v31  ;;  %v8975_v43 = vadd.f32 %v8907_v4, %v10152_v53  ;;  %v8979_v45 = vadd.f32 %v8902_v12, %v10153_v7  ;;  %v8983_v22 = vadd.f32 %v8905_v8, %v10154_v55  ;;  %v10162_v52 = vld [vmem:[#allocation106_spill] sm:$0xff]  ;;  %v10163_v53 = vld [vmem:[#allocation97_spill] sm:$0xff] }
 0x62c   :  { %v8987_v30 = vadd.f32 %v8907_v4, %v10155_v40  ;;  %v8991_v34 = vadd.f32 %v8902_v12, %v10156_v33  ;;  %v8995_v60 = vadd.f32 %v8905_v8, %v10157_v37  ;;  %v8999_v24 = vadd.f32 %v8907_v4, %v10158_v6 }
 0x62d   :  { %v9003_v17 = vadd.f32 %v8902_v12, %v10159_v56  ;;  %v9007_v46 = vadd.f32 %v8905_v8, %v10160_v9  ;;  %v9011_v19 = vadd.f32 %v8907_v4, %v10161_v63  ;;  %v9015_v31 = vadd.f32 %v8902_v12, %v10162_v52 }
 0x62e   :  { %v9019_v7 = vadd.f32 %v8905_v8, %v10163_v53  ;;  %v4005_v55 = vmax.f32 %v3957_v29, %v3958_v15  ;;  %v4013_v40 = vmax.f32 %v3960_v47, %v3961_v58  ;;  %v4021_v33 = vmax.f32 %v3963_v41, %v3964_v18 }
 0x62f   :  { %v4029_v37 = vmax.f32 %v3966_v2, %v3967_v38  ;;  %v4037_v6 = vmax.f32 %v3969_v3, %v3970_v62  ;;  %v4045_v56 = vmax.f32 %v3972_v13, %v3973_v14  ;;  %v4053_v11 = vmax.f32 %v3975_v50, %v3976_v49  ;;  %v10164_v62 = vld [vmem:[#allocation96_spill] sm:$0xff] }
 0x630   :  { %v4006_v9 = vmax.f32 %v4005_v55, %v3959_v42  ;;  %v4014_v5 = vmax.f32 %v4013_v40, %v3962_v35  ;;  %v4061_v36 = vmax.f32 %v3978_v39, %v3979_v10  ;;  %v4022_v63 = vmax.f32 %v4021_v33, %v3965_v25  ;;  %v10168_v40 = vld [vmem:[#allocation131_spill] sm:$0xff] }
 0x631   :  { %v4030_v54 = vmax.f32 %v4029_v37, %v3968_v48  ;;  %v4038_v23 = vmax.f32 %v4037_v6, %v3971_v20  ;;  %v4046_v61 = vmax.f32 %v4045_v56, %v3974_v44  ;;  %v4054_v32 = vmax.f32 %v4053_v11, %v3977_v28  ;;  %v10169_v37 = vld [vmem:[#allocation128_spill] sm:$0xff] }
 0x632   :  { %v4007_v52 = vrot.slane %v4006_v9, 4  ;;  %v4015_v59 = vrot.slane %v4014_v5, 4  ;;  %v4062_v26 = vmax.f32 %v4061_v36, %v3980_v21  ;;  %v4023_v53 = vrot.slane %v4022_v63, 4  ;;  %v10167_v21 = vld [vmem:[#allocation107_spill] sm:$0xff] }
 0x633   :  { %v4031_v16 = vrot.slane %v4030_v54, 4  ;;  %v4039_v29 = vrot.slane %v4038_v23, 4  ;;  %v4047_v47 = vrot.slane %v4046_v61, 4  ;;  %v4055_v3 = vrot.slane %v4054_v32, 4 }
 0x634   :  { %v4008_v41 = vmax.f32 %v4006_v9, %v4007_v52  ;;  %v4016_v2 = vmax.f32 %v4014_v5, %v4015_v59  ;;  %v4063_v15 = vrot.slane %v4062_v26, 4  ;;  %v4024_v42 = vmax.f32 %v4022_v63, %v4023_v53  ;;  %v10170_v9 = vld [vmem:[#allocation121_spill] sm:$0xff]  ;;  %v10171_v52 = vld [vmem:[#allocation135_spill] sm:$0xff] }
 0x635   :  { %v4032_v35 = vmax.f32 %v4030_v54, %v4031_v16  ;;  %v4040_v58 = vmax.f32 %v4038_v23, %v4039_v29  ;;  %v4048_v18 = vmax.f32 %v4046_v61, %v4047_v47  ;;  %v4056_v20 = vmax.f32 %v4054_v32, %v4055_v3  ;;  %v10165_v61 = vld [vmem:[#allocation119_spill] sm:$0xff]  ;;  %v10166_v16 = vld [vmem:[#allocation114_spill] sm:$0xff] }
 0x636   :  { %v4009_v25 = vrot.slane %v4008_v41, 2  ;;  %v4017_v48 = vrot.slane %v4016_v2, 2  ;;  %v4064_v38 = vmax.f32 %v4062_v26, %v4063_v15  ;;  %v3997_v11 = vadd.f32 %v8907_v4, %v10164_v62 }
 0x637   :  { %v4025_v36 = vrot.slane %v4024_v42, 2  ;;  %v4033_v13 = vrot.slane %v4032_v35, 2  ;;  %v4041_v14 = vrot.slane %v4040_v58, 2  ;;  %v4049_v49 = vrot.slane %v4048_v18, 2 }
 0x638   :  { %v4010_v44 = vmax.f32 %v4008_v41, %v4009_v25  ;;  %v4018_v50 = vmax.f32 %v4016_v2, %v4017_v48  ;;  %v4057_v5 = vrot.slane %v4056_v20, 2  ;;  %v4065_v23 = vrot.slane %v4064_v38, 2 }
 0x639   :  { %v4026_v59 = vmax.f32 %v4024_v42, %v4025_v36  ;;  %v9023_v28 = vmax.f32 %v4032_v35, %v4033_v13  ;;  %v9025_v54 = vmax.f32 %v4040_v58, %v4041_v14  ;;  %v3998_v32 = vadd.f32 %v8902_v12, %v10165_v61 }
 0x63a   :  { %v3999_v26 = vadd.f32 %v8905_v8, %v10166_v16  ;;  %v4011_v39 = vrot.slane %v4010_v44, 1  ;;  %v4019_v10 = vrot.slane %v4018_v50, 1  ;;  %v4000_v55 = vadd.f32 %v8907_v4, %v10167_v21 }
 0x63b   :  { %v4001_v33 = vadd.f32 %v8902_v12, %v10168_v40  ;;  %v4002_v6 = vadd.f32 %v8905_v8, %v10169_v37  ;;  %v4027_v56 = vrot.slane %v4026_v59, 1  ;;  %v4003_v63 = vadd.f32 %v8907_v4, %v10170_v9  ;;  %v6973_v9 = vld [vmem:[%s7345_s3 + $0x1d0] sm:$0xff]  }
 0x63c   :  { %v4004_v53 = vadd.f32 %v8902_v12, %v10171_v52  ;;  %v9041_v29 = vmax.f32 %v4048_v18, %v4049_v49  ;;  %v9043_v47 = vmax.f32 %v4056_v20, %v4057_v5  ;;  %v9045_v2 = vmax.f32 %v4010_v44, %v4011_v39 }
 0x63d   :  { %v4035_v3 = vrot.slane %v9023_v28, 1  ;;  %v4043_v15 = vrot.slane %v9025_v54, 1  ;;  %v9049_v42 = vmax.f32 %v4064_v38, %v4065_v23  ;;  %v9051_v4 = vmax.f32 %v4018_v50, %v4019_v10  ;;  %v10172_v50 = vld [vmem:[#allocation126_spill] sm:$0xff] }
 0x63e   :  { %v9053_v58 = vmax.f32 %v4026_v59, %v4027_v56  ;;  %v4069_v12 = vmax.f32 %v8959_v1, %v8963_v51  ;;  %v4077_v25 = vmax.f32 %v8971_v0, %v8975_v43  ;;  %v4085_v48 = vmax.f32 %v8983_v22, %v8987_v30  ;;  %v6971_v0 = vld [vmem:[%s7345_s3 + $0x1c0] sm:$0xff]  }
 0x63f   :  { %v4385_v41 = vpop.f32.mrb[48].mxu1  ;;  %v4093_v20 = vmax.f32 %v8995_v60, %v8999_v24  ;;  %v4101_v38 = vmax.f32 %v9007_v46, %v9011_v19  ;;  %v4109_v51 = vmax.f32 %v9019_v7, %v3997_v11  ;;  %v4117_v13 = vmax.f32 %v3999_v26, %v4000_v55 }
 0x640   :  { %v4393_v8 = vpack.c.bf16 %v4385_v41, %v4385_v41  ;;  %v6671_v35 = vpop.f32.mrb[49].mxu1  ;;  %v4070_v1 = vmax.f32 %v4069_v12, %v8967_v57  ;;  %v4078_v43 = vmax.f32 %v4077_v25, %v8979_v45  ;;  %v4086_v22 = vmax.f32 %v4085_v48, %v8991_v34 }
 0x641   :  { %v4388_v18 = vpop.f32.mrb[50].mxu1  ;;  %v4094_v30 = vmax.f32 %v4093_v20, %v9003_v17  ;;  %v4102_v60 = vmax.f32 %v4101_v38, %v9015_v31  ;;  %v4110_v46 = vmax.f32 %v4109_v51, %v3998_v32  ;;  %v4118_v19 = vmax.f32 %v4117_v13, %v4001_v33  ;;  %v6972_v31 = vld [vmem:[%s7345_s3 + $0x1c8] sm:$0xff]   ;;  %v6974_v13 = vld [vmem:[%s7345_s3 + $0x1d8] sm:$0xff]  }
 0x642   :  { %v4399_v62 = vsel %vm157_vm0, %v4393_v8, 0  ;;  %v6672_v36 = vpop.f32.mrb[51].mxu1  ;;  %6809 = vmatprep.subr.msk.bf16.mxu0 %vm157_vm0, %v4393_v8  ;;  %v4071_v24 = vrot.slane %v4070_v1, 4  ;;  %v4125_v57 = vmax.f32 %v4002_v6, %v4003_v63  ;;  %v4079_v14 = vrot.slane %v4078_v43, 4 }
 0x643   :  { %6674 = vmatpush3.bf16.msra.mxu0 %v4399_v62  ;;  %v4087_v7 = vrot.slane %v4086_v22, 4  ;;  %v4095_v11 = vrot.slane %v4094_v30, 4  ;;  %v4103_v44 = vrot.slane %v4102_v60, 4  ;;  %v4111_v34 = vrot.slane %v4110_v46, 4 }
 0x644   :  { %6699 = vmatprep.subr.bf16.mxu0 %v10067_v27  ;;  %v4072_v45 = vmax.f32 %v4070_v1, %v4071_v24  ;;  %v4119_v49 = vrot.slane %v4118_v19, 4  ;;  %v4126_v17 = vmax.f32 %v4125_v57, %v4004_v53  ;;  %v4051_v5 = vrot.slane %v9041_v29, 1 }
 0x645   :  { %v4080_v59 = vmax.f32 %v4078_v43, %v4079_v14  ;;  %v4088_v23 = vmax.f32 %v4086_v22, %v4087_v7  ;;  %v4096_v61 = vmax.f32 %v4094_v30, %v4095_v11  ;;  %v4104_v16 = vmax.f32 %v4102_v60, %v4103_v44  ;;  %v6005_v44 = vld [vmem:[%s9932_s27 + $0x5] ss:$0 sm:$0xff] }
 0x646   :  { %6676 = vmatmul.mubr.msk.bf16.vlgmr.msra.gmra.mrb[40].mxu0 %vm153_vm3, %v10172_v50  ;;  %v4073_v32 = vrot.slane %v4072_v45, 2  ;;  %v4112_v26 = vmax.f32 %v4110_v46, %v4111_v34  ;;  %v4120_v39 = vmax.f32 %v4118_v19, %v4119_v49  ;;  %v4127_v40 = vrot.slane %v4126_v17, 4 }
 0x647   :  { %6700 = vmatpush3.bf16.msra.mxu0 %v6971_v0  ;;  %6715 = vmatprep.mubr.msk.bf16.mxu0 %vm7207_vm2, %v10067_v27  ;;  %v4081_v10 = vrot.slane %v4080_v59, 2  ;;  %v4089_v21 = vrot.slane %v4088_v23, 2  ;;  %v4097_v55 = vrot.slane %v4096_v61, 2  ;;  %v4105_v37 = vrot.slane %v4104_v16, 2 }
 0x648   :  { %6701 = vmatprep.subr.bf16.mxu0 %v10067_v27  ;;  %v4074_v33 = vmax.f32 %v4072_v45, %v4073_v32  ;;  %v4113_v6 = vrot.slane %v4112_v26, 2  ;;  %v4121_v56 = vrot.slane %v4120_v39, 2  ;;  %v4128_v41 = vmax.f32 %v4126_v17, %v4127_v40 }
 0x649   :  { %v4082_v63 = vmax.f32 %v4080_v59, %v4081_v10  ;;  %v4090_v52 = vmax.f32 %v4088_v23, %v4089_v21  ;;  %v4098_v53 = vmax.f32 %v4096_v61, %v4097_v55  ;;  %v4106_v35 = vmax.f32 %v4104_v16, %v4105_v37  ;;  %v10174_v61 = vld [vmem:[#allocation123_spill] sm:$0xff]  ;;  %v6977_v55 = vld [vmem:[%s7345_s3 + $0x1f0] sm:$0xff]  }
 0x64a   :  { %v4075_v8 = vrot.slane %v4074_v33, 1  ;;  %v4114_v12 = vmax.f32 %v4112_v26, %v4113_v6  ;;  %v4122_v18 = vmax.f32 %v4120_v39, %v4121_v56  ;;  %v4129_v38 = vrot.slane %v4128_v41, 2  ;;  %v6976_v26 = vld [vmem:[%s7345_s3 + $0x1e8] sm:$0xff]  }
 0x64b   :  { %6702 = vmatpush3.bf16.msra.mxu0 %v6972_v31  ;;  %v4083_v25 = vrot.slane %v4082_v63, 1  ;;  %v4091_v48 = vrot.slane %v4090_v52, 1  ;;  %v4099_v20 = vrot.slane %v4098_v53, 1  ;;  %v4059_v62 = vrot.slane %v9043_v47, 1  ;;  %v10173_v31 = vld [vmem:[#allocation104_spill] sm:$0xff] }
 0x64c   :  { %6703 = vmatprep.subr.bf16.mxu0 %v10067_v27  ;;  %v4067_v36 = vrot.slane %v9049_v42, 1  ;;  %v4076_v1 = vmax.f32 %v4074_v33, %v4075_v8  ;;  %v4107_v51 = vrot.slane %v4106_v35, 1  ;;  %v4115_v22 = vrot.slane %v4114_v12, 1  ;;  %v6978_v33 = vld [vmem:[%s7345_s3 + $0x1f8] sm:$0xff]   ;;  %v6983_v8 = vld [vmem:[%s9842_s14 + $0x1e0] sm:$0xff]  }
 0x64d   :  { %v4084_v0 = vmax.f32 %v4082_v63, %v4083_v25  ;;  %v4092_v43 = vmax.f32 %v4090_v52, %v4091_v48  ;;  %v4130_v30 = vmax.f32 %v4128_v41, %v4129_v38  ;;  %v4036_v60 = vmax.f32 %v9023_v28, %v4035_v3  ;;  %v10179_v63 = vld [vmem:[#allocation185_spill] sm:$0xff]  ;;  %v6982_v41 = vld [vmem:[%s9842_s14 + $0x1d8] sm:$0xff]   ;;  %v10181_v48 = vld [vmem:[#allocation148_spill] sm:$0xff] }
 0x64e   :  { %v4044_v24 = vmax.f32 %v9025_v54, %v4043_v15  ;;  %v4123_v46 = vrot.slane %v4122_v18, 1  ;;  %v4246_v19 = vsel %vm1060_vm10, %v9051_v4, %v9045_v2  ;;  %v4100_v57 = vmax.f32 %v4098_v53, %v4099_v20  ;;  %v6975_v15 = vld [vmem:[%s7345_s3 + $0x1e0] sm:$0xff]   ;;  %v6980_v52 = vld [vmem:[%s9842_s14 + $0x1c8] sm:$0xff]   ;;  %v6981_v53 = vld [vmem:[%s9842_s14 + $0x1d0] sm:$0xff]   ;;  %s10180_s3 = sld [smem:[#allocation29_spill]] }
 0x64f   :  { %6704 = vmatpush3.bf16.msra.mxu0 %v6973_v9  ;;  %v4131_v14 = vrot.slane %v4130_v30, 1  ;;  %v4247_v7 = vsel %vm1062_vm11, %v9053_v58, %v4246_v19  ;;  %v4253_v11 = vsel %vm1060_vm10, %v4084_v0, %v4076_v1  ;;  %v4052_v50 = vmax.f32 %v9041_v29, %v4051_v5  ;;  %v6979_v9 = vld [vmem:[%s9842_s14 + $0x1c0] sm:$0xff]  }
 0x650   :  { %6705 = vmatprep.subr.bf16.mxu0 %v10067_v27  ;;  %v4108_v28 = vmax.f32 %v4106_v35, %v4107_v51  ;;  %v4248_v3 = vsel %vm1064_vm12, %v4036_v60, %v4247_v7  ;;  %v4254_v54 = vsel %vm1062_vm11, %v4092_v43, %v4253_v11  ;;  %v4060_v45 = vmax.f32 %v9043_v47, %v4059_v62  ;;  %v6984_v35 = vld [vmem:[%s9842_s14 + $0x1e8] sm:$0xff]   ;;  %v10182_v0 = vld [vmem:[#allocation108_spill] sm:$0xff]  ;;  %v10183_v43 = vld [vmem:[#allocation186_spill] sm:$0xff] }
 0x651   :  { %v4116_v2 = vmax.f32 %v4114_v12, %v4115_v22  ;;  %v4249_v4 = vsel %vm1066_vm13, %v4044_v24, %v4248_v3  ;;  %v4255_v58 = vsel %vm1064_vm12, %v4100_v57, %v4254_v54  ;;  %v4068_v34 = vmax.f32 %v9049_v42, %v4067_v36  ;;  %v6985_v12 = vld [vmem:[%s9842_s14 + $0x1f0] sm:$0xff]   ;;  %v10186_v57 = vld [vmem:[#allocation173_spill] sm:$0xff] }
 0x652   :  { %v4124_v29 = vmax.f32 %v4122_v18, %v4123_v46  ;;  %v4250_v49 = vsel %vm1068_vm14, %v4052_v50, %v4249_v4  ;;  %v4256_v17 = vsel %vm1066_vm13, %v4108_v28, %v4255_v58  ;;  %v4224_v5 = vadd.f32 %v6005_v44, %v10173_v31  ;;  %v6986_v18 = vld [vmem:[%s9842_s14 + $0x1f8] sm:$0xff]   ;;  %v10185_v46 = vld [vmem:[#allocation172_spill] sm:$0xff]  ;;  %v10187_v11 = vld [vmem:[#allocation38_spill] sm:$0xff] }
 0x653   :  { %6706 = vmatpush3.bf16.msra.mxu0 %v6974_v13  ;;  %v4132_v59 = vmax.f32 %v4130_v30, %v4131_v14  ;;  %v4251_v47 = vsel %vm1070_vm15, %v4060_v45, %v4250_v49  ;;  %v4257_v23 = vsel %vm1068_vm14, %v4116_v2, %v4256_v17  ;;  %v4227_v32 = vadd.f32 %v6005_v44, %v10174_v61  ;;  %v6054_v30 = vld [vmem:[%s9911_s12 + $0xc] sm:$0x3]  ;;  %v10188_v3 = vld [vmem:[#allocation34_spill] sm:$0xff]  ;;  %v10189_v58 = vld [vmem:[#allocation36_spill] sm:$0xff] }
 0x654   :  { %6707 = vmatprep.subr.bf16.mxu0 %v10067_v27  ;;  %v4252_v16 = vsel %vm1072_vm1, %v4068_v34, %v4251_v47  ;;  %v4258_v42 = vsel %vm1070_vm15, %v4124_v29, %v4257_v23  ;;  %v6987_v25 = vld [vmem:[%s10180_s3] sm:$0xff]   ;;  %v6988_v20 = vld [vmem:[%s10180_s3 + $0x8] sm:$0xff]   ;;  %v6989_v38 = vld [vmem:[%s10180_s3 + $0x10] sm:$0xff]   ;;  %v10184_v22 = vpack.c.bf16 %v10182_v0, %v10183_v43  ;;  %v4450_v60 = vrot.slane %v6054_v30, 7 }
 0x655   :  { %v4259_v39 = vsel %vm1072_vm1, %v4132_v59, %v4258_v42  ;;  %v9120_v10 = vadd.f32 %v4252_v16, %v4224_v5  ;;  %v6990_v62 = vld [vmem:[%s10180_s3 + $0x18] sm:$0xff]   ;;  %v6991_v36 = vld [vmem:[%s10180_s3 + $0x20] sm:$0xff]   ;;  %v6992_v1 = vld [vmem:[%s10180_s3 + $0x28] sm:$0xff]   ;;  %v4397_v14 = vrot.slane %v6054_v30, %v10186_v57 }
 0x656   :  { %v9123_v21 = vadd.f32 %v4259_v39, %v4227_v32  ;;  %v6993_v51 = vld [vmem:[%s10180_s3 + $0x30] sm:$0xff]   ;;  %v6994_v13 = vld [vmem:[%s10180_s3 + $0x38] sm:$0xff]   ;;  %v4452_v24 = vsub.f32 %v6054_v30, %v4450_v60  ;;  %v10190_v31 = vld [vmem:[#allocation73_spill] sm:$0xff] }
 0x657   :  { %6708 = vmatpush3.bf16.msra.mxu0 %v6975_v15  ;;  %10175 = vst [vmem:[#allocation146_spill] sm:$0xff] %v9120_v10  ;;  %v10191_v59 = vld [vmem:[#allocation72_spill] sm:$0xff]  ;;  %v10192_v23 = vld [vmem:[#allocation87_spill] sm:$0xff]  ;;  %v10194_v42 = vld [vmem:[#allocation49_spill] sm:$0xff] }
 0x658   :  { %6709 = vmatprep.subr.bf16.mxu0 %v10067_v27  ;;  %10176 = vst [vmem:[#allocation140_spill] sm:$0xff] %v9123_v21  ;;  %v4456_v19 = vrot.slane %v4452_v24, %v10185_v46  ;;  %v10193_v32 = vld [vmem:[#allocation99_spill] sm:$0xff]  ;;  %v10207_v43 = vld [vmem:[#allocation130_spill] sm:$0xff] }
 0x659   :  { %v10195_v39 = vld [vmem:[#allocation51_spill] sm:$0xff]  ;;  %v10208_v30 = vld [vmem:[#allocation110_spill] sm:$0xff] }
 0x65a   :  { %v4459_v44 = vmul.f32 %v4456_v19, %v10187_v11  ;;  %v4457_v54 = vmul.f32 %v4456_v19, %v10188_v3  ;;  %v4458_v34 = vmul.f32 %v4456_v19, %v10189_v58  ;;  %v10209_v24 = vld [vmem:[#allocation118_spill] sm:$0xff]  ;;  %v10211_v11 = vld [vmem:[#allocation124_spill] sm:$0xff] }
 0x65b   :  { %6710 = vmatpush3.bf16.msra.mxu0 %v6976_v26  ;;  %v10213_v3 = vld [vmem:[#allocation144_spill] sm:$0xff] }
 0x65c   :  { %6711 = vmatprep.subr.bf16.mxu0 %v10067_v27 }
 0x65f   :  { %v9127_v40 = vpop.f32.mrb[52].mxu1  ;;  %6712 = vmatpush3.bf16.msra.mxu0 %v6977_v55 }
 0x660   :  { %10177 = vst [vmem:[#allocation149_spill] sm:$0xff] %v9127_v40  ;;  %v6697_v37 = vpop.f32.mrb[53].mxu1  ;;  %6713 = vmatprep.subr.bf16.mxu0 %v10067_v27 }
 0x661   :  { %v9131_v6 = vpop.f32.mrb[54].mxu1 }
 0x662   :  { %10178 = vst [vmem:[#allocation156_spill] sm:$0xff] %v9131_v6  ;;  %v6698_v56 = vpop.f32.mrb[55].mxu1 }
 0x663   :  { %6714 = vmatpush3.bf16.msra.mxu0 %v6978_v33  ;;  %v10196_v33 = vld [vmem:[#allocation61_spill] sm:$0xff]  ;;  %v10197_v56 = vld [vmem:[#allocation75_spill] sm:$0xff] }
 0x664   :  { %6725 = vmatprep.subr.bf16.mxu0 %v10067_v27 }
 0x666   :  { %6716 = vmatmul.mubr.bf16.vlgmr.msra.gmra.mrb[44].mxu0 %v10179_v63  ;;  %v10198_v63 = vld [vmem:[#allocation48_spill] sm:$0xff] }
 0x667   :  { %6726 = vmatpush3.bf16.msra.mxu0 %v6979_v9  ;;  %6741 = vmatprep.mubr.msk.bf16.mxu0 %vm7207_vm2, %v10067_v27 }
 0x668   :  { %6727 = vmatprep.subr.bf16.mxu0 %v10067_v27 }
 0x66b   :  { %6728 = vmatpush3.bf16.msra.mxu0 %v6980_v52 }
 0x66c   :  { %6729 = vmatprep.subr.bf16.mxu0 %v10067_v27 }
 0x66f   :  { %6730 = vmatpush3.bf16.msra.mxu0 %v6981_v53  ;;  %v10199_v53 = vld [vmem:[#allocation86_spill] sm:$0xff] }
 0x670   :  { %6731 = vmatprep.subr.bf16.mxu0 %v10067_v27 }
 0x673   :  { %6732 = vmatpush3.bf16.msra.mxu0 %v6982_v41 }
 0x674   :  { %6733 = vmatprep.subr.bf16.mxu0 %v10067_v27 }
 0x677   :  { %6734 = vmatpush3.bf16.msra.mxu0 %v6983_v8  ;;  %v10200_v8 = vld [vmem:[#allocation116_spill] sm:$0xff] }
 0x678   :  { %6735 = vmatprep.subr.bf16.mxu0 %v10067_v27 }
 0x67b   :  { %6736 = vmatpush3.bf16.msra.mxu0 %v6984_v35 }
 0x67c   :  { %6737 = vmatprep.subr.bf16.mxu0 %v10067_v27 }
 0x67f   :  { %6738 = vmatpush3.bf16.msra.mxu0 %v6985_v12  ;;  %v10201_v12 = vld [vmem:[#allocation98_spill] sm:$0xff] }
 0x680   :  { %6739 = vmatprep.subr.bf16.mxu0 %v10067_v27 }
 0x683   :  { %6740 = vmatpush3.bf16.msra.mxu0 %v6986_v18 }
 0x684   :  { %6765 = vmatprep.subr.bf16.mxu0 %v10067_v27 }
 0x686   :  { %6742 = vmatmul.mubr.bf16.vlgmr.msra.gmra.mrb[48].mxu0 %v10181_v48 }
 0x687   :  { %6766 = vmatpush3.bf16.msra.mxu0 %v6987_v25  ;;  %6781 = vmatprep.mubr.msk.bf16.mxu0 %vm7207_vm2, %v10067_v27  ;;  %v10202_v25 = vld [vmem:[#allocation50_spill] sm:$0xff] }
 0x688   :  { %6767 = vmatprep.subr.bf16.mxu0 %v10067_v27 }
 0x68b   :  { %6768 = vmatpush3.bf16.msra.mxu0 %v6988_v20  ;;  %v10203_v20 = vld [vmem:[#allocation60_spill] sm:$0xff] }
 0x68c   :  { %6769 = vmatprep.subr.bf16.mxu0 %v10067_v27 }
 0x68f   :  { %6770 = vmatpush3.bf16.msra.mxu0 %v6989_v38 }
 0x690   :  { %6771 = vmatprep.subr.bf16.mxu0 %v10067_v27 }
 0x693   :  { %6772 = vmatpush3.bf16.msra.mxu0 %v6990_v62  ;;  %v10204_v62 = vld [vmem:[#allocation74_spill] sm:$0xff] }
 0x694   :  { %6773 = vmatprep.subr.bf16.mxu0 %v10067_v27 }
 0x697   :  { %6774 = vmatpush3.bf16.msra.mxu0 %v6991_v36 }
 0x698   :  { %6775 = vmatprep.subr.bf16.mxu0 %v10067_v27 }
 0x69b   :  { %6776 = vmatpush3.bf16.msra.mxu0 %v6992_v1  ;;  %v10205_v1 = vld [vmem:[#allocation89_spill] sm:$0xff] }
 0x69c   :  { %6777 = vmatprep.subr.bf16.mxu0 %v10067_v27 }
 0x69f   :  { %6778 = vmatpush3.bf16.msra.mxu0 %v6993_v51 }
 0x6a0   :  { %6779 = vmatprep.subr.bf16.mxu0 %v10067_v27 }
 0x6a3   :  { %6780 = vmatpush3.bf16.msra.mxu0 %v6994_v13  ;;  %v10206_v13 = vld [vmem:[#allocation101_spill] sm:$0xff] }
 0x6a6   :  { %6782 = vmatmul.mubr.bf16.vlgmr.msra.gmra.mrb[52].mxu0 %v10184_v22 }
 0x719   :  { %v6677_v7 = vpop.f32.mrb[40].mxu0 }
 0x71a   :  { %v4444_v50 = vadd.f32 %v6677_v7, %v4397_v14  ;;  %v4435_v28 = vpop.f32.mrb[41].mxu0 }
 0x71b   :  { %v4436_v15 = vadd.f32 %v4435_v28, %v4397_v14  ;;  %v6678_v45 = vpop.f32.mrb[42].mxu0 }
 0x71c   :  { %v9179_v2 = vadd.f32 %v4459_v44, %v4444_v50  ;;  %v4438_v4 = vpop.f32.mrb[43].mxu0  ;;  %v10212_v50 = vld [vmem:[#allocation132_spill] sm:$0xff] }
 0x71d   :  { %v9182_v29 = vadd.f32 %v4457_v54, %v4436_v15  ;;  %v4439_v49 = vadd.f32 %v4438_v4, %v4397_v14  ;;  %v10210_v14 = vld [vmem:[#allocation139_spill] sm:$0xff]  ;;  %v10214_v15 = vld [vmem:[#allocation53_spill] sm:$0xff]  ;;  %v10215_v4 = vld [vmem:[#allocation52_spill] sm:$0xff] }
 0x71e   :  { %v4465_v5 = vadd.f32 %v9179_v2, %v10190_v31  ;;  %v4468_v47 = vadd.f32 %v9179_v2, %v10191_v59  ;;  %v4471_v61 = vadd.f32 %v9179_v2, %v10192_v23  ;;  %v4474_v16 = vadd.f32 %v9179_v2, %v10193_v32  ;;  %v10217_v31 = vld [vmem:[#allocation55_spill] sm:$0xff]  ;;  %v10218_v23 = vld [vmem:[#allocation54_spill] sm:$0xff] }
 0x71f   :  { %v9184_v17 = vadd.f32 %v4458_v34, %v4439_v49  ;;  %v4463_v26 = vadd.f32 %v9182_v29, %v10194_v42  ;;  %v4466_v55 = vadd.f32 %v9182_v29, %v10195_v39  ;;  %v4469_v37 = vadd.f32 %v9182_v29, %v10196_v33  ;;  %v10216_v34 = vld [vmem:[#allocation77_spill] sm:$0xff]  ;;  %v10219_v42 = vld [vmem:[#allocation76_spill] sm:$0xff]  ;;  %v10220_v33 = vld [vmem:[#allocation63_spill] sm:$0xff] }
 0x720   :  { %v4472_v9 = vadd.f32 %v9182_v29, %v10197_v56  ;;  %v4475_v41 = vadd.f32 %v9182_v29, %v10199_v53  ;;  %v4477_v35 = vadd.f32 %v9179_v2, %v10200_v8  ;;  %v4478_v18 = vadd.f32 %v9182_v29, %v10201_v12  ;;  %v10222_v8 = vld [vmem:[#allocation88_spill] sm:$0xff] }
 0x721   :  { %v4464_v52 = vadd.f32 %v9184_v17, %v10198_v63  ;;  %v4467_v48 = vadd.f32 %v9184_v17, %v10202_v25  ;;  %v4470_v38 = vadd.f32 %v9184_v17, %v10203_v20  ;;  %v4473_v36 = vadd.f32 %v9184_v17, %v10204_v62  ;;  %v10221_v63 = vld [vmem:[#allocation62_spill] sm:$0xff]  ;;  %v10223_v25 = vld [vmem:[#allocation79_spill] sm:$0xff] }
 0x722   :  { %v4476_v51 = vadd.f32 %v9184_v17, %v10205_v1  ;;  %v4479_v0 = vadd.f32 %v9184_v17, %v10206_v13  ;;  %v4480_v22 = vadd.f32 %v9179_v2, %v10207_v43  ;;  %v4481_v60 = vadd.f32 %v9182_v29, %v10208_v30  ;;  %v10224_v62 = vld [vmem:[#allocation78_spill] sm:$0xff]  ;;  %v10225_v13 = vld [vmem:[#allocation100_spill] sm:$0xff]  ;;  %v10226_v30 = vld [vmem:[#allocation91_spill] sm:$0xff] }
 0x723   :  { %v4482_v19 = vadd.f32 %v9184_v17, %v10209_v24  ;;  %v4483_v7 = vadd.f32 %v9179_v2, %v10210_v14  ;;  %v4484_v44 = vadd.f32 %v9182_v29, %v10211_v11  ;;  %v4485_v28 = vadd.f32 %v9184_v17, %v10212_v50  ;;  %v10227_v14 = vld [vmem:[#allocation90_spill] sm:$0xff]  ;;  %v10228_v50 = vld [vmem:[#allocation113_spill] sm:$0xff] }
 0x724   :  { %v4486_v54 = vadd.f32 %v9179_v2, %v10213_v3  ;;  %v9236_v45 = vadd.f32 %v9182_v29, %v10214_v15  ;;  %v9240_v58 = vadd.f32 %v9184_v17, %v10215_v4  ;;  %v9244_v49 = vadd.f32 %v9179_v2, %v10216_v34  ;;  %v10229_v15 = vld [vmem:[#allocation103_spill] sm:$0xff]  ;;  %v10230_v34 = vld [vmem:[#allocation102_spill] sm:$0xff] }
 0x725   :  { %v9248_v59 = vadd.f32 %v9182_v29, %v10217_v31  ;;  %v9252_v32 = vadd.f32 %v9184_v17, %v10218_v23  ;;  %v9256_v39 = vadd.f32 %v9179_v2, %v10219_v42  ;;  %v9260_v56 = vadd.f32 %v9182_v29, %v10220_v33 }
 0x726   :  { %v9264_v53 = vadd.f32 %v9184_v17, %v10221_v63  ;;  %v9268_v12 = vadd.f32 %v9179_v2, %v10222_v8  ;;  %v9272_v20 = vadd.f32 %v9182_v29, %v10223_v25  ;;  %v9276_v1 = vadd.f32 %v9184_v17, %v10224_v62 }
 0x727   :  { %v9280_v43 = vadd.f32 %v9179_v2, %v10225_v13  ;;  %v9284_v24 = vadd.f32 %v9182_v29, %v10226_v30  ;;  %v9288_v11 = vadd.f32 %v9184_v17, %v10227_v14  ;;  %v9292_v3 = vadd.f32 %v9179_v2, %v10228_v50 }
 0x728   :  { %v9296_v4 = vadd.f32 %v9182_v29, %v10229_v15  ;;  %v9300_v31 = vadd.f32 %v9184_v17, %v10230_v34  ;;  %v4511_v23 = vmax.f32 %v4463_v26, %v4464_v52  ;;  %v4519_v42 = vmax.f32 %v4466_v55, %v4467_v48 }
 0x729   :  { %v4527_v33 = vmax.f32 %v4469_v37, %v4470_v38  ;;  %v4535_v63 = vmax.f32 %v4472_v9, %v4473_v36  ;;  %v4543_v8 = vmax.f32 %v4475_v41, %v4476_v51  ;;  %v4551_v25 = vmax.f32 %v4478_v18, %v4479_v0 }
 0x72a   :  { %v4559_v62 = vmax.f32 %v4481_v60, %v4482_v19  ;;  %v4512_v13 = vmax.f32 %v4511_v23, %v4465_v5  ;;  %v4520_v30 = vmax.f32 %v4519_v42, %v4468_v47  ;;  %v4567_v50 = vmax.f32 %v4484_v44, %v4485_v28  ;;  %v10232_v28 = vld [vmem:[#allocation120_spill] sm:$0xff] }
 0x72b   :  { %v4528_v14 = vmax.f32 %v4527_v33, %v4471_v61  ;;  %v4536_v57 = vmax.f32 %v4535_v63, %v4474_v16  ;;  %v4544_v46 = vmax.f32 %v4543_v8, %v4477_v35  ;;  %v4552_v21 = vmax.f32 %v4551_v25, %v4480_v22  ;;  %v10233_v33 = vld [vmem:[#allocation115_spill] sm:$0xff]  ;;  %v10234_v8 = vld [vmem:[#allocation133_spill] sm:$0xff] }
 0x72c   :  { %v4560_v15 = vmax.f32 %v4559_v62, %v4483_v7  ;;  %v4513_v10 = vrot.slane %v4512_v13, 4  ;;  %v4521_v6 = vrot.slane %v4520_v30, 4  ;;  %v4568_v34 = vmax.f32 %v4567_v50, %v4486_v54  ;;  %v10235_v62 = vld [vmem:[#allocation134_spill] sm:$0xff]  ;;  %v10237_v50 = vld [vmem:[#allocation137_spill] sm:$0xff] }
 0x72d   :  { %v4529_v40 = vrot.slane %v4528_v14, 4  ;;  %v4537_v27 = vrot.slane %v4536_v57, 4  ;;  %v4545_v26 = vrot.slane %v4544_v46, 4  ;;  %v4553_v55 = vrot.slane %v4552_v21, 4 }
 0x72e   :  { %v4561_v37 = vrot.slane %v4560_v15, 4  ;;  %v4514_v9 = vmax.f32 %v4512_v13, %v4513_v10  ;;  %v4522_v52 = vmax.f32 %v4520_v30, %v4521_v6  ;;  %v4569_v18 = vrot.slane %v4568_v34, 4  ;;  %v10236_v30 = vld [vmem:[#allocation129_spill] sm:$0xff] }
 0x72f   :  { %v4530_v41 = vmax.f32 %v4528_v14, %v4529_v40  ;;  %v4538_v5 = vmax.f32 %v4536_v57, %v4537_v27  ;;  %v4546_v47 = vmax.f32 %v4544_v46, %v4545_v26  ;;  %v4554_v61 = vmax.f32 %v4552_v21, %v4553_v55  ;;  %v10231_v46 = vld [vmem:[#allocation127_spill] sm:$0xff] }
 0x730   :  { %v4562_v48 = vmax.f32 %v4560_v15, %v4561_v37  ;;  %v4515_v16 = vrot.slane %v4514_v9, 2  ;;  %v4523_v35 = vrot.slane %v4522_v52, 2  ;;  %v4570_v36 = vmax.f32 %v4568_v34, %v4569_v18 }
 0x731   :  { %v4531_v38 = vrot.slane %v4530_v41, 2  ;;  %v4539_v51 = vrot.slane %v4538_v5, 2  ;;  %v4547_v0 = vrot.slane %v4546_v47, 2  ;;  %v4555_v22 = vrot.slane %v4554_v61, 2 }
 0x732   :  { %v4563_v60 = vrot.slane %v4562_v48, 2  ;;  %v4516_v19 = vmax.f32 %v4514_v9, %v4515_v16  ;;  %v4524_v7 = vmax.f32 %v4522_v52, %v4523_v35  ;;  %v4571_v10 = vrot.slane %v4570_v36, 2 }
 0x733   :  { %v9302_v44 = vmax.f32 %v4530_v41, %v4531_v38  ;;  %v9304_v6 = vmax.f32 %v4538_v5, %v4539_v51  ;;  %v9306_v40 = vmax.f32 %v4546_v47, %v4547_v0  ;;  %v9308_v27 = vmax.f32 %v4554_v61, %v4555_v22  ;;  %v6995_v51 = vld [vmem:[%s10180_s3] sm:$0xff]  }
 0x734   :  { %v9310_v21 = vmax.f32 %v4562_v48, %v4563_v60  ;;  %v4504_v57 = vadd.f32 %v9179_v2, %v10231_v46  ;;  %v4505_v54 = vadd.f32 %v9182_v29, %v10232_v28  ;;  %v4517_v23 = vrot.slane %v4516_v19, 1  ;;  %v10239_v28 = vld [vmem:[#allocation142_spill] sm:$0xff] }
 0x735   :  { %v4525_v42 = vrot.slane %v4524_v7, 1  ;;  %v4506_v63 = vadd.f32 %v9184_v17, %v10233_v33  ;;  %v4507_v25 = vadd.f32 %v9179_v2, %v10234_v8  ;;  %v4508_v13 = vadd.f32 %v9182_v29, %v10235_v62 }
 0x736   :  { %v4509_v14 = vadd.f32 %v9184_v17, %v10236_v30  ;;  %v4510_v15 = vadd.f32 %v9179_v2, %v10237_v50  ;;  %v4533_v34 = vrot.slane %v9302_v44, 1  ;;  %v4541_v26 = vrot.slane %v9304_v6, 1 }
 0x737   :  { %v9328_v55 = vmax.f32 %v4570_v36, %v4571_v10  ;;  %v9330_v9 = vmax.f32 %v4516_v19, %v4517_v23  ;;  %v4549_v52 = vrot.slane %v9306_v40, 1  ;;  %v4557_v41 = vrot.slane %v9308_v27, 1 }
 0x738   :  { %v4565_v29 = vrot.slane %v9310_v21, 1  ;;  %v9335_v17 = vmax.f32 %v4524_v7, %v4525_v42  ;;  %v4575_v2 = vmax.f32 %v9236_v45, %v9240_v58  ;;  %v4583_v5 = vmax.f32 %v9248_v59, %v9252_v32 }
 0x739   :  { %v4890_v37 = vpop.f32.mrb[44].mxu0  ;;  %v4591_v47 = vmax.f32 %v9260_v56, %v9264_v53  ;;  %v4599_v48 = vmax.f32 %v9272_v20, %v9276_v1  ;;  %v4607_v16 = vmax.f32 %v9284_v24, %v9288_v11  ;;  %v4615_v35 = vmax.f32 %v9296_v4, %v9300_v31 }
 0x73a   :  { %v6717_v18 = vpop.f32.mrb[45].mxu0  ;;  %v4623_v38 = vmax.f32 %v4505_v54, %v4506_v63  ;;  %v4576_v58 = vmax.f32 %v4575_v2, %v9244_v49  ;;  %v4584_v59 = vmax.f32 %v4583_v5, %v9256_v39  ;;  %v4631_v19 = vmax.f32 %v4508_v13, %v4509_v14  ;;  %v6996_v63 = vld [vmem:[%s10180_s3 + $0x8] sm:$0xff]  }
 0x73b   :  { %v4893_v61 = vpop.f32.mrb[46].mxu0  ;;  %v4592_v32 = vmax.f32 %v4591_v47, %v9268_v12  ;;  %v4600_v56 = vmax.f32 %v4599_v48, %v9280_v43  ;;  %v4608_v53 = vmax.f32 %v4607_v16, %v9292_v3  ;;  %v4616_v20 = vmax.f32 %v4615_v35, %v4504_v57  ;;  %v6997_v35 = vld [vmem:[%s10180_s3 + $0x10] sm:$0xff]  }
 0x73c   :  { %v4899_v36 = vpack.c.bf16 %v4893_v61, %v4890_v37  ;;  %v6718_v45 = vpop.f32.mrb[47].mxu0  ;;  %v4624_v1 = vmax.f32 %v4623_v38, %v4507_v25  ;;  %v4577_v11 = vrot.slane %v4576_v58, 4  ;;  %v4585_v4 = vrot.slane %v4584_v59, 4 }
 0x73d   :  { %v4593_v31 = vrot.slane %v4592_v32, 4  ;;  %v4601_v49 = vrot.slane %v4600_v56, 4  ;;  %v4609_v0 = vrot.slane %v4608_v53, 4  ;;  %v4617_v39 = vrot.slane %v4616_v20, 4 }
 0x73e   :  { %v4905_v24 = vsel %vm1227_vm8, %v4899_v36, 0  ;;  %6810 = vmatprep.subr.msk.bf16.mxu1 %vm1227_vm8, %v4899_v36  ;;  %v4625_v22 = vrot.slane %v4624_v1, 4  ;;  %v10238_v12 = vmov 0.0   ;;  %v4578_v43 = vmax.f32 %v4576_v58, %v4577_v11 }
 0x73f   :  { %6720 = vmatpush3.bf16.msra.mxu1 %v4905_v24  ;;  %v4586_v3 = vmax.f32 %v4584_v59, %v4585_v4  ;;  %v4594_v60 = vmax.f32 %v4592_v32, %v4593_v31  ;;  %v4602_v7 = vmax.f32 %v4600_v56, %v4601_v49  ;;  %v4610_v10 = vmax.f32 %v4608_v53, %v4609_v0  ;;  %v6058_v49 = vld [vmem:[%s9932_s27 + $0x6] ss:$0 sm:$0xff] }
 0x740   :  { %6745 = vmatprep.subr.bf16.mxu1 %v10238_v12  ;;  %v4618_v46 = vmax.f32 %v4616_v20, %v4617_v39  ;;  %v4626_v57 = vmax.f32 %v4624_v1, %v4625_v22  ;;  %v4579_v54 = vrot.slane %v4578_v43, 2  ;;  %v4632_v33 = vmax.f32 %v4631_v19, %v4510_v15 }
 0x741   :  { %v4587_v23 = vrot.slane %v4586_v3, 2  ;;  %v4595_v42 = vrot.slane %v4594_v60, 2  ;;  %v4603_v8 = vrot.slane %v4602_v7, 2  ;;  %v4611_v25 = vrot.slane %v4610_v10, 2 }
 0x742   :  { %6722 = vmatmul.mubr.msk.bf16.vlgmr.msra.gmra.mrb[56].mxu1 %vm1220_vm9, %v10239_v28  ;;  %v4619_v62 = vrot.slane %v4618_v46, 2  ;;  %v4627_v13 = vrot.slane %v4626_v57, 2  ;;  %v4580_v30 = vmax.f32 %v4578_v43, %v4579_v54  ;;  %v4633_v37 = vrot.slane %v4632_v33, 4  ;;  %v6999_v54 = vld [vmem:[%s10180_s3 + $0x20] sm:$0xff]  }
 0x743   :  { %6746 = vmatpush3.bf16.msra.mxu1 %v6995_v51  ;;  %6761 = vmatprep.mubr.msk.bf16.mxu1 %vm7207_vm2, %v10238_v12  ;;  %v4588_v14 = vmax.f32 %v4586_v3, %v4587_v23  ;;  %v4596_v50 = vmax.f32 %v4594_v60, %v4595_v42  ;;  %v4604_v18 = vmax.f32 %v4602_v7, %v4603_v8  ;;  %v6998_v51 = vld [vmem:[%s10180_s3 + $0x18] sm:$0xff]   ;;  %v10242_v8 = vld [vmem:[#allocation146_spill] sm:$0xff] }
 0x744   :  { %6747 = vmatprep.subr.bf16.mxu1 %v10238_v12  ;;  %v4612_v2 = vmax.f32 %v4610_v10, %v4611_v25  ;;  %v4620_v5 = vmax.f32 %v4618_v46, %v4619_v62  ;;  %v4628_v15 = vmax.f32 %v4626_v57, %v4627_v13  ;;  %v4581_v47 = vrot.slane %v4580_v30, 1  ;;  %v10240_v10 = vld [vmem:[#allocation149_spill] sm:$0xff]  ;;  %v10241_v57 = vld [vmem:[#allocation156_spill] sm:$0xff] }
 0x745   :  { %v4589_v61 = vrot.slane %v4588_v14, 1  ;;  %v4597_v48 = vrot.slane %v4596_v50, 1  ;;  %v4634_v16 = vmax.f32 %v4632_v33, %v4633_v37  ;;  %v4534_v38 = vmax.f32 %v9302_v44, %v4533_v34  ;;  %v10243_v62 = vld [vmem:[#allocation140_spill] sm:$0xff] }
 0x746   :  { %v4605_v36 = vrot.slane %v4604_v18, 1  ;;  %v4613_v45 = vrot.slane %v4612_v2, 1  ;;  %v4621_v58 = vrot.slane %v4620_v5, 1  ;;  %v4582_v59 = vmax.f32 %v4580_v30, %v4581_v47 }
 0x747   :  { %6748 = vmatpush3.bf16.msra.mxu1 %v6996_v63  ;;  %v4590_v32 = vmax.f32 %v4588_v14, %v4589_v61  ;;  %v4598_v56 = vmax.f32 %v4596_v50, %v4597_v48  ;;  %v4635_v53 = vrot.slane %v4634_v16, 2  ;;  %v4542_v20 = vmax.f32 %v9304_v6, %v4541_v26  ;;  %v7000_v63 = vld [vmem:[%s10180_s3 + $0x28] sm:$0xff]  }
 0x748   :  { %6749 = vmatprep.subr.bf16.mxu1 %v10238_v12  ;;  %v4550_v1 = vmax.f32 %v9306_v40, %v4549_v52  ;;  %v4573_v44 = vrot.slane %v9328_v55, 1  ;;  %v4629_v34 = vrot.slane %v4628_v15, 1  ;;  %v4606_v24 = vmax.f32 %v4604_v18, %v4605_v36  ;;  %v7001_v18 = vld [vmem:[%s10180_s3 + $0x30] sm:$0xff]  }
 0x749   :  { %v4636_v11 = vmax.f32 %v4634_v16, %v4635_v53  ;;  %v4752_v4 = vsel %vm1060_vm10, %v9335_v17, %v9330_v9  ;;  %v4759_v31 = vsel %vm1060_vm10, %v4590_v32, %v4582_v59  ;;  %v4558_v6 = vmax.f32 %v9308_v27, %v4557_v41  ;;  %v7002_v16 = vld [vmem:[%s10180_s3 + $0x38] sm:$0xff]   ;;  %v9428_v53 = vld [vmem:[%s10245_s22] ss:$0 sm:$0xff] }
 0x74a   :  { %v4614_v26 = vmax.f32 %v4612_v2, %v4613_v45  ;;  %v4753_v40 = vsel %vm1062_vm11, %v4534_v38, %v4752_v4  ;;  %v4760_v52 = vsel %vm1062_vm11, %v4598_v56, %v4759_v31  ;;  %v4622_v0 = vmax.f32 %v4620_v5, %v4621_v58  ;;  %v9420_v38 = vld [vmem:[%s10244_s4] ss:$0 sm:$0xff]  ;;  %v7008_v31 = vld [vmem:[%s10180_s3 + $0x28] sm:$0xff]  }
 0x74b   :  { %6750 = vmatpush3.bf16.msra.mxu1 %v6997_v35  ;;  %v4637_v39 = vrot.slane %v4636_v11, 1  ;;  %v4754_v9 = vsel %vm1064_vm12, %v4542_v20, %v4753_v40  ;;  %v4761_v17 = vsel %vm1064_vm12, %v4606_v24, %v4760_v52  ;;  %v4566_v22 = vmax.f32 %v9310_v21, %v4565_v29  ;;  %v7005_v24 = vld [vmem:[%s10180_s3 + $0x10] sm:$0xff]   ;;  %v7007_v4 = vld [vmem:[%s10180_s3 + $0x20] sm:$0xff]  }
 0x74c   :  { %6751 = vmatprep.subr.bf16.mxu1 %v10238_v12  ;;  %v4630_v27 = vmax.f32 %v4628_v15, %v4629_v34  ;;  %v4755_v41 = vsel %vm1066_vm13, %v4550_v1, %v4754_v9  ;;  %v4762_v43 = vsel %vm1066_vm13, %v4614_v26, %v4761_v17  ;;  %v4574_v3 = vmax.f32 %v9328_v55, %v4573_v44  ;;  %v7003_v44 = vld [vmem:[%s10180_s3] sm:$0xff]   ;;  %v7004_v34 = vld [vmem:[%s10180_s3 + $0x8] sm:$0xff]  }
 0x74d   :  { %v4638_v60 = vmax.f32 %v4636_v11, %v4637_v39  ;;  %v4756_v19 = vsel %vm1068_vm14, %v4558_v6, %v4755_v41  ;;  %v4763_v7 = vsel %vm1068_vm14, %v4622_v0, %v4762_v43  ;;  %v4730_v46 = vadd.f32 %v6058_v49, %v10240_v10  ;;  %v7006_v11 = vld [vmem:[%s10180_s3 + $0x18] sm:$0xff]   ;;  %v6107_v26 = vld [vmem:[%s9911_s12 + $0xe] sm:$0x3] }
 0x74e   :  { %v4733_v28 = vadd.f32 %v6058_v49, %v10241_v57  ;;  %v4757_v21 = vsel %vm1070_vm15, %v4566_v22, %v4756_v19  ;;  %v4764_v29 = vsel %vm1070_vm15, %v4630_v27, %v4763_v7  ;;  %v4264_v25 = vmax.f32 %v10242_v8, 0.0  ;;  %v7010_v6 = vld [vmem:[%s10180_s3 + $0x38] sm:$0xff]   ;;  %v10246_v49 = vld [vmem:[#allocation172_spill] sm:$0xff]  ;;  %v10247_v39 = vld [vmem:[#allocation173_spill] sm:$0xff] }
 0x74f   :  { %6752 = vmatpush3.bf16.msra.mxu1 %v6998_v51  ;;  %v4758_v55 = vsel %vm1072_vm1, %v4574_v3, %v4757_v21  ;;  %v4765_v23 = vsel %vm1072_vm1, %v4638_v60, %v4764_v29  ;;  %v4265_v13 = vmax.f32 %v10243_v62, 0.0  ;;  %v7009_v51 = vld [vmem:[%s10180_s3 + $0x30] sm:$0xff]   ;;  %v4956_v40 = vrot.slane %v6107_v26, 7  ;;  %v10248_v22 = vld [vmem:[#allocation189_spill] sm:$0xff]  ;;  %v10249_v3 = vld [vmem:[#allocation187_spill] sm:$0xff] }
 0x750   :  { %6753 = vmatprep.subr.bf16.mxu1 %v10238_v12  ;;  %v4768_v42 = vadd.f32 %v4758_v55, %v4730_v46  ;;  %v4769_v33 = vadd.f32 %v4765_v23, %v4733_v28  ;;  %v4903_v9 = vrot.slane %v6107_v26, %v10247_v39  ;;  %v10251_v21 = vld [vmem:[#allocation195_spill] sm:$0xff]  ;;  %v10252_v55 = vld [vmem:[#allocation196_spill] sm:$0xff] }
 0x751   :  { %v4958_v52 = vsub.f32 %v6107_v26, %v4956_v40  ;;  %v10269_v26 = vld [vmem:[#allocation206_spill] sm:$0xff] }
 0x752   :  { %v4770_v30 = vmax.f32 %v4768_v42, 0.0  ;;  %v4771_v14 = vmax.f32 %v4769_v33, 0.0  ;;  %v10253_v42 = vld [vmem:[#allocation199_spill] sm:$0xff] }
 0x753   :  { %6754 = vmatpush3.bf16.msra.mxu1 %v6999_v54  ;;  %v4962_v0 = vrot.slane %v4958_v52, %v10246_v49  ;;  %v10270_v52 = vld [vmem:[#allocation207_spill] sm:$0xff] }
 0x754   :  { %6755 = vmatprep.subr.bf16.mxu1 %v10238_v12  ;;  %v4772_v50 = vadd.f32 %v4770_v30, %v4264_v25  ;;  %v4773_v37 = vadd.f32 %v4771_v14, %v4265_v13  ;;  %v10255_v25 = vld [vmem:[#allocation190_spill] sm:$0xff]  ;;  %v10256_v13 = vld [vmem:[#allocation175_spill] sm:$0xff]  ;;  %v10257_v14 = vld [vmem:[#allocation193_spill] sm:$0xff] }
 0x755   :  { %v4965_v27 = vmul.f32 %v4962_v0, %v10248_v22  ;;  %v4963_v60 = vmul.f32 %v4962_v0, %v10249_v3  ;;  %v10273_v22 = vld [vmem:[#allocation210_spill] sm:$0xff] }
 0x756   :  { %v5172_v2 = vmax.f32 %v4772_v50, 0.0  ;;  %v5173_v5 = vmax.f32 %v4773_v37, 0.0 }
 0x757   :  { %6756 = vmatpush3.bf16.msra.mxu1 %v7000_v63  ;;  %v10254_v63 = vld [vmem:[#allocation202_spill] sm:$0xff] }
 0x758   :  { %6757 = vmatprep.subr.bf16.mxu1 %v10238_v12  ;;  %v5193_v47 = vpack.c.bf16 %v5173_v5, %v5172_v2  ;;  %v10259_v5 = vld [vmem:[#allocation200_spill] sm:$0xff] }
 0x759   :  { %v9412_v15 = vpop.f32.mrb[48].mxu0 }
 0x75a   :  { %v6743_v61 = vpop.f32.mrb[49].mxu0 }
 0x75b   :  { %v5150_v48 = vpop.f32.mrb[50].mxu0  ;;  %6758 = vmatpush3.bf16.msra.mxu1 %v7001_v18  ;;  %v10258_v18 = vld [vmem:[#allocation197_spill] sm:$0xff] }
 0x75c   :  { %v6744_v35 = vpop.f32.mrb[51].mxu0  ;;  %6759 = vmatprep.subr.bf16.mxu1 %v10238_v12  ;;  %v10260_v61 = vld [vmem:[#allocation205_spill] sm:$0xff] }
 0x75f   :  { %6760 = vmatpush3.bf16.msra.mxu1 %v7002_v16  ;;  %v10261_v16 = vld [vmem:[#allocation203_spill] sm:$0xff] }
 0x760   :  { %6785 = vmatprep.subr.bf16.mxu1 %v10238_v12 }
 0x762   :  { %6762 = vmatmul.mubr.bf16.vlgmr.msra.gmra.mrb[60].mxu1 %v5193_v47 }
 0x763   :  { %6801 = vmatprep.mubr.msk.bf16.mxu1 %vm7207_vm2, %v10238_v12  ;;  %6786 = vmatpush3.bf16.msra.mxu1 %v7003_v44  ;;  %v10265_v44 = vld [vmem:[#allocation198_spill] sm:$0xff] }
 0x764   :  { %6787 = vmatprep.subr.bf16.mxu1 %v10238_v12 }
 0x767   :  { %6788 = vmatpush3.bf16.msra.mxu1 %v7004_v34 }
 0x768   :  { %6789 = vmatprep.subr.bf16.mxu1 %v10238_v12 }
 0x76b   :  { %6790 = vmatpush3.bf16.msra.mxu1 %v7005_v24  ;;  %v10266_v24 = vld [vmem:[#allocation201_spill] sm:$0xff] }
 0x76c   :  { %6791 = vmatprep.subr.bf16.mxu1 %v10238_v12 }
 0x76f   :  { %6792 = vmatpush3.bf16.msra.mxu1 %v7006_v11 }
 0x770   :  { %6793 = vmatprep.subr.bf16.mxu1 %v10238_v12 }
 0x773   :  { %6794 = vmatpush3.bf16.msra.mxu1 %v7007_v4  ;;  %v10267_v4 = vld [vmem:[#allocation204_spill] sm:$0xff] }
 0x774   :  { %6795 = vmatprep.subr.bf16.mxu1 %v10238_v12 }
 0x777   :  { %6796 = vmatpush3.bf16.msra.mxu1 %v7008_v31 }
 0x778   :  { %6797 = vmatprep.subr.bf16.mxu1 %v10238_v12 }
 0x779   :  { %v5427_v36 = vpop.f32.mrb[52].mxu0 }
 0x77a   :  { %v9423_v45 = vadd.f32 %v9420_v38, %v5427_v36  ;;  %v6783_v58 = vpop.f32.mrb[53].mxu0  ;;  %v10262_v36 = vld [vmem:[#allocation191_spill] sm:$0xff] }
 0x77b   :  { %v5430_v59 = vpop.f32.mrb[54].mxu0  ;;  %6798 = vmatpush3.bf16.msra.mxu1 %v7009_v51  ;;  %v10268_v51 = vld [vmem:[#allocation208_spill] sm:$0xff] }
 0x77c   :  { %5434 = vst [vmem:[#allocation4] sm:$0xff] %v9423_v45  ;;  %v5431_v32 = vadd.f32 %v9420_v38, %v5430_v59  ;;  %v6784_v56 = vpop.f32.mrb[55].mxu0  ;;  %6799 = vmatprep.subr.bf16.mxu1 %v10238_v12  ;;  %v10250_v12 = vld [vmem:[#allocation188_spill] sm:$0xff] }
 0x77d   :  { %v4964_v57 = vmul.f32 %v4962_v0, %v10250_v12  ;;  %v10263_v59 = vld [vmem:[#allocation192_spill] sm:$0xff]  ;;  %v10264_v56 = vld [vmem:[#allocation194_spill] sm:$0xff]  ;;  %v10271_v0 = vld [vmem:[#allocation211_spill] sm:$0xff] }
 0x77e   :  { %5435 = vst [vmem:[#allocation4 + $0x8] sm:$0xf] %v5431_v32  ;;  %v9431_v20 = vadd.f32 %v9428_v53, %v5431_v32 }
 0x77f   :  { %6800 = vmatpush3.bf16.msra.mxu1 %v7010_v6 }
 0x780   :  { %v5447_v1 = vsel %vm157_vm0, %v9431_v20, -inf }
 0x781   :  { %5448 = vmax.xlane.f32.xlu0 %v5447_v1 }
 0x815   :  { %v6723_v17 = vpop.f32.mrb[56].mxu1 }
 0x816   :  { %v4950_v41 = vadd.f32 %v6723_v17, %v4903_v9  ;;  %v4941_v43 = vpop.f32.mrb[57].mxu1 }
 0x817   :  { %v4942_v19 = vadd.f32 %v4941_v43, %v4903_v9  ;;  %v6724_v7 = vpop.f32.mrb[58].mxu1 }
 0x818   :  { %v4968_v10 = vadd.f32 %v4965_v27, %v4950_v41  ;;  %v4944_v46 = vpop.f32.mrb[59].mxu1  ;;  %v10274_v41 = vld [vmem:[#allocation212_spill] sm:$0xff] }
 0x819   :  { %v4966_v28 = vadd.f32 %v4963_v60, %v4942_v19  ;;  %v4945_v54 = vadd.f32 %v4944_v46, %v4903_v9  ;;  %v10272_v9 = vld [vmem:[#allocation209_spill] sm:$0xff] }
 0x81a   :  { %v4971_v29 = vadd.f32 %v4968_v10, %v10251_v21  ;;  %v4974_v23 = vadd.f32 %v4968_v10, %v10252_v55  ;;  %v4977_v33 = vadd.f32 %v4968_v10, %v10253_v42  ;;  %v4980_v8 = vadd.f32 %v4968_v10, %v10254_v63 }
 0x81b   :  { %v4969_v62 = vadd.f32 %v4966_v28, %v10255_v25  ;;  %v4972_v30 = vadd.f32 %v4966_v28, %v10256_v13  ;;  %v4975_v50 = vadd.f32 %v4966_v28, %v10257_v14  ;;  %v4967_v37 = vadd.f32 %v4964_v57, %v4945_v54 }
 0x81c   :  { %v4978_v2 = vadd.f32 %v4966_v28, %v10258_v18  ;;  %v4981_v47 = vadd.f32 %v4966_v28, %v10259_v5  ;;  %v4983_v48 = vadd.f32 %v4968_v10, %v10260_v61  ;;  %v4984_v35 = vadd.f32 %v4966_v28, %v10261_v16 }
 0x81d   :  { %v4970_v58 = vadd.f32 %v4967_v37, %v10262_v36  ;;  %v4973_v32 = vadd.f32 %v4967_v37, %v10263_v59  ;;  %v4976_v1 = vadd.f32 %v4967_v37, %v10264_v56  ;;  %v4979_v34 = vadd.f32 %v4967_v37, %v10265_v44 }
 0x81e   :  { %v4982_v11 = vadd.f32 %v4967_v37, %v10266_v24  ;;  %v4985_v31 = vadd.f32 %v4967_v37, %v10267_v4  ;;  %v4986_v6 = vadd.f32 %v4968_v10, %v10268_v51  ;;  %v4987_v40 = vadd.f32 %v4966_v28, %v10269_v26 }
 0x81f   :  { %v4988_v49 = vadd.f32 %v4967_v37, %v10270_v52  ;;  %v4989_v39 = vadd.f32 %v4968_v10, %v10271_v0  ;;  %v4990_v17 = vadd.f32 %v4966_v28, %v10272_v9  ;;  %v4991_v27 = vadd.f32 %v4967_v37, %v10273_v22 }
 0x820   :  { %v4992_v43 = vadd.f32 %v4968_v10, %v10274_v41  ;;  %v4993_v3 = vmax.f32 %v4969_v62, %v4970_v58  ;;  %v5001_v60 = vmax.f32 %v4972_v30, %v4973_v32  ;;  %v5009_v19 = vmax.f32 %v4975_v50, %v4976_v1 }
 0x821   :  { %v5017_v7 = vmax.f32 %v4978_v2, %v4979_v34  ;;  %v5025_v46 = vmax.f32 %v4981_v47, %v4982_v11  ;;  %v5033_v12 = vmax.f32 %v4984_v35, %v4985_v31  ;;  %v5041_v57 = vmax.f32 %v4987_v40, %v4988_v49 }
 0x822   :  { %v4994_v54 = vmax.f32 %v4993_v3, %v4971_v29  ;;  %v5002_v21 = vmax.f32 %v5001_v60, %v4974_v23  ;;  %v5010_v55 = vmax.f32 %v5009_v19, %v4977_v33  ;;  %v5049_v42 = vmax.f32 %v4990_v17, %v4991_v27 }
 0x823   :  { %v5018_v63 = vmax.f32 %v5017_v7, %v4980_v8  ;;  %v5026_v25 = vmax.f32 %v5025_v46, %v4983_v48  ;;  %v5034_v13 = vmax.f32 %v5033_v12, %v4986_v6  ;;  %v5042_v14 = vmax.f32 %v5041_v57, %v4989_v39  ;;  %v6111_v46 = vld [vmem:[%s9932_s27 + $0x7] ss:$0 sm:$0xff] }
 0x824   :  { %v4995_v28 = vrot.slane %v4994_v54, 4  ;;  %v5003_v18 = vrot.slane %v5002_v21, 4  ;;  %v5011_v37 = vrot.slane %v5010_v55, 4  ;;  %v5050_v5 = vmax.f32 %v5049_v42, %v4992_v43 }
 0x825   :  { %v5019_v10 = vrot.slane %v5018_v63, 4  ;;  %v5027_v62 = vrot.slane %v5026_v25, 4  ;;  %v5035_v30 = vrot.slane %v5034_v13, 4  ;;  %v5043_v50 = vrot.slane %v5042_v14, 4 }
 0x826   :  { %v4996_v2 = vmax.f32 %v4994_v54, %v4995_v28  ;;  %v5004_v47 = vmax.f32 %v5002_v21, %v5003_v18  ;;  %v5012_v61 = vmax.f32 %v5010_v55, %v5011_v37  ;;  %v5051_v16 = vrot.slane %v5050_v5, 4 }
 0x827   :  { %v5020_v29 = vmax.f32 %v5018_v63, %v5019_v10  ;;  %v5028_v23 = vmax.f32 %v5026_v25, %v5027_v62  ;;  %v5036_v33 = vmax.f32 %v5034_v13, %v5035_v30  ;;  %v5044_v35 = vmax.f32 %v5042_v14, %v5043_v50 }
 0x828   :  { %v4997_v8 = vrot.slane %v4996_v2, 2  ;;  %v5005_v48 = vrot.slane %v5004_v47, 2  ;;  %v5013_v36 = vrot.slane %v5012_v61, 2  ;;  %v5052_v58 = vmax.f32 %v5050_v5, %v5051_v16  ;;  %v5449_v16 = vpop.xlane.xlu0 %5448 }
 0x829   :  { %v5021_v59 = vrot.slane %v5020_v29, 2  ;;  %v5029_v32 = vrot.slane %v5028_v23, 2  ;;  %v5037_v56 = vrot.slane %v5036_v33, 2  ;;  %v5045_v1 = vrot.slane %v5044_v35, 2 }
 0x82a   :  { %v4998_v44 = vmax.f32 %v4996_v2, %v4997_v8  ;;  %v5006_v34 = vmax.f32 %v5004_v47, %v5005_v48  ;;  %v5014_v24 = vmax.f32 %v5012_v61, %v5013_v36  ;;  %v5053_v11 = vrot.slane %v5052_v58, 2 }
 0x82b   :  { %v5022_v4 = vmax.f32 %v5020_v29, %v5021_v59  ;;  %v5030_v31 = vmax.f32 %v5028_v23, %v5029_v32  ;;  %v5038_v51 = vmax.f32 %v5036_v33, %v5037_v56  ;;  %v5046_v6 = vmax.f32 %v5044_v35, %v5045_v1 }
 0x82c   :  { %v4999_v26 = vrot.slane %v4998_v44, 1  ;;  %v5007_v40 = vrot.slane %v5006_v34, 1  ;;  %v5015_v52 = vrot.slane %v5014_v24, 1  ;;  %v5054_v49 = vmax.f32 %v5052_v58, %v5053_v11 }
 0x82d   :  { %v5023_v0 = vrot.slane %v5022_v4, 1  ;;  %v5031_v39 = vrot.slane %v5030_v31, 1  ;;  %v5039_v27 = vrot.slane %v5038_v51, 1  ;;  %v5047_v41 = vrot.slane %v5046_v6, 1 }
 0x82e   :  { %v5000_v9 = vmax.f32 %v4998_v44, %v4999_v26  ;;  %v5008_v17 = vmax.f32 %v5006_v34, %v5007_v40  ;;  %v5016_v22 = vmax.f32 %v5014_v24, %v5015_v52  ;;  %v5055_v3 = vrot.slane %v5054_v49, 1 }
 0x82f   :  { %v5024_v43 = vmax.f32 %v5022_v4, %v5023_v0  ;;  %v5032_v19 = vmax.f32 %v5030_v31, %v5031_v39  ;;  %v5040_v12 = vmax.f32 %v5038_v51, %v5039_v27  ;;  %v5048_v54 = vmax.f32 %v5046_v6, %v5047_v41 }
 0x830   :  { %v5161_v60 = vsel %vm1060_vm10, %v5008_v17, %v5000_v9  ;;  %v5056_v55 = vmax.f32 %v5054_v49, %v5055_v3  ;;  %v5148_v63 = vadd.f32 %v6111_v46, %v9412_v15  ;;  %v5443_v47 = vadd.f32 %v9428_v53, %v9423_v45 }
 0x831   :  { %v5162_v7 = vsel %vm1062_vm11, %v5016_v22, %v5161_v60  ;;  %v5451_v45 = vsub.f32 %v9431_v20, %v5449_v16 }
 0x832   :  { %v5163_v57 = vsel %vm1064_vm12, %v5024_v43, %v5162_v7 }
 0x833   :  { %v5164_v21 = vsel %vm1066_vm13, %v5032_v19, %v5163_v57  ;;  %v5454_v1 = vmul.f32 1.442695, %v5451_v45 }
 0x834   :  { %v5165_v42 = vsel %vm1068_vm14, %v5040_v12, %v5164_v21 }
 0x835   :  { %v5283_v25 = vpop.f32.mrb[60].mxu1  ;;  %v5166_v13 = vsel %vm1070_vm15, %v5048_v54, %v5165_v42 }
 0x836   :  { %v5284_v14 = vadd.f32 %v9420_v38, %v5283_v25  ;;  %v6763_v28 = vpop.f32.mrb[61].mxu1  ;;  %v5167_v18 = vsel %vm1072_vm1, %v5056_v55, %v5166_v13 }
 0x837   :  { %v5286_v37 = vpop.f32.mrb[62].mxu1  ;;  %v5169_v5 = vadd.f32 %v5167_v18, %v5148_v63 }
 0x838   :  { %5290 = vst [vmem:[#allocation2] sm:$0xff] %v5284_v14  ;;  %v5299_v10 = vadd.f32 %v9428_v53, %v5284_v14  ;;  %v5287_v62 = vadd.f32 %v9420_v38, %v5286_v37  ;;  %v6764_v30 = vpop.f32.mrb[63].mxu1 }
 0x839   :  { %v5170_v50 = vmax.f32 %v5169_v5, 0.0 }
 0x83a   :  { %5291 = vst [vmem:[#allocation2 + $0x8] sm:$0xff] %v5287_v62  ;;  %v5300_v15 = vadd.f32 %v9428_v53, %v5287_v62  ;;  %5301 = vmax.xlane.f32.xlu0 %v5299_v10 }
 0x83b   :  { %v5176_v2 = vmax.f32 %v5170_v50, 0.0 }
 0x83c   :  { %5303 = vmax.xlane.f32.xlu1 %v5300_v15 }
 0x83d   :  { %v5483_v61 = vpack.c.bf16 %v5176_v2, %v5176_v2 }
 0x83e   :  { %5445 = vmax.xlane.f32.xlu0 %v5443_v47 }
 0x83f   :  { %6802 = vmatmul.mubr.bf16.vlgmr.msra.gmra.mrb[64].mxu1 %v5483_v61 }
 0x8c7   :  { %v5302_v29 = vpop.xlane.xlu0 %5301 }
 0x8c8   :  { %v5305_v23 = vsub.f32 %v5299_v10, %v5302_v29 }
 0x8c9   :  { %v5304_v59 = vpop.xlane.xlu1 %5303 }
 0x8ca   :  { %v5307_v33 = vmul.f32 1.442695, %v5305_v23  ;;  %v5306_v32 = vsub.f32 %v5300_v15, %v5304_v59 }
 0x8cb   :  { %v5446_v35 = vpop.xlane.xlu0 %5445 }
 0x8cc   :  { %7011 = vpow2.f32 %v5307_v33  ;;  %v5450_v8 = vsub.f32 %v5443_v47, %v5446_v35  ;;  %v5309_v56 = vmul.f32 1.442695, %v5306_v32 }
 0x8ce   :  { %v5452_v48 = vmul.f32 1.442695, %v5450_v8 }
 0x8d0   :  { %7013 = vpow2.f32 %v5452_v48 }
 0x8d1   :  { %7015 = vpow2.f32 %v5309_v56 }
 0x8d2   :  { %7017 = vpow2.f32 %v5454_v1 }
 0x8d6   :  { %v7012_v36 = vpop.eup %7011 }
 0x8d7   :  { %5311 = vadd.xlane.f32.xlu0 %v7012_v36 }
 0x8da   :  { %v7014_v58 = vpop.eup %7013 }
 0x8db   :  { %5456 = vadd.xlane.f32.xlu0 %v7014_v58  ;;  %v7016_v51 = vpop.eup %7015 }
 0x8dc   :  { %v7018_v6 = vpop.eup %7017 }
 0x8dd   :  { %v5458_v26 = vsel %vm157_vm0, %v7018_v6, 0.0 }
 0x912   :  { %v5573_v44 = vpop.f32.mrb[64].mxu1 }
 0x913   :  { %v5574_v34 = vadd.f32 %v9420_v38, %v5573_v44  ;;  %v6803_v24 = vpop.f32.mrb[65].mxu1 }
 0x914   :  { %v5576_v11 = vpop.f32.mrb[66].mxu1 }
 0x915   :  { %v5587_v4 = vadd.f32 %v9428_v53, %v5574_v34  ;;  %5579 = vst [vmem:[#allocation6] sm:$0xff] %v5574_v34  ;;  %v6804_v31 = vpop.f32.mrb[67].mxu1 }
 0x917   :  { %5588 = vmax.xlane.f32.xlu1 %v5587_v4 }
 0x91b   :  { %5313 = vadd.xlane.f32.xlu1 %v7016_v51 }
 0x91f   :  { %5459 = vadd.xlane.f32.xlu1 %v5458_v26 }
 0x964   :  { %v5312_v20 = vpop.xlane.xlu0 %5311 }
 0x965   :  { %7019 = vrcp.f32 %v5312_v20 }
 0x968   :  { %v5457_v40 = vpop.xlane.xlu0 %5456 }
 0x969   :  { %7021 = vrcp.f32 %v5457_v40 }
 0x96f   :  { %v7020_v52 = vpop.eup %7019 }
 0x970   :  { %v5317_v49 = vmul.f32 %v7020_v52, %v7012_v36 }
 0x972   :  { %5319 = vst [vmem:[#allocation7] sm:$0xff] %v5317_v49 }
 0x973   :  { %v7022_v38 = vpop.eup %7021 }
 0x974   :  { %v5463_v0 = vmul.f32 %v7022_v38, %v7014_v58 }
 0x976   :  { %5465 = vst [vmem:[#allocation9] sm:$0xff] %v5463_v0 }
 0x9a4   :  { %v5589_v53 = vpop.xlane.xlu1 %5588 }
 0x9a5   :  { %v5590_v39 = vsub.f32 %v5587_v4, %v5589_v53 }
 0x9a7   :  { %v5591_v9 = vmul.f32 1.442695, %v5590_v39 }
 0x9a8   :  { %v5314_v17 = vpop.xlane.xlu1 %5313 }
 0x9a9   :  { %7023 = vpow2.f32 %v5591_v9 }
 0x9aa   :  { %7025 = vrcp.f32 %v5314_v17 }
 0x9ac   :  { %v5460_v22 = vpop.xlane.xlu1 %5459 }
 0x9ad   :  { %7027 = vrcp.f32 %v5460_v22 }
 0x9b3   :  { %v9499_v27 = vpop.eup %7023 }
 0x9b4   :  { %v7026_v41 = vpop.eup %7025  ;;  %5593 = vadd.xlane.f32.xlu0 %v9499_v27 }
 0x9b5   :  { %v5318_v43 = vmul.f32 %v7026_v41, %v7016_v51 }
 0x9b7   :  { %v7028_v3 = vpop.eup %7027  ;;  %5320 = vst [vmem:[#allocation7 + $0x8] sm:$0xff] %v5318_v43 }
 0x9b8   :  { %v5464_v60 = vmul.f32 %v7028_v3, %v7018_v6 }
 0x9ba   :  { %5466 = vst [vmem:[#allocation9 + $0x8] sm:$0xf] %v5464_v60 }
 0x9bb   :  { %7042 = shalt.err (!%p7039_p4)
}
 0x9bc   :  { %s10275_s7 = sld [smem:[#allocation33_spill]] }
 0x9c2   :  { %s7043_s10 = scalar_lea.hbm %s10275_s7, 256 }
 0x9c3   :  { %p7044_p5 = scmp.ne.s32.totalorder %s10275_s7, %s7043_s10  ;;  %p7047_p6 = scmp.lt.u32.totalorder %s7043_s10, %s10275_s7 }
 0x9c5   :  { %p7049_p7 = pnand %p7047_p6, %p7044_p5 }
 0x9c7   :  { %7052 = shalt.err (!%p7049_p7)
}
 0x9c8   :  { %s7211_s11 = smov 128   ;;  %s7212_s15 = smov 8  }
 0x9c9   :  { %5621 = dma.vmem_to_hbm [thread:$0]  %s5616_s26, 256, %s10275_s7, [#allocation5], %s7211_s11, %s7211_s11, %s7212_s15  }
 0x9ca   :  { %s7053_s16 = scalar_lea.vmem %s9502_s1, 256  ;;  %p7058_p9 = scmp.lt.s32.totalorder %s9502_s1, %s9502_s1 }
 0x9cb   :  { %p7054_p8 = scmp.ne.s32.totalorder %s9502_s1, %s7053_s16  ;;  %p7059_p10 = scmp.lt.s32.totalorder %s7053_s16, %s7053_s16 }
 0x9cd   :  { %p7060_p11 = por %p7059_p10, %p7058_p9 }
 0x9cf   :  { %p7061_p12 = pnand %p7060_p11, %p7054_p8 }
 0x9d1   :  { %7064 = shalt.err (!%p7061_p12)
}
 0x9d2   :  { %s7065_s18 = scalar_lea.hbm %s7390_s21, 256 }
 0x9d3   :  { %p7066_p13 = scmp.ne.s32.totalorder %s7390_s21, %s7065_s18  ;;  %p7069_p0 = scmp.lt.u32.totalorder %s7065_s18, %s7390_s21 }
 0x9d5   :  { %p7071_p1 = pnand %p7069_p0, %p7066_p13 }
 0x9d7   :  { %7074 = shalt.err (!%p7071_p1)
}
 0x9d8   :  { %5643 = dma.vmem_to_hbm [thread:$0]  %s9502_s1, 256, %s7390_s21, [#allocation8], %s7211_s11, %s7211_s11, %s7212_s15  }
 0x9d9   :  { %s7213_s0 = smov [#allocation2]   ;;  %s7214_s9 = smov [#allocation6]  }
 0x9da   :  { %s5603_s5 = sshll.u32 %s7213_s0, 4  ;;  %s5628_s13 = sshll.u32 %s7214_s9, 4  ;;  %s5604_s5 = int_to_ptr.vmem [resolvable:$true] %s5603_s5  ;;  %s5629_s13 = int_to_ptr.vmem [resolvable:$true] %s5628_s13 }
 0x9db   :  { %s7075_s17 = scalar_lea.vmem %s5604_s5, 256  ;;  %p7080_p3 = scmp.lt.s32.totalorder %s5604_s5, %s5604_s5 }
 0x9dc   :  { %p7076_p2 = scmp.ne.s32.totalorder %s5604_s5, %s7075_s17  ;;  %p7081_p4 = scmp.lt.s32.totalorder %s7075_s17, %s7075_s17 }
 0x9de   :  { %p7082_p5 = por %p7081_p4, %p7080_p3 }
 0x9e0   :  { %p7083_p6 = pnand %p7082_p5, %p7076_p2 }
 0x9e2   :  { %7086 = shalt.err (!%p7083_p6)
}
 0x9e3   :  { %s10276_s25 = sld [smem:[#allocation32_spill]] }
 0x9e9   :  { %s7087_s29 = scalar_lea.hbm %s10276_s25, 256 }
 0x9ea   :  { %p7088_p7 = scmp.ne.s32.totalorder %s10276_s25, %s7087_s29  ;;  %p7091_p8 = scmp.lt.u32.totalorder %s7087_s29, %s10276_s25 }
 0x9ec   :  { %p7093_p9 = pnand %p7091_p8, %p7088_p7 }
 0x9ee   :  { %7096 = shalt.err (!%p7093_p9)
}
 0x9ef   :  { %5609 = dma.vmem_to_hbm [thread:$0]  %s5604_s5, 256, %s10276_s25, [#allocation3], %s7211_s11, %s7211_s11, %s7212_s15  }
 0x9f0   :  { %s7097_s21 = scalar_lea.vmem %s5629_s13, 128  ;;  %p7102_p11 = scmp.lt.s32.totalorder %s5629_s13, %s5629_s13 }
 0x9f1   :  { %p7098_p10 = scmp.ne.s32.totalorder %s5629_s13, %s7097_s21  ;;  %p7103_p12 = scmp.lt.s32.totalorder %s7097_s21, %s7097_s21 }
 0x9f3   :  { %p7104_p13 = por %p7103_p12, %p7102_p11 }
 0x9f5   :  { %p7105_p0 = pnand %p7104_p13, %p7098_p10 }
 0x9f7   :  { %7108 = shalt.err (!%p7105_p0)
}
 0x9f8   :  { %s7109_s14 = scalar_lea.hbm %s7385_s8, 128 }
 0x9f9   :  { %p7110_p1 = scmp.ne.s32.totalorder %s7385_s8, %s7109_s14  ;;  %p7113_p2 = scmp.lt.u32.totalorder %s7109_s14, %s7385_s8 }
 0x9fb   :  { %p7115_p3 = pnand %p7113_p2, %p7110_p1 }
 0x9fd   :  { %7118 = shalt.err (!%p7115_p3)
}
 0x9fe   :  { %5631 = dma.vmem_to_hbm [thread:$0]  %s5629_s13, 128, %s7385_s8, [#allocation5]  }
 0x9ff   :  { %s7215_s19 = smov [#allocation9]  }
 0xa00   :  { %s5649_s30 = sshll.u32 %s7215_s19, 4  ;;  %s5650_s30 = int_to_ptr.vmem [resolvable:$true] %s5649_s30 }
 0xa01   :  { %s7119_s6 = scalar_lea.vmem %s5650_s30, 256  ;;  %p7124_p5 = scmp.lt.s32.totalorder %s5650_s30, %s5650_s30 }
 0xa02   :  { %p7120_p4 = scmp.ne.s32.totalorder %s5650_s30, %s7119_s6  ;;  %p7125_p6 = scmp.lt.s32.totalorder %s7119_s6, %s7119_s6 }
 0xa04   :  { %p7126_p7 = por %p7125_p6, %p7124_p5 }
 0xa06   :  { %p7127_p8 = pnand %p7126_p7, %p7120_p4 }
 0xa08   :  { %7130 = shalt.err (!%p7127_p8)
}
 0xa09   :  { %s7131_s12 = scalar_lea.hbm %s7395_s24, 256 }
 0xa0a   :  { %p7132_p9 = scmp.ne.s32.totalorder %s7395_s24, %s7131_s12  ;;  %p7135_p10 = scmp.lt.u32.totalorder %s7131_s12, %s7395_s24 }
 0xa0c   :  { %p7137_p11 = pnand %p7135_p10, %p7132_p9 }
 0xa0e   :  { %7140 = shalt.err (!%p7137_p11)
}
 0xa0f   :  { %5655 = dma.vmem_to_hbm [thread:$0]  %s5650_s30, 256, %s7395_s24, [#allocation8], %s7211_s11, %s7211_s11, %s7212_s15  }
 0xa10   :  { %s7216_s8 = smov [#allocation10]  }
 0xa11   :  { %s5662_s27 = sshll.u32 %s7216_s8, 4  ;;  %s5663_s27 = int_to_ptr.vmem [resolvable:$true] %s5662_s27 }
 0xa12   :  { %s7141_s3 = scalar_lea.vmem %s5663_s27, 128  ;;  %p7146_p13 = scmp.lt.s32.totalorder %s5663_s27, %s5663_s27 }
 0xa13   :  { %p7142_p12 = scmp.ne.s32.totalorder %s5663_s27, %s7141_s3  ;;  %p7147_p0 = scmp.lt.s32.totalorder %s7141_s3, %s7141_s3 }
 0xa15   :  { %p7148_p1 = por %p7147_p0, %p7146_p13 }
 0xa17   :  { %p7149_p2 = pnand %p7148_p1, %p7142_p12 }
 0xa41   :  { %v5594_v19 = vpop.xlane.xlu0 %5593 }
 0xa42   :  { %7029 = vrcp.f32 %v5594_v19 }
 0xa4c   :  { %v7030_v7 = vpop.eup %7029 }
 0xa4d   :  { %v5596_v46 = vmul.f32 %v7030_v7, %v9499_v27 }
 0xa4f   :  { %5597 = vst [vmem:[#allocation10] sm:$0xff] %v5596_v46 }
 0xa50   :  { %7152 = shalt.err (!%p7149_p2)
}
 0xa51   :  { %s7153_s24 = scalar_lea.hbm %s7400_s20, 128 }
 0xa52   :  { %p7154_p3 = scmp.ne.s32.totalorder %s7400_s20, %s7153_s24  ;;  %p7157_p4 = scmp.lt.u32.totalorder %s7153_s24, %s7400_s20 }
 0xa54   :  { %p7159_p5 = pnand %p7157_p4, %p7154_p3 }
 0xa56   :  { %7162 = shalt.err (!%p7159_p5)
}
 0xa57   :  { %5665 = dma.vmem_to_hbm [thread:$0]  %s5663_s27, 128, %s7400_s20, [#allocation11]  }
 0xa58   :  { %7163 = dma.done.wait [#allocation3], 256  }
 0xa59   :  { %7164 = vsyncadd [#allocation3], 4294967040 }
 0xa5a   :  { %7165 = dma.done.wait [#allocation5], 384  }
 0xa5b   :  { %7166 = vsyncadd [#allocation5], 4294966912 }
 0xa5c   :  { %7167 = dma.done.wait [#allocation8], 512  }
 0xa5d   :  { %7168 = vsyncadd [#allocation8], 4294966784 }
 0xa5e   :  { %7169 = dma.done.wait [#allocation11], 128  }
 0xa5f   :  { %7170 = vsyncadd [#allocation11], 4294967168 }
 0xa60   :  { %5684 = vsyncpa [#allocation3], 1 }
 0xa61   :  { %5685 = vsyncpa [#allocation5], 1 }
 0xa62   :  { %5686 = vsyncpa [#allocation8], 1 }
 0xa63   :  { %5687 = vsyncpa [#allocation11], 1 }

</bundles_post_ra>
